<compile_context>
chip_gen: v5e
topology: v5e:2x2
jax: 0.10.0
libtpu: 0.0.40
codegen_flags: <defaults>
</compile_context>

<pallas_src>
import functools

import jax
import jax.numpy as jnp
from jax import lax
from jax.experimental import pallas as pl
from jax.experimental.pallas import tpu as pltpu

LANE = 128


def _round_up(n, m):
    return ((n + m - 1) // m) * m


# ----------------------------------------------------------------------------
# In-kernel helpers (values only — never refs)
# ----------------------------------------------------------------------------
def _im2col_3x3(xp, h, w):
    """xp: (h+2, w+2, c) spatially padded value -> (h*w, 9*c) tap-major im2col."""
    c = xp.shape[-1]
    cols = []
    for dy in range(3):
        for dx in range(3):
            win = lax.slice(xp, (dy, dx, 0), (dy + h, dx + w, c))
            cols.append(win.reshape(h * w, c))
    return jnp.concatenate(cols, axis=-1)


def _maxpool_2x2(y, h, w):
    """y: (h*w, c) conv output, rows row-major over (h, w) -> (h//2, w//2, c)."""
    c = y.shape[-1]
    y = jnp.max(y.reshape(h * w // 2, 2, c), axis=1)        # horizontal pairs
    y = jnp.max(y.reshape(h // 2, 2, w // 2, c), axis=1)    # vertical pairs
    return y


def _conv_block(lhs_bf16, w_ref, b_ref, h, w):
    """Fused conv3x3 + bias + ReLU + 2x2 maxpool: one matmul, K = taps*Cin."""
    y = jnp.dot(lhs_bf16, w_ref[...], preferred_element_type=jnp.float32)
    y = jnp.maximum(y + b_ref[...], 0.0)
    return _maxpool_2x2(y, h, w)                              # f32


# ----------------------------------------------------------------------------
# Pallas kernels
# ----------------------------------------------------------------------------
def conv_stack_kernel(x_ref, w1_ref, b1_ref, w2_ref, b2_ref, w3_ref, b3_ref,
                      o_ref, s1_ref, s2_ref, *, H, W):
    """All three VGG-style blocks for ONE image, entirely in VMEM.

    x_ref:  (1, H*W, K1)  layer-1 im2col (bf16), K1 = 9*Cin padded
    w*_ref: (K, 128)      conv weights, taps concatenated along K (bf16)
    b*_ref: (1, 128)      biases (f32, zero in padded lanes)
    o_ref:  (1, (H//8)*(W//8), 128)  flattened (h, w, c) features (f32)
    s1/s2:  zero-bordered bf16 VMEM scratch holding pooled activations + halo
    """
    h2, w2 = H // 2, W // 2
    h4, w4 = H // 4, W // 4
    h8, w8 = H // 8, W // 8
    cp = o_ref.shape[-1]

    # ---- block 1 (input arrives already im2col'ed from the wrapper) --------
    lhs = x_ref[...].reshape(H * W, x_ref.shape[-1])
    p = _conv_block(lhs, w1_ref, b1_ref, H, W)                # (h2, w2, cp)

    # zero-bordered halo for block 2 (static-slice store only)
    s1_ref[...] = jnp.zeros(s1_ref.shape, s1_ref.dtype)
    s1_ref[1:h2 + 1, 1:w2 + 1, :] = p.astype(s1_ref.dtype)

    # ---- block 2 ------------------------------------------------------------
    lhs = _im2col_3x3(s1_ref[...], h2, w2)                    # (h2*w2, 9*cp) bf16
    p = _conv_block(lhs, w2_ref, b2_ref, h2, w2)              # (h4, w4, cp)

    s2_ref[...] = jnp.zeros(s2_ref.shape, s2_ref.dtype)
    s2_ref[1:h4 + 1, 1:w4 + 1, :] = p.astype(s2_ref.dtype)

    # ---- block 3 ------------------------------------------------------------
    lhs = _im2col_3x3(s2_ref[...], h4, w4)
    p = _conv_block(lhs, w3_ref, b3_ref, h4, w4)              # (h8, w8, cp)

    # emit already flattened in (h, w, c) order; the NCHW-flatten permutation
    # is folded into the first classifier weight, so no transpose is needed.
    o_ref[...] = p.reshape(1, h8 * w8, cp)


def head_kernel(x_ref, w1_ref, b1_ref, w2_ref, b2_ref, we_ref, be_ref,
                cls_ref, enc_ref, code_ref):
    """Fused classifier (Linear+ReLU x2) + fc_encode + Bihalf hash."""
    x = x_ref[...].astype(jnp.bfloat16)
    h1 = jnp.dot(x, w1_ref[...], preferred_element_type=jnp.float32) + b1_ref[...]
    h1 = jnp.maximum(h1, 0.0)
    h2 = jnp.dot(h1.astype(jnp.bfloat16), w2_ref[...],
                 preferred_element_type=jnp.float32) + b2_ref[...]
    h2 = jnp.maximum(h2, 0.0)
    cls_ref[...] = h2

    enc = jnp.dot(h2.astype(jnp.bfloat16), we_ref[...],
                  preferred_element_type=jnp.float32) + be_ref[...]
    enc_ref[...] = enc

    # Bihalf hash: per column, the N//2 largest entries -> +1, rest -> -1.
    # Rank count with a stable index tie-break (== stable descending sort +
    # scatter of [+1...,-1...]).  N = batch is tiny and static -> fully
    # unrolled broadcast compares on values (no loop, no enc_ref read-back).
    # NOTE: padded lanes (>= encode_length) hold ±1 garbage; sliced off outside.
    n, d = enc.shape
    row_id = lax.broadcasted_iota(jnp.int32, (n, d), 0)
    counts = jnp.zeros((n, d), jnp.float32)
    for j in range(n):
        row_j = enc[j:j + 1, :]                               # (1, d), f32 exact
        beats = jnp.logical_or(row_j > enc,
                               jnp.logical_and(row_j == enc, row_id > j))
        counts = counts + beats.astype(jnp.float32)
    code_ref[...] = jnp.where(counts < n // 2, 1.0, -1.0).astype(code_ref.dtype)


# ----------------------------------------------------------------------------
# Pallas wrappers
# ----------------------------------------------------------------------------
def conv_stack(x_nchw, conv_params, *, feat_hw):
    """Entire features() stack in one pallas_call, grid over batch."""
    assert len(conv_params) == 3
    (w1, b1), (w2, b2), (w3, b3) = conv_params
    b, c, h, w = x_nchw.shape
    k1 = w1.shape[0]
    cp = w1.shape[1]
    out_hw = feat_hw * feat_hw

    # Layer-1 im2col is done once in the wrapper (cheap XLA work on the tiny
    # network input): K = 9*Cin = 27, padded to k1, cast to bf16 at the HBM
    # boundary so the kernel's first conv is a single lane-dense matmul.
    x = jnp.transpose(x_nchw, (0, 2, 3, 1))                   # NCHW -> NHWC
    xp = jnp.pad(x, ((0, 0), (1, 1), (1, 1), (0, 0)))
    cols = [xp[:, dy:dy + h, dx:dx + w, :].reshape(b, h * w, c)
            for dy in range(3) for dx in range(3)]
    lhs = jnp.concatenate(cols, axis=-1)                      # (B, H*W, 9*C)
    lhs = jnp.pad(lhs, ((0, 0), (0, 0), (0, k1 - 9 * c))).astype(jnp.bfloat16)

    s1_shape = (h // 2 + 2, w // 2 + 2, cp)                   # pooled + 1px halo
    s2_shape = (h // 4 + 2, w // 4 + 2, cp)

    kernel = functools.partial(conv_stack_kernel, H=h, W=w)
    # NOTE(v7x scaling): at real VGG sizes the full-image block would need
    # row-strip tiling + explicit vmem_limit_bytes; at this toy size everything
    # (weights ~0.6 MiB + activations <1 MiB) fits the default scoped VMEM.
    return pl.pallas_call(
        kernel,
        out_shape=jax.ShapeDtypeStruct((b, out_hw, cp), jnp.float32),
        grid=(b,),
        in_specs=[
            pl.BlockSpec((1, h * w, k1), lambda i: (i, 0, 0)),
            pl.BlockSpec(w1.shape, lambda i: (0, 0)),
            pl.BlockSpec(b1.shape, lambda i: (0, 0)),
            pl.BlockSpec(w2.shape, lambda i: (0, 0)),
            pl.BlockSpec(b2.shape, lambda i: (0, 0)),
            pl.BlockSpec(w3.shape, lambda i: (0, 0)),
            pl.BlockSpec(b3.shape, lambda i: (0, 0)),
        ],
        out_specs=pl.BlockSpec((1, out_hw, cp), lambda i: (i, 0, 0)),
        scratch_shapes=[
            pltpu.VMEM(s1_shape, jnp.bfloat16),
            pltpu.VMEM(s2_shape, jnp.bfloat16),
        ],
        compiler_params=pltpu.CompilerParams(
            dimension_semantics=("parallel",)),   # batch -> 2 TCs on v7x
    )(lhs, w1, b1, w2, b2, w3, b3)


def _full_spec(arr):
    # Explicit full-array VMEM-resident block (gridless call -> 0-arg index map).
    return pl.BlockSpec(arr.shape, lambda: (0,) * arr.ndim)


def head(x_flat, head_params):
    """classifier + fc_encode + hash in one gridless kernel (all fits VMEM)."""
    w1, b1, w2, b2, we, be = head_params
    b = x_flat.shape[0]
    hpad = w1.shape[1]
    epad = we.shape[1]
    args = (x_flat, w1, b1, w2, b2, we, be)
    return pl.pallas_call(
        head_kernel,
        out_shape=(
            jax.ShapeDtypeStruct((b, hpad), jnp.float32),   # classifier out
            jax.ShapeDtypeStruct((b, epad), jnp.float32),   # fc_encode out
            jax.ShapeDtypeStruct((b, epad), jnp.float32),   # hash codes
        ),
        in_specs=[_full_spec(a) for a in args],
        out_specs=(
            pl.BlockSpec((b, hpad), lambda: (0, 0)),
            pl.BlockSpec((b, epad), lambda: (0, 0)),
            pl.BlockSpec((b, epad), lambda: (0, 0)),
        ),
    )(*args)


def cnn_forward(x_nchw, params, *, hidden, encode_length, feat_hw):
    """Mirrors CNN.forward: features -> flatten -> classifier -> fc_encode -> hash."""
    feat = conv_stack(x_nchw, params["convs"], feat_hw=feat_hw)   # (B, fh*fw, CP)
    x_flat = feat.reshape(feat.shape[0], -1)                      # (h, w, c) order
    cls_p, enc_p, code_p = head(x_flat, params["head"])
    return (cls_p[:, :hidden], enc_p[:, :encode_length], code_p[:, :encode_length])


# ----------------------------------------------------------------------------
# Parameters: logical (PyTorch-like) weights + Pallas-layout preparation
# ----------------------------------------------------------------------------
def make_logical_params(key, in_ch, conv_channels, hidden, encode_length, feat_hw):
    """Deterministic synthetic weights (stand-in for pretrained VGG16)."""
    params = {"convs": [], "cls": [], "enc": None}
    cin = in_ch
    for cout in conv_channels:
        key, kw, kb = jax.random.split(key, 3)
        w = jax.random.normal(kw, (cout, cin, 3, 3), jnp.float32) / jnp.sqrt(9.0 * cin)
        b = 0.1 * jax.random.normal(kb, (cout,), jnp.float32)
        params["convs"].append((w, b))
        cin = cout
    flat = cin * feat_hw * feat_hw
    dims = (flat, hidden, hidden)
    for i in range(2):
        key, kw, kb = jax.random.split(key, 3)
        w = jax.random.normal(kw, (dims[i], dims[i + 1]), jnp.float32) / jnp.sqrt(float(dims[i]))
        b = 0.1 * jax.random.normal(kb, (dims[i + 1],), jnp.float32)
        params["cls"].append((w, b))
    key, kw, kb = jax.random.split(key, 3)
    we = jax.random.normal(kw, (hidden, encode_length), jnp.float32) / jnp.sqrt(float(hidden))
    be = 0.1 * jax.random.normal(kb, (encode_length,), jnp.float32)
    params["enc"] = (we, be)
    return params


def prepare_pallas_params(logical, in_ch, feat_hw):
    """Logical weights -> Pallas layouts: taps concatenated along K, bf16 MXU
    operands, 128-lane zero padding, flatten permutation folded into w1."""
    pp = {"convs": [], "head": None}
    cin_log = in_ch
    first = True
    for (w, b) in logical["convs"]:
        cout = w.shape[0]
        cout_pad = _round_up(cout, LANE)
        if first:
            # layer 1: K = 9 * Cin (27), padded up -> matches the wrapper im2col
            k = 9 * cin_log
            kpad = _round_up(k, 32)
            taps = jnp.transpose(w, (2, 3, 1, 0)).reshape(k, cout)  # (dy,dx,ci)->rows
            wt = jnp.zeros((kpad, cout_pad), jnp.float32).at[:k, :cout].set(taps)
            first = False
        else:
            cin_pad = _round_up(cin_log, LANE)
            taps = jnp.zeros((3, 3, cin_pad, cout_pad), jnp.float32)
            taps = taps.at[:, :, :cin_log, :cout].set(jnp.transpose(w, (2, 3, 1, 0)))
            wt = taps.reshape(9 * cin_pad, cout_pad)
        bias = jnp.zeros((1, cout_pad), jnp.float32).at[0, :cout].set(b)
        pp["convs"].append((wt.astype(jnp.bfloat16), bias))
        cin_log = cout

    cin_pad = _round_up(cin_log, LANE)
    (w1, b1), (w2, b2) = logical["cls"]
    we, be = logical["enc"]
    hidden = w1.shape[1]
    enc_len = we.shape[1]
    hpad = _round_up(hidden, LANE)
    epad = _round_up(enc_len, LANE)
    # Fold NCHW-flatten permutation + channel padding into w1 so activations
    # stay (h, w, c)-flattened (no transpose between conv stack and head).
    w1_chw = w1.reshape(cin_log, feat_hw, feat_hw, hidden)        # (C,H,W,hid)
    w1_hwc = jnp.transpose(w1_chw, (1, 2, 0, 3))                  # (H,W,C,hid)
    w1p = jnp.zeros((feat_hw, feat_hw, cin_pad, hpad), jnp.float32)
    w1p = w1p.at[:, :, :cin_log, :hidden].set(w1_hwc)
    w1p = w1p.reshape(feat_hw * feat_hw * cin_pad, hpad)
    b1p = jnp.zeros((1, hpad), jnp.float32).at[0, :hidden].set(b1)
    w2p = jnp.zeros((hpad, hpad), jnp.float32).at[:hidden, :hidden].set(w2)
    b2p = jnp.zeros((1, hpad), jnp.float32).at[0, :hidden].set(b2)
    wep = jnp.zeros((hpad, epad), jnp.float32).at[:hidden, :enc_len].set(we)
    bep = jnp.zeros((1, epad), jnp.float32).at[0, :enc_len].set(be)
    pp["head"] = (w1p.astype(jnp.bfloat16), b1p, w2p.astype(jnp.bfloat16), b2p,
                  wep.astype(jnp.bfloat16), bep)
    return pp


# ----------------------------------------------------------------------------
# Pure-JAX f32 reference (for correctness checking)
# ----------------------------------------------------------------------------
def reference_forward(x_nchw, logical):
    x = x_nchw
    for (w, b) in logical["convs"]:
        x = lax.conv_general_dilated(
            x, w, window_strides=(1, 1), padding=((1, 1), (1, 1)),
            dimension_numbers=("NCHW", "OIHW", "NCHW"))
        x = jnp.maximum(x + b[None, :, None, None], 0.0)
        x = lax.reduce_window(x, -jnp.inf, lax.max,
                              (1, 1, 2, 2), (1, 1, 2, 2), "VALID")
    x = x.reshape(x.shape[0], -1)                     # NCHW flatten
    for (w, b) in logical["cls"]:
        x = jnp.maximum(x @ w + b, 0.0)               # Dropout = identity (eval)
    we, be = logical["enc"]
    h = x @ we + be
    return x, h


def reference_hash(h):
    """Same rank count + stable index tie-break as the kernel (exact match)."""
    n = h.shape[0]
    hi = h[:, None, :]
    hj = h[None, :, :]
    ii = jnp.arange(n)[:, None, None]
    jj = jnp.arange(n)[None, :, None]
    beats = (hj > hi) | ((hj == hi) & (jj < ii))
    counts = beats.sum(axis=1)
    return jnp.where(counts < n // 2, 1.0, -1.0).astype(h.dtype)


# ----------------------------------------------------------------------------
if __name__ == "__main__":
    key = jax.random.PRNGKey(0)
    k_in, k_par = jax.random.split(key)

    # Small shapes mirroring the VGG16-based CNN at toy scale.
    B, C, H, W = 2, 3, 16, 16
    conv_channels = (8, 16, 32)                 # 3 blocks: 16 -> 8 -> 4 -> 2 spatial
    hidden = 64                                 # stands in for VGG's 4096
    encode_length = 16
    feat_hw = H // (2 ** len(conv_channels))    # 2

    x_in = jax.random.normal(k_in, (B, C, H, W), jnp.float32)
    logical = make_logical_params(k_par, C, conv_channels, hidden,
                                  encode_length, feat_hw)
    pparams = prepare_pallas_params(logical, C, feat_hw)

    fwd = jax.jit(functools.partial(cnn_forward, hidden=hidden,
                                    encode_length=encode_length,
                                    feat_hw=feat_hw))
    feats, h_out, b_out = fwd(x_in, pparams)
    jax.block_until_ready((feats, h_out, b_out))

    # Shape + numerical checks vs a pure-JAX f32 reference (bf16 MXU operands
    # in the kernels -> generous tolerance), plus exact hash invariants.
    ref_feats, ref_h = reference_forward(x_in, logical)
    assert feats.shape == (B, hidden)
    assert h_out.shape == (B, encode_length)
    assert b_out.shape == (B, encode_length)
    assert bool(jnp.allclose(feats, ref_feats, rtol=5e-2, atol=5e-2))
    assert bool(jnp.allclose(h_out, ref_h, rtol=5e-2, atol=5e-2))
    assert bool(jnp.all(jnp.abs(b_out) == 1.0))
    assert bool(jnp.all(jnp.sum(b_out, axis=0) == 0.0))       # exactly half +1
    assert bool(jnp.array_equal(b_out, reference_hash(h_out)))

    print("KERNEL_OK")
</pallas_src>

<mosaic_0001>
module attributes {stable_mosaic.version = 11 : i64} {
  func.func @head_kernel(%arg0: memref<2x512xf32, #tpu.memory_space<vmem>>, %arg1: memref<512x128xbf16, #tpu.memory_space<vmem>>, %arg2: memref<1x128xf32, #tpu.memory_space<vmem>>, %arg3: memref<128x128xbf16, #tpu.memory_space<vmem>>, %arg4: memref<1x128xf32, #tpu.memory_space<vmem>>, %arg5: memref<128x128xbf16, #tpu.memory_space<vmem>>, %arg6: memref<1x128xf32, #tpu.memory_space<vmem>>, %arg7: memref<2x128xf32, #tpu.memory_space<vmem>>, %arg8: memref<2x128xf32, #tpu.memory_space<vmem>>, %arg9: memref<2x128xf32, #tpu.memory_space<vmem>>) attributes {dimension_semantics = [], scalar_prefetch = 0 : i64, scratch_operands = 0 : i64, tpu.core_type = #tpu.core_type<tc>} {
    %c0 = arith.constant 0 : index
    %c0_0 = arith.constant 0 : index
    %0 = vector.load %arg0[%c0, %c0_0] : memref<2x512xf32, #tpu.memory_space<vmem>>, vector<2x512xf32>
    %1 = arith.truncf %0 : vector<2x512xf32> to vector<2x512xbf16>
    %c0_1 = arith.constant 0 : index
    %c0_2 = arith.constant 0 : index
    %2 = vector.load %arg1[%c0_1, %c0_2] : memref<512x128xbf16, #tpu.memory_space<vmem>>, vector<512x128xbf16>
    %cst = arith.constant dense<0.000000e+00> : vector<2x128xf32>
    %3 = tpu.matmul %1, %2, %cst {dimension_numbers = #tpu.dot_dimension_numbers<[1], [0], [0], [1], [0, 0, 1, 1], [], []>} : vector<2x512xbf16>, vector<512x128xbf16>, vector<2x128xf32> -> vector<2x128xf32>
    %c0_3 = arith.constant 0 : index
    %c0_4 = arith.constant 0 : index
    %4 = vector.load %arg2[%c0_3, %c0_4] : memref<1x128xf32, #tpu.memory_space<vmem>>, vector<1x128xf32>
    %5 = vector.broadcast %4 : vector<1x128xf32> to vector<2x128xf32>
    %6 = arith.addf %3, %5 : vector<2x128xf32>
    %cst_5 = arith.constant 0.000000e+00 : f32
    %7 = vector.broadcast %cst_5 : f32 to vector<2x128xf32>
    %8 = arith.maximumf %6, %7 : vector<2x128xf32>
    %9 = arith.truncf %8 : vector<2x128xf32> to vector<2x128xbf16>
    %c0_6 = arith.constant 0 : index
    %c0_7 = arith.constant 0 : index
    %10 = vector.load %arg3[%c0_6, %c0_7] : memref<128x128xbf16, #tpu.memory_space<vmem>>, vector<128x128xbf16>
    %cst_8 = arith.constant dense<0.000000e+00> : vector<2x128xf32>
    %11 = tpu.matmul %9, %10, %cst_8 {dimension_numbers = #tpu.dot_dimension_numbers<[1], [0], [0], [1], [0, 0, 1, 1], [], []>} : vector<2x128xbf16>, vector<128x128xbf16>, vector<2x128xf32> -> vector<2x128xf32>
    %c0_9 = arith.constant 0 : index
    %c0_10 = arith.constant 0 : index
    %12 = vector.load %arg4[%c0_9, %c0_10] : memref<1x128xf32, #tpu.memory_space<vmem>>, vector<1x128xf32>
    %13 = vector.broadcast %12 : vector<1x128xf32> to vector<2x128xf32>
    %14 = arith.addf %11, %13 : vector<2x128xf32>
    %cst_11 = arith.constant 0.000000e+00 : f32
    %15 = vector.broadcast %cst_11 : f32 to vector<2x128xf32>
    %16 = arith.maximumf %14, %15 : vector<2x128xf32>
    %c0_12 = arith.constant 0 : index
    %c0_13 = arith.constant 0 : index
    %17 = vector.load %arg7[%c0_12, %c0_13] : memref<2x128xf32, #tpu.memory_space<vmem>>, vector<2x128xf32>
    tpu.vector_store %arg7[%c0_12, %c0_13], %16 {strides = array<i32>} : memref<2x128xf32, #tpu.memory_space<vmem>>, vector<2x128xf32>,
    %18 = arith.truncf %16 : vector<2x128xf32> to vector<2x128xbf16>
    %c0_14 = arith.constant 0 : index
    %c0_15 = arith.constant 0 : index
    %19 = vector.load %arg5[%c0_14, %c0_15] : memref<128x128xbf16, #tpu.memory_space<vmem>>, vector<128x128xbf16>
    %cst_16 = arith.constant dense<0.000000e+00> : vector<2x128xf32>
    %20 = tpu.matmul %18, %19, %cst_16 {dimension_numbers = #tpu.dot_dimension_numbers<[1], [0], [0], [1], [0, 0, 1, 1], [], []>} : vector<2x128xbf16>, vector<128x128xbf16>, vector<2x128xf32> -> vector<2x128xf32>
    %c0_17 = arith.constant 0 : index
    %c0_18 = arith.constant 0 : index
    %21 = vector.load %arg6[%c0_17, %c0_18] : memref<1x128xf32, #tpu.memory_space<vmem>>, vector<1x128xf32>
    %22 = vector.broadcast %21 : vector<1x128xf32> to vector<2x128xf32>
    %23 = arith.addf %20, %22 : vector<2x128xf32>
    %c0_19 = arith.constant 0 : index
    %c0_20 = arith.constant 0 : index
    %24 = vector.load %arg8[%c0_19, %c0_20] : memref<2x128xf32, #tpu.memory_space<vmem>>, vector<2x128xf32>
    tpu.vector_store %arg8[%c0_19, %c0_20], %23 {strides = array<i32>} : memref<2x128xf32, #tpu.memory_space<vmem>>, vector<2x128xf32>,
    %25 = tpu.iota {dimensions = array<i32: 0>} : vector<2x128xi32>
    %cst_21 = arith.constant 0.000000e+00 : f32
    %26 = vector.broadcast %cst_21 : f32 to vector<2x128xf32>
    %27 = vector.extract_strided_slice %23 {offsets = [0, 0], sizes = [1, 128], strides = [1, 1]} : vector<2x128xf32> to vector<1x128xf32>
    %28 = vector.broadcast %27 : vector<1x128xf32> to vector<2x128xf32>
    %29 = arith.cmpf ogt, %28, %23 : vector<2x128xf32>
    %30 = vector.broadcast %27 : vector<1x128xf32> to vector<2x128xf32>
    %31 = arith.cmpf oeq, %30, %23 : vector<2x128xf32>
    %c0_i32 = arith.constant 0 : i32
    %32 = vector.broadcast %c0_i32 : i32 to vector<2x128xi32>
    %33 = arith.cmpi sgt, %25, %32 : vector<2x128xi32>
    %34 = arith.andi %31, %33 : vector<2x128xi1>
    %35 = arith.ori %29, %34 : vector<2x128xi1>
    %36 = arith.extui %35 : vector<2x128xi1> to vector<2x128xi32>
    %37 = arith.sitofp %36 : vector<2x128xi32> to vector<2x128xf32>
    %38 = arith.addf %26, %37 : vector<2x128xf32>
    %39 = vector.extract_strided_slice %23 {offsets = [1, 0], sizes = [1, 128], strides = [1, 1]} : vector<2x128xf32> to vector<1x128xf32>
    %40 = vector.broadcast %39 : vector<1x128xf32> to vector<2x128xf32>
    %41 = arith.cmpf ogt, %40, %23 : vector<2x128xf32>
    %42 = vector.broadcast %39 : vector<1x128xf32> to vector<2x128xf32>
    %43 = arith.cmpf oeq, %42, %23 : vector<2x128xf32>
    %c1_i32 = arith.constant 1 : i32
    %44 = vector.broadcast %c1_i32 : i32 to vector<2x128xi32>
    %45 = arith.cmpi sgt, %25, %44 : vector<2x128xi32>
    %46 = arith.andi %43, %45 : vector<2x128xi1>
    %47 = arith.ori %41, %46 : vector<2x128xi1>
    %48 = arith.extui %47 : vector<2x128xi1> to vector<2x128xi32>
    %49 = arith.sitofp %48 : vector<2x128xi32> to vector<2x128xf32>
    %50 = arith.addf %38, %49 : vector<2x128xf32>
    %cst_22 = arith.constant 1.000000e+00 : f32
    %51 = vector.broadcast %cst_22 : f32 to vector<2x128xf32>
    %52 = arith.cmpf olt, %50, %51 : vector<2x128xf32>
    %cst_23 = arith.constant 1.000000e+00 : f32
    %cst_24 = arith.constant -1.000000e+00 : f32
    %53 = vector.broadcast %cst_23 : f32 to vector<2x128xf32>
    %54 = vector.broadcast %cst_24 : f32 to vector<2x128xf32>
    %55 = arith.select %52, %53, %54 : vector<2x128xi1>, vector<2x128xf32>
    %c0_25 = arith.constant 0 : index
    %c0_26 = arith.constant 0 : index
    %56 = vector.load %arg9[%c0_25, %c0_26] : memref<2x128xf32, #tpu.memory_space<vmem>>, vector<2x128xf32>
    tpu.vector_store %arg9[%c0_25, %c0_26], %55 {strides = array<i32>} : memref<2x128xf32, #tpu.memory_space<vmem>>, vector<2x128xf32>,
    return
  }
}

module attributes {stable_mosaic.version = 11 : i64} {
  func.func @conv_stack_kernel(%arg0: i32, %arg1: memref<1x256x32xbf16, #tpu.memory_space<vmem>>, %arg2: memref<32x128xbf16, #tpu.memory_space<vmem>>, %arg3: memref<1x128xf32, #tpu.memory_space<vmem>>, %arg4: memref<1152x128xbf16, #tpu.memory_space<vmem>>, %arg5: memref<1x128xf32, #tpu.memory_space<vmem>>, %arg6: memref<1152x128xbf16, #tpu.memory_space<vmem>>, %arg7: memref<1x128xf32, #tpu.memory_space<vmem>>, %arg8: memref<1x4x128xf32, #tpu.memory_space<vmem>>, %arg9: memref<10x10x128xbf16, #tpu.memory_space<vmem>>, %arg10: memref<6x6x128xbf16, #tpu.memory_space<vmem>>) attributes {dimension_semantics = [#tpu.dimension_semantics<parallel>], iteration_bounds = array<i64: 2>, scalar_prefetch = 0 : i64, scratch_operands = 2 : i64, tpu.core_type = #tpu.core_type<tc>, window_params = [{transform_indices = @transform_0, window_bounds = array<i64: 1, 256, 32>}, {pipeline_mode = #tpu.pipeline_mode<synchronous>, transform_indices = @transform_1, window_bounds = array<i64: 32, 128>}, {pipeline_mode = #tpu.pipeline_mode<synchronous>, transform_indices = @transform_2, window_bounds = array<i64: 1, 128>}, {pipeline_mode = #tpu.pipeline_mode<synchronous>, transform_indices = @transform_3, window_bounds = array<i64: 1152, 128>}, {pipeline_mode = #tpu.pipeline_mode<synchronous>, transform_indices = @transform_4, window_bounds = array<i64: 1, 128>}, {pipeline_mode = #tpu.pipeline_mode<synchronous>, transform_indices = @transform_5, window_bounds = array<i64: 1152, 128>}, {pipeline_mode = #tpu.pipeline_mode<synchronous>, transform_indices = @transform_6, window_bounds = array<i64: 1, 128>}, {transform_indices = @transform_7, window_bounds = array<i64: 1, 4, 128>}]} {
    %c0 = arith.constant 0 : index
    %c0_0 = arith.constant 0 : index
    %c0_1 = arith.constant 0 : index
    %0 = vector.load %arg1[%c0, %c0_0, %c0_1] : memref<1x256x32xbf16, #tpu.memory_space<vmem>>, vector<1x256x32xbf16>
    %1 = vector.shape_cast %0 : vector<1x256x32xbf16> to vector<256x32xbf16>
    %c0_2 = arith.constant 0 : index
    %c0_3 = arith.constant 0 : index
    %2 = vector.load %arg2[%c0_2, %c0_3] : memref<32x128xbf16, #tpu.memory_space<vmem>>, vector<32x128xbf16>
    %cst = arith.constant dense<0.000000e+00> : vector<256x128xf32>
    %3 = tpu.matmul %1, %2, %cst {dimension_numbers = #tpu.dot_dimension_numbers<[1], [0], [0], [1], [0, 0, 1, 1], [], []>} : vector<256x32xbf16>, vector<32x128xbf16>, vector<256x128xf32> -> vector<256x128xf32>
    %c0_4 = arith.constant 0 : index
    %c0_5 = arith.constant 0 : index
    %4 = vector.load %arg3[%c0_4, %c0_5] : memref<1x128xf32, #tpu.memory_space<vmem>>, vector<1x128xf32>
    %5 = vector.broadcast %4 : vector<1x128xf32> to vector<256x128xf32>
    %6 = arith.addf %3, %5 : vector<256x128xf32>
    %cst_6 = arith.constant 0.000000e+00 : f32
    %7 = vector.broadcast %cst_6 : f32 to vector<256x128xf32>
    %8 = arith.maximumf %6, %7 : vector<256x128xf32>
    %9 = vector.shape_cast %8 : vector<256x128xf32> to vector<128x2x128xf32>
    %cst_7 = arith.constant dense<0xFF800000> : vector<128x128xf32>
    %10 = vector.multi_reduction <maximumf>, %9, %cst_7 [1] : vector<128x2x128xf32> to vector<128x128xf32>
    %11 = vector.shape_cast %10 : vector<128x128xf32> to vector<8x2x8x128xf32>
    %cst_8 = arith.constant dense<0xFF800000> : vector<8x8x128xf32>
    %12 = vector.multi_reduction <maximumf>, %11, %cst_8 [1] : vector<8x2x8x128xf32> to vector<8x8x128xf32>
    %cst_9 = arith.constant 0.000000e+00 : bf16
    %13 = vector.broadcast %cst_9 : bf16 to vector<10x10x128xbf16>
    %c0_10 = arith.constant 0 : index
    %c0_11 = arith.constant 0 : index
    %c0_12 = arith.constant 0 : index
    %14 = vector.load %arg9[%c0_10, %c0_11, %c0_12] : memref<10x10x128xbf16, #tpu.memory_space<vmem>>, vector<10x10x128xbf16>
    tpu.vector_store %arg9[%c0_10, %c0_11, %c0_12], %13 {strides = array<i32>} : memref<10x10x128xbf16, #tpu.memory_space<vmem>>, vector<10x10x128xbf16>,
    %15 = arith.truncf %12 : vector<8x8x128xf32> to vector<8x8x128xbf16>
    %c1 = arith.constant 1 : index
    %c1_13 = arith.constant 1 : index
    %c0_14 = arith.constant 0 : index
    %16 = vector.load %arg9[%c1, %c1_13, %c0_14] : memref<10x10x128xbf16, #tpu.memory_space<vmem>>, vector<8x8x128xbf16>
    tpu.vector_store %arg9[%c1, %c1_13, %c0_14], %15 {strides = array<i32>} : memref<10x10x128xbf16, #tpu.memory_space<vmem>>, vector<8x8x128xbf16>,
    %c0_15 = arith.constant 0 : index
    %c0_16 = arith.constant 0 : index
    %c0_17 = arith.constant 0 : index
    %17 = vector.load %arg9[%c0_15, %c0_16, %c0_17] : memref<10x10x128xbf16, #tpu.memory_space<vmem>>, vector<10x10x128xbf16>
    %18 = vector.extract_strided_slice %17 {offsets = [0, 0, 0], sizes = [8, 8, 128], strides = [1, 1, 1]} : vector<10x10x128xbf16> to vector<8x8x128xbf16>
    %19 = vector.shape_cast %18 : vector<8x8x128xbf16> to vector<64x128xbf16>
    %20 = vector.extract_strided_slice %17 {offsets = [0, 1, 0], sizes = [8, 8, 128], strides = [1, 1, 1]} : vector<10x10x128xbf16> to vector<8x8x128xbf16>
    %21 = vector.shape_cast %20 : vector<8x8x128xbf16> to vector<64x128xbf16>
    %22 = vector.extract_strided_slice %17 {offsets = [0, 2, 0], sizes = [8, 8, 128], strides = [1, 1, 1]} : vector<10x10x128xbf16> to vector<8x8x128xbf16>
    %23 = vector.shape_cast %22 : vector<8x8x128xbf16> to vector<64x128xbf16>
    %24 = vector.extract_strided_slice %17 {offsets = [1, 0, 0], sizes = [8, 8, 128], strides = [1, 1, 1]} : vector<10x10x128xbf16> to vector<8x8x128xbf16>
    %25 = vector.shape_cast %24 : vector<8x8x128xbf16> to vector<64x128xbf16>
    %26 = vector.extract_strided_slice %17 {offsets = [1, 1, 0], sizes = [8, 8, 128], strides = [1, 1, 1]} : vector<10x10x128xbf16> to vector<8x8x128xbf16>
    %27 = vector.shape_cast %26 : vector<8x8x128xbf16> to vector<64x128xbf16>
    %28 = vector.extract_strided_slice %17 {offsets = [1, 2, 0], sizes = [8, 8, 128], strides = [1, 1, 1]} : vector<10x10x128xbf16> to vector<8x8x128xbf16>
    %29 = vector.shape_cast %28 : vector<8x8x128xbf16> to vector<64x128xbf16>
    %30 = vector.extract_strided_slice %17 {offsets = [2, 0, 0], sizes = [8, 8, 128], strides = [1, 1, 1]} : vector<10x10x128xbf16> to vector<8x8x128xbf16>
    %31 = vector.shape_cast %30 : vector<8x8x128xbf16> to vector<64x128xbf16>
    %32 = vector.extract_strided_slice %17 {offsets = [2, 1, 0], sizes = [8, 8, 128], strides = [1, 1, 1]} : vector<10x10x128xbf16> to vector<8x8x128xbf16>
    %33 = vector.shape_cast %32 : vector<8x8x128xbf16> to vector<64x128xbf16>
    %34 = vector.extract_strided_slice %17 {offsets = [2, 2, 0], sizes = [8, 8, 128], strides = [1, 1, 1]} : vector<10x10x128xbf16> to vector<8x8x128xbf16>
    %35 = vector.shape_cast %34 : vector<8x8x128xbf16> to vector<64x128xbf16>
    %36 = tpu.concatenate %19, %21, %23, %25, %27, %29, %31, %33, %35 in 1 : vector<64x128xbf16>, vector<64x128xbf16>, vector<64x128xbf16>, vector<64x128xbf16>, vector<64x128xbf16>, vector<64x128xbf16>, vector<64x128xbf16>, vector<64x128xbf16>, vector<64x128xbf16> -> vector<64x1152xbf16>
    %c0_18 = arith.constant 0 : index
    %c0_19 = arith.constant 0 : index
    %37 = vector.load %arg4[%c0_18, %c0_19] : memref<1152x128xbf16, #tpu.memory_space<vmem>>, vector<1152x128xbf16>
    %cst_20 = arith.constant dense<0.000000e+00> : vector<64x128xf32>
    %38 = tpu.matmul %36, %37, %cst_20 {dimension_numbers = #tpu.dot_dimension_numbers<[1], [0], [0], [1], [0, 0, 1, 1], [], []>} : vector<64x1152xbf16>, vector<1152x128xbf16>, vector<64x128xf32> -> vector<64x128xf32>
    %c0_21 = arith.constant 0 : index
    %c0_22 = arith.constant 0 : index
    %39 = vector.load %arg5[%c0_21, %c0_22] : memref<1x128xf32, #tpu.memory_space<vmem>>, vector<1x128xf32>
    %40 = vector.broadcast %39 : vector<1x128xf32> to vector<64x128xf32>
    %41 = arith.addf %38, %40 : vector<64x128xf32>
    %cst_23 = arith.constant 0.000000e+00 : f32
    %42 = vector.broadcast %cst_23 : f32 to vector<64x128xf32>
    %43 = arith.maximumf %41, %42 : vector<64x128xf32>
    %44 = vector.shape_cast %43 : vector<64x128xf32> to vector<32x2x128xf32>
    %cst_24 = arith.constant dense<0xFF800000> : vector<32x128xf32>
    %45 = vector.multi_reduction <maximumf>, %44, %cst_24 [1] : vector<32x2x128xf32> to vector<32x128xf32>
    %46 = vector.shape_cast %45 : vector<32x128xf32> to vector<4x2x4x128xf32>
    %cst_25 = arith.constant dense<0xFF800000> : vector<4x4x128xf32>
    %47 = vector.multi_reduction <maximumf>, %46, %cst_25 [1] : vector<4x2x4x128xf32> to vector<4x4x128xf32>
    %cst_26 = arith.constant 0.000000e+00 : bf16
    %48 = vector.broadcast %cst_26 : bf16 to vector<6x6x128xbf16>
    %c0_27 = arith.constant 0 : index
    %c0_28 = arith.constant 0 : index
    %c0_29 = arith.constant 0 : index
    %49 = vector.load %arg10[%c0_27, %c0_28, %c0_29] : memref<6x6x128xbf16, #tpu.memory_space<vmem>>, vector<6x6x128xbf16>
    tpu.vector_store %arg10[%c0_27, %c0_28, %c0_29], %48 {strides = array<i32>} : memref<6x6x128xbf16, #tpu.memory_space<vmem>>, vector<6x6x128xbf16>,
    %50 = arith.truncf %47 : vector<4x4x128xf32> to vector<4x4x128xbf16>
    %c1_30 = arith.constant 1 : index
    %c1_31 = arith.constant 1 : index
    %c0_32 = arith.constant 0 : index
    %51 = vector.load %arg10[%c1_30, %c1_31, %c0_32] : memref<6x6x128xbf16, #tpu.memory_space<vmem>>, vector<4x4x128xbf16>
    tpu.vector_store %arg10[%c1_30, %c1_31, %c0_32], %50 {strides = array<i32>} : memref<6x6x128xbf16, #tpu.memory_space<vmem>>, vector<4x4x128xbf16>,
    %c0_33 = arith.constant 0 : index
    %c0_34 = arith.constant 0 : index
    %c0_35 = arith.constant 0 : index
    %52 = vector.load %arg10[%c0_33, %c0_34, %c0_35] : memref<6x6x128xbf16, #tpu.memory_space<vmem>>, vector<6x6x128xbf16>
    %53 = vector.extract_strided_slice %52 {offsets = [0, 0, 0], sizes = [4, 4, 128], strides = [1, 1, 1]} : vector<6x6x128xbf16> to vector<4x4x128xbf16>
    %54 = vector.shape_cast %53 : vector<4x4x128xbf16> to vector<16x128xbf16>
    %55 = vector.extract_strided_slice %52 {offsets = [0, 1, 0], sizes = [4, 4, 128], strides = [1, 1, 1]} : vector<6x6x128xbf16> to vector<4x4x128xbf16>
    %56 = vector.shape_cast %55 : vector<4x4x128xbf16> to vector<16x128xbf16>
    %57 = vector.extract_strided_slice %52 {offsets = [0, 2, 0], sizes = [4, 4, 128], strides = [1, 1, 1]} : vector<6x6x128xbf16> to vector<4x4x128xbf16>
    %58 = vector.shape_cast %57 : vector<4x4x128xbf16> to vector<16x128xbf16>
    %59 = vector.extract_strided_slice %52 {offsets = [1, 0, 0], sizes = [4, 4, 128], strides = [1, 1, 1]} : vector<6x6x128xbf16> to vector<4x4x128xbf16>
    %60 = vector.shape_cast %59 : vector<4x4x128xbf16> to vector<16x128xbf16>
    %61 = vector.extract_strided_slice %52 {offsets = [1, 1, 0], sizes = [4, 4, 128], strides = [1, 1, 1]} : vector<6x6x128xbf16> to vector<4x4x128xbf16>
    %62 = vector.shape_cast %61 : vector<4x4x128xbf16> to vector<16x128xbf16>
    %63 = vector.extract_strided_slice %52 {offsets = [1, 2, 0], sizes = [4, 4, 128], strides = [1, 1, 1]} : vector<6x6x128xbf16> to vector<4x4x128xbf16>
    %64 = vector.shape_cast %63 : vector<4x4x128xbf16> to vector<16x128xbf16>
    %65 = vector.extract_strided_slice %52 {offsets = [2, 0, 0], sizes = [4, 4, 128], strides = [1, 1, 1]} : vector<6x6x128xbf16> to vector<4x4x128xbf16>
    %66 = vector.shape_cast %65 : vector<4x4x128xbf16> to vector<16x128xbf16>
    %67 = vector.extract_strided_slice %52 {offsets = [2, 1, 0], sizes = [4, 4, 128], strides = [1, 1, 1]} : vector<6x6x128xbf16> to vector<4x4x128xbf16>
    %68 = vector.shape_cast %67 : vector<4x4x128xbf16> to vector<16x128xbf16>
    %69 = vector.extract_strided_slice %52 {offsets = [2, 2, 0], sizes = [4, 4, 128], strides = [1, 1, 1]} : vector<6x6x128xbf16> to vector<4x4x128xbf16>
    %70 = vector.shape_cast %69 : vector<4x4x128xbf16> to vector<16x128xbf16>
    %71 = tpu.concatenate %54, %56, %58, %60, %62, %64, %66, %68, %70 in 1 : vector<16x128xbf16>, vector<16x128xbf16>, vector<16x128xbf16>, vector<16x128xbf16>, vector<16x128xbf16>, vector<16x128xbf16>, vector<16x128xbf16>, vector<16x128xbf16>, vector<16x128xbf16> -> vector<16x1152xbf16>
    %c0_36 = arith.constant 0 : index
    %c0_37 = arith.constant 0 : index
    %72 = vector.load %arg6[%c0_36, %c0_37] : memref<1152x128xbf16, #tpu.memory_space<vmem>>, vector<1152x128xbf16>
    %cst_38 = arith.constant dense<0.000000e+00> : vector<16x128xf32>
    %73 = tpu.matmul %71, %72, %cst_38 {dimension_numbers = #tpu.dot_dimension_numbers<[1], [0], [0], [1], [0, 0, 1, 1], [], []>} : vector<16x1152xbf16>, vector<1152x128xbf16>, vector<16x128xf32> -> vector<16x128xf32>
    %c0_39 = arith.constant 0 : index
    %c0_40 = arith.constant 0 : index
    %74 = vector.load %arg7[%c0_39, %c0_40] : memref<1x128xf32, #tpu.memory_space<vmem>>, vector<1x128xf32>
    %75 = vector.broadcast %74 : vector<1x128xf32> to vector<16x128xf32>
    %76 = arith.addf %73, %75 : vector<16x128xf32>
    %cst_41 = arith.constant 0.000000e+00 : f32
    %77 = vector.broadcast %cst_41 : f32 to vector<16x128xf32>
    %78 = arith.maximumf %76, %77 : vector<16x128xf32>
    %79 = vector.shape_cast %78 : vector<16x128xf32> to vector<8x2x128xf32>
    %cst_42 = arith.constant dense<0xFF800000> : vector<8x128xf32>
    %80 = vector.multi_reduction <maximumf>, %79, %cst_42 [1] : vector<8x2x128xf32> to vector<8x128xf32>
    %81 = vector.shape_cast %80 : vector<8x128xf32> to vector<2x2x2x128xf32>
    %cst_43 = arith.constant dense<0xFF800000> : vector<2x2x128xf32>
    %82 = vector.multi_reduction <maximumf>, %81, %cst_43 [1] : vector<2x2x2x128xf32> to vector<2x2x128xf32>
    %83 = vector.shape_cast %82 : vector<2x2x128xf32> to vector<1x4x128xf32>
    %c0_44 = arith.constant 0 : index
    %c0_45 = arith.constant 0 : index
    %c0_46 = arith.constant 0 : index
    %84 = vector.load %arg8[%c0_44, %c0_45, %c0_46] : memref<1x4x128xf32, #tpu.memory_space<vmem>>, vector<1x4x128xf32>
    tpu.vector_store %arg8[%c0_44, %c0_45, %c0_46], %83 {strides = array<i32>} : memref<1x4x128xf32, #tpu.memory_space<vmem>>, vector<1x4x128xf32>,
    return
  }
  func.func @transform_0(%arg0: i32) -> (i32, i32, i32) {
    %c0_i32 = arith.constant 0 : i32
    %c0_i32_0 = arith.constant 0 : i32
    %c0_i32_1 = arith.constant 0 : i32
    return %arg0, %c0_i32, %c0_i32_0 : i32, i32, i32
  }
  func.func @transform_1(%arg0: i32) -> (i32, i32) {
    %c0_i32 = arith.constant 0 : i32
    %c0_i32_0 = arith.constant 0 : i32
    %c0_i32_1 = arith.constant 0 : i32
    return %c0_i32, %c0_i32_0 : i32, i32
  }
  func.func @transform_2(%arg0: i32) -> (i32, i32) {
    %c0_i32 = arith.constant 0 : i32
    %c0_i32_0 = arith.constant 0 : i32
    %c0_i32_1 = arith.constant 0 : i32
    return %c0_i32, %c0_i32_0 : i32, i32
  }
  func.func @transform_3(%arg0: i32) -> (i32, i32) {
    %c0_i32 = arith.constant 0 : i32
    %c0_i32_0 = arith.constant 0 : i32
    %c0_i32_1 = arith.constant 0 : i32
    return %c0_i32, %c0_i32_0 : i32, i32
  }
  func.func @transform_4(%arg0: i32) -> (i32, i32) {
    %c0_i32 = arith.constant 0 : i32
    %c0_i32_0 = arith.constant 0 : i32
    %c0_i32_1 = arith.constant 0 : i32
    return %c0_i32, %c0_i32_0 : i32, i32
  }
  func.func @transform_5(%arg0: i32) -> (i32, i32) {
    %c0_i32 = arith.constant 0 : i32
    %c0_i32_0 = arith.constant 0 : i32
    %c0_i32_1 = arith.constant 0 : i32
    return %c0_i32, %c0_i32_0 : i32, i32
  }
  func.func @transform_6(%arg0: i32) -> (i32, i32) {
    %c0_i32 = arith.constant 0 : i32
    %c0_i32_0 = arith.constant 0 : i32
    %c0_i32_1 = arith.constant 0 : i32
    return %c0_i32, %c0_i32_0 : i32, i32
  }
  func.func @transform_7(%arg0: i32) -> (i32, i32, i32) {
    %c0_i32 = arith.constant 0 : i32
    %c0_i32_0 = arith.constant 0 : i32
    %c0_i32_1 = arith.constant 0 : i32
    return %arg0, %c0_i32, %c0_i32_0 : i32, i32, i32
  }
}

</mosaic_0001>

<bundles_post_ra>
// kernel: cnn_forward.3
= control target key start
LH: loop header
LB: loop body
LE: loop exit
PB: predicated region body
PF: predicated region fallthrough
CT: control target
= control target key end

     0   :  { %15 = vsyncpa [#allocation3], 0  ;;  %s1142_s0 = inlined_call_operand.vmem [shape: f32[2,512], index: 0, kind: input, shape index: {}]   ;;  %s1143_s1 = inlined_call_operand.vmem [shape: bf16[512,128], index: 1, kind: input, shape index: {}]   ;;  %s1144_s2 = inlined_call_operand.vmem [shape: f32[1,128], index: 2, kind: input, shape index: {}]   ;;  %s1145_s3 = inlined_call_operand.vmem [shape: bf16[128,128], index: 3, kind: input, shape index: {}]   ;;  %s1146_s4 = inlined_call_operand.vmem [shape: f32[1,128], index: 4, kind: input, shape index: {}]   ;;  %s1147_s5 = inlined_call_operand.vmem [shape: bf16[128,128], index: 5, kind: input, shape index: {}]   ;;  %s1148_s6 = inlined_call_operand.vmem [shape: f32[1,128], index: 6, kind: input, shape index: {}]   ;;  %s1149_s7 = inlined_call_operand.hbm [shape: f32[2,128], index: 7, kind: output, shape index: {0}]   ;;  %s1150_s8 = inlined_call_operand.hbm [shape: f32[2,128], index: 8, kind: output, shape index: {1}]   ;;  %s1151_s9 = inlined_call_operand.hbm [shape: f32[2,128], index: 9, kind: output, shape index: {2}]  }
   0x1   :  { %v797_v0 = vld [vmem:[%s1143_s1 + $0x38] sm:$0xff]  ;;  %v796_v4 = vld [vmem:[%s1143_s1 + $0x30] sm:$0xff]  ;;  %v795_v8 = vld [vmem:[%s1143_s1 + $0x28] sm:$0xff] }
   0x2   :  { %v805_v1 = vld [vmem:[%s1143_s1 + $0x78] sm:$0xff]  ;;  %306 = vmatpush.bf16.msra.mxu0 %v797_v0  ;;  %v804_v5 = vld [vmem:[%s1143_s1 + $0x70] sm:$0xff]  ;;  %v803_v9 = vld [vmem:[%s1143_s1 + $0x68] sm:$0xff] }
   0x3   :  { %v813_v2 = vld [vmem:[%s1143_s1 + $0xb8] sm:$0xff]  ;;  %319 = vmatpush.bf16.msra.mxu1 %v805_v1  ;;  %v812_v6 = vld [vmem:[%s1143_s1 + $0xb0] sm:$0xff]  ;;  %v811_v10 = vld [vmem:[%s1143_s1 + $0xa8] sm:$0xff] }
   0x4   :  { %v821_v3 = vld [vmem:[%s1143_s1 + $0xf8] sm:$0xff]  ;;  %332 = vmatpush.bf16.msra.mxu2 %v813_v2  ;;  %v820_v7 = vld [vmem:[%s1143_s1 + $0xf0] sm:$0xff]  ;;  %v819_v11 = vld [vmem:[%s1143_s1 + $0xe8] sm:$0xff] }
   0x5   :  { %345 = vmatpush.bf16.msra.mxu3 %v821_v3  ;;  %v794_v12 = vld [vmem:[%s1143_s1 + $0x20] sm:$0xff] }
   0x6   :  { %307 = vmatpush.bf16.msra.mxu0 %v796_v4  ;;  %v802_v13 = vld [vmem:[%s1143_s1 + $0x60] sm:$0xff] }
   0x7   :  { %320 = vmatpush.bf16.msra.mxu1 %v804_v5  ;;  %v31_v14 = vld [vmem:[%s1142_s0] sm:$0xff] }
   0x8   :  { %333 = vmatpush.bf16.msra.mxu2 %v812_v6  ;;  %v810_v15 = vld [vmem:[%s1143_s1 + $0xa0] sm:$0xff]  ;;  %33 = vst [vmem:[#allocation1] ss:$4 sm:$0xff] %v31_v14 }
   0x9   :  { %346 = vmatpush.bf16.msra.mxu3 %v820_v7  ;;  %v818_v16 = vld [vmem:[%s1143_s1 + $0xe0] sm:$0xff] }
   0xa   :  { %308 = vmatpush.bf16.msra.mxu0 %v795_v8 }
   0xb   :  { %321 = vmatpush.bf16.msra.mxu1 %v803_v9 }
   0xc   :  { %334 = vmatpush.bf16.msra.mxu2 %v811_v10 }
   0xd   :  { %347 = vmatpush.bf16.msra.mxu3 %v819_v11 }
   0xe   :  { %16 = vsyncpa [#allocation5], 0  ;;  %309 = vmatpush.bf16.msra.mxu0 %v794_v12  ;;  %v793_v17 = vld [vmem:[%s1143_s1 + $0x18] sm:$0xff]  ;;  %v792_v21 = vld [vmem:[%s1143_s1 + $0x10] sm:$0xff]  ;;  %s922_s20 = smov [#allocation2]   ;;  %s556_s24 = sshll.u32 %s1149_s7, 4  ;;  %v526_v14 = vlaneseq  ;;  %s557_s24 = int_to_ptr.hbm [resolvable:$true] %s556_s24 }
   0xf   :  { %322 = vmatpush.bf16.msra.mxu1 %v802_v13  ;;  %v801_v18 = vld [vmem:[%s1143_s1 + $0x58] sm:$0xff]  ;;  %v800_v22 = vld [vmem:[%s1143_s1 + $0x50] sm:$0xff]  ;;  %v791_v25 = vld [vmem:[%s1143_s1 + $0x8] sm:$0xff]  ;;  %s554_s21 = sshll.u32 %s922_s20, 4  ;;  %s567_s28 = sshll.u32 %s1150_s8, 4  ;;  %s555_s21 = int_to_ptr.vmem [resolvable:$true] %s554_s21  ;;  %s568_s28 = int_to_ptr.hbm [resolvable:$true] %s567_s28 }
  0x10   :  { %335 = vmatpush.bf16.msra.mxu2 %v810_v15  ;;  %v809_v19 = vld [vmem:[%s1143_s1 + $0x98] sm:$0xff]  ;;  %v808_v23 = vld [vmem:[%s1143_s1 + $0x90] sm:$0xff]  ;;  %v799_v26 = vld [vmem:[%s1143_s1 + $0x48] sm:$0xff]  ;;  %s578_s30 = sshll.u32 %s1151_s9, 4  ;;  %s579_s30 = int_to_ptr.hbm [resolvable:$true] %s578_s30 }
  0x11   :  { %348 = vmatpush.bf16.msra.mxu3 %v818_v16  ;;  %v817_v20 = vld [vmem:[%s1143_s1 + $0xd8] sm:$0xff]  ;;  %v816_v24 = vld [vmem:[%s1143_s1 + $0xd0] sm:$0xff]  ;;  %v807_v27 = vld [vmem:[%s1143_s1 + $0x88] sm:$0xff]  ;;  %v527_v16 = vshrl.u32 %v526_v14, 7 }
  0x12   :  { %310 = vmatpush.bf16.msra.mxu0 %v793_v17  ;;  %v815_v28 = vld [vmem:[%s1143_s1 + $0xc8] sm:$0xff]  ;;  %v790_v29 = vld [vmem:[%s1143_s1] sm:$0xff]  ;;  %v36_v35 = vld.sshfl [vmem:[#allocation1 + $0x10] sm:$0xff pattern:$0x73625140] }
  0x13   :  { %323 = vmatpush.bf16.msra.mxu1 %v801_v18  ;;  %v798_v30 = vld [vmem:[%s1143_s1 + $0x40] sm:$0xff]  ;;  %v35_v34 = vld.sshfl [vmem:[#allocation1 + $0x8] sm:$0xff pattern:$0x73625140]  ;;  %v829_v37 = vld [vmem:[%s1145_s3 + $0x38] sm:$0xff]  ;;  %v44_v40 = vpack.c.bf16 %v36_v35, %v36_v35  ;;  %vm531_vm0 = vcmp.gt.s32.totalorder %v527_v16, 0 }
  0x14   :  { %336 = vmatpush.bf16.msra.mxu2 %v809_v19  ;;  %v806_v31 = vld [vmem:[%s1143_s1 + $0x80] sm:$0xff]  ;;  %v37_v36 = vld.sshfl [vmem:[#allocation1 + $0x18] sm:$0xff pattern:$0x73625140]  ;;  %v43_v39 = vpack.c.bf16 %v35_v34, %v35_v34  ;;  %v828_v42 = vld [vmem:[%s1145_s3 + $0x30] sm:$0xff]  ;;  %vm540_vm1 = vcmp.gt.s32.totalorder %v527_v16, 1 }
  0x15   :  { %349 = vmatpush.bf16.msra.mxu3 %v817_v20  ;;  %v814_v32 = vld [vmem:[%s1143_s1 + $0xc0] sm:$0xff]  ;;  %v45_v41 = vpack.c.bf16 %v37_v36, %v37_v36  ;;  %v827_v43 = vld [vmem:[%s1145_s3 + $0x28] sm:$0xff]  ;;  %v825_v45 = vld [vmem:[%s1145_s3 + $0x18] sm:$0xff] }
  0x16   :  { %311 = vmatpush.bf16.msra.mxu0 %v792_v21  ;;  %v34_v33 = vld.sshfl [vmem:[#allocation1] sm:$0xff pattern:$0x73625140]  ;;  %v824_v46 = vld [vmem:[%s1145_s3 + $0x10] sm:$0xff]  ;;  %v823_v47 = vld [vmem:[%s1145_s3 + $0x8] sm:$0xff] }
  0x17   :  { %324 = vmatpush.bf16.msra.mxu1 %v800_v22  ;;  %v42_v38 = vpack.c.bf16 %v34_v33, %v34_v33  ;;  %v826_v44 = vld [vmem:[%s1145_s3 + $0x20] sm:$0xff]  ;;  %v837_v49 = vld [vmem:[%s1147_s5 + $0x38] sm:$0xff]  ;;  %v836_v50 = vld [vmem:[%s1147_s5 + $0x30] sm:$0xff]  ;;  %v924_v22 = vmov 0.0  }
  0x18   :  { %337 = vmatpush.bf16.msra.mxu2 %v808_v23  ;;  %v822_v48 = vld [vmem:[%s1145_s3] sm:$0xff]  ;;  %v835_v51 = vld [vmem:[%s1147_s5 + $0x28] sm:$0xff]  ;;  %v833_v54 = vld [vmem:[%s1147_s5 + $0x18] sm:$0xff] }
  0x19   :  { %350 = vmatpush.bf16.msra.mxu3 %v816_v24  ;;  %v834_v52 = vld [vmem:[%s1147_s5 + $0x20] sm:$0xff]  ;;  %v832_v58 = vld [vmem:[%s1147_s5 + $0x10] sm:$0xff]  ;;  %v831_v6 = vld [vmem:[%s1147_s5 + $0x8] sm:$0xff] }
  0x1a   :  { %312 = vmatpush.bf16.msra.mxu0 %v791_v25  ;;  %v843_v53 = vld [vmem:[%s1144_s2] ss:$0 sm:$0xff] }
  0x1b   :  { %325 = vmatpush.bf16.msra.mxu1 %v799_v26  ;;  %v830_v7 = vld [vmem:[%s1147_s5] sm:$0xff]  ;;  %v926_v26 = vmov -1.0  }
  0x1c   :  { %338 = vmatpush.bf16.msra.mxu2 %v807_v27  ;;  %v844_v8 = vld [vmem:[%s1146_s4] ss:$0 sm:$0xff]  ;;  %s923_s4 = smov [#allocation4]  }
  0x1d   :  { %351 = vmatpush.bf16.msra.mxu3 %v815_v28  ;;  %v845_v15 = vld [vmem:[%s1148_s6] ss:$0 sm:$0xff]  ;;  %s565_s25 = sshll.u32 %s923_s4, 4  ;;  %s925_s6 = smov [#allocation6]   ;;  %s566_s25 = int_to_ptr.vmem [resolvable:$true] %s565_s25 }
  0x1e   :  { %313 = vmatpush.bf16.msra.mxu0 %v790_v29  ;;  %s576_s7 = sshll.u32 %s925_s6, 4  ;;  %s577_s7 = int_to_ptr.vmem [resolvable:$true] %s576_s7 }
  0x1f   :  { %326 = vmatpush.bf16.msra.mxu1 %v798_v30 }
  0x20   :  { %339 = vmatpush.bf16.msra.mxu2 %v806_v31 }
  0x21   :  { %352 = vmatpush.bf16.msra.mxu3 %v814_v32  ;;  %314 = vmatmul.bf16.vlgmr.msra.gmra.mxu0 %v42_v38 }
  0x22   :  { %428 = vmatpush.bf16.msrb.mxu0 %v829_v37  ;;  %327 = vmatmul.bf16.vlgmr.msra.gmra.mxu1 %v43_v39 }
  0x23   :  { %340 = vmatmul.bf16.vlgmr.msra.gmra.mxu2 %v44_v40  ;;  %512 = vmatpush.bf16.msrb.mxu1 %v837_v49 }
  0x24   :  { %353 = vmatmul.bf16.vlgmr.msra.gmra.mxu3 %v45_v41 }
  0x26   :  { %429 = vmatpush.bf16.msrb.mxu0 %v828_v42 }
  0x27   :  { %513 = vmatpush.bf16.msrb.mxu1 %v836_v50 }
  0x2a   :  { %430 = vmatpush.bf16.msrb.mxu0 %v827_v43 }
  0x2b   :  { %514 = vmatpush.bf16.msrb.mxu1 %v835_v51 }
  0x2e   :  { %431 = vmatpush.bf16.msrb.mxu0 %v826_v44 }
  0x2f   :  { %515 = vmatpush.bf16.msrb.mxu1 %v834_v52 }
  0x32   :  { %432 = vmatpush.bf16.msrb.mxu0 %v825_v45 }
  0x33   :  { %516 = vmatpush.bf16.msrb.mxu1 %v833_v54 }
  0x36   :  { %433 = vmatpush.bf16.msrb.mxu0 %v824_v46 }
  0x37   :  { %517 = vmatpush.bf16.msrb.mxu1 %v832_v58 }
  0x3a   :  { %434 = vmatpush.bf16.msrb.mxu0 %v823_v47 }
  0x3b   :  { %518 = vmatpush.bf16.msrb.mxu1 %v831_v6 }
  0x3e   :  { %435 = vmatpush.bf16.msrb.mxu0 %v822_v48 }
  0x3f   :  { %519 = vmatpush.bf16.msrb.mxu1 %v830_v7 }
  0x9e   :  { %v315_v55 = vpop.f32.mrf.mxu0 }
  0x9f   :  { %v328_v56 = vpop.f32.mrf.mxu1  ;;  %v316_v57 = vadd.f32 %v843_v53, %v315_v55 }
  0xa1   :  { %v329_v59 = vadd.f32 %v328_v56, %v316_v57 }
  0xa6   :  { %v341_v60 = vpop.f32.mrf.mxu2  ;;  %v317_v63 = vpop.f32.mrf.mxu0 }
  0xa7   :  { %v354_v61 = vpop.f32.mrf.mxu3  ;;  %v342_v62 = vadd.f32 %v341_v60, %v329_v59  ;;  %v330_v0 = vpop.f32.mrf.mxu1 }
  0xa9   :  { %v355_v1 = vadd.f32 %v354_v61, %v342_v62 }
  0xab   :  { %v358_v2 = vmax.f32 %v355_v1, 0.0 }
  0xad   :  { %v359_v3 = vpack.c.bf16 %v358_v2, %v358_v2 }
  0xae   :  { %v343_v4 = vpop.f32.mrf.mxu2 }
  0xaf   :  { %v356_v5 = vpop.f32.mrf.mxu3  ;;  %436 = vmatmul.bf16.vlgmr.msrb.gmra.mxu0 %v359_v3 }
 0x12c   :  { %v437_v9 = vpop.f32.mrf.mxu0 }
 0x12d   :  { %v438_v10 = vadd.f32 %v844_v8, %v437_v9 }
 0x12f   :  { %v441_v11 = vmax.f32 %v438_v10, 0.0 }
 0x131   :  { %v443_v12 = vpack.c.bf16 %v441_v11, %v441_v11  ;;  %442 = vst [vmem:[#allocation2] sm:$0x3] %v441_v11 }
 0x132   :  { %559 = dma.vmem_to_hbm [thread:$0]  %s555_s21, 32, %s557_s24, [#allocation3]  }
 0x133   :  { %520 = vmatmul.bf16.vlgmr.msrb.gmra.mxu1 %v443_v12 }
 0x134   :  { %v439_v13 = vpop.f32.mrf.mxu0 }
 0x1b0   :  { %v521_v17 = vpop.f32.mrf.mxu1 }
 0x1b1   :  { %v522_v18 = vadd.f32 %v845_v15, %v521_v17 }
 0x1b3   :  { %525 = vst [vmem:[#allocation4] sm:$0x3] %v522_v18  ;;  %v528_v19 = vperm.slane %v522_v18, 0  ;;  %v537_v20 = vperm.slane %v522_v18, 1 }
 0x1b4   :  { %570 = dma.vmem_to_hbm [thread:$0]  %s566_s25, 32, %s568_s28, [#allocation5]  }
 0x1b5   :  { %vm529_vm2 = vcmp.gt.f32.partialorder %v528_v19, %v522_v18  ;;  %vm530_vm3 = vcmp.eq.f32.partialorder %v528_v19, %v522_v18  ;;  %vm539_vm4 = vcmp.eq.f32.partialorder %v537_v20, %v522_v18  ;;  %vm538_vm6 = vcmp.gt.f32.partialorder %v537_v20, %v522_v18 }
 0x1b6   :  { %vm532_vm5 = vmand %vm530_vm3, %vm531_vm0 }
 0x1b7   :  { %vm533_vm7 = vmor %vm529_vm2, %vm532_vm5 }
 0x1b8   :  { %v523_v21 = vpop.f32.mrf.mxu1  ;;  %v788_v23 = vsel %vm533_vm7, 1.0, %v924_v22  ;;  %vm541_vm8 = vmand %vm539_vm4, %vm540_vm1 }
 0x1b9   :  { %vm542_vm9 = vmor %vm538_vm6, %vm541_vm8 }
 0x1ba   :  { %v789_v24 = vsel %vm542_vm9, 1.0, %v924_v22 }
 0x1bb   :  { %v545_v25 = vadd.f32 %v789_v24, %v788_v23 }
 0x1bd   :  { %vm546_vm10 = vcmp.lt.f32.partialorder %v545_v25, 1.0 }
 0x1be   :  { %v547_v27 = vsel %vm546_vm10, 1.0, %v926_v26 }
 0x1bf   :  { %548 = vst [vmem:[#allocation6] sm:$0x3] %v547_v27 }
 0x1c0   :  { %581 = dma.vmem_to_hbm [thread:$0]  %s577_s7, 32, %s579_s30, [#allocation5]  }
 0x1c1   :  { %918 = dma.done.wait [#allocation3], 32  }
 0x1c2   :  { %919 = vsyncadd [#allocation3], 4294967264 }
 0x1c3   :  { %920 = dma.done.wait [#allocation5], 64  }
 0x1c4   :  { %921 = vsyncadd [#allocation5], 4294967232 }
 0x1c5   :  { %594 = vsyncpa [#allocation3], 1 }
 0x1c6   :  { %595 = vsyncpa [#allocation5], 1 }

// kernel: cnn_forward.2
= control target key start
LH: loop header
LB: loop body
LE: loop exit
PB: predicated region body
PF: predicated region fallthrough
CT: control target
= control target key end

     0   :  { %s5693_s24 = smov 0   ;;  %s7344_s0 = inlined_call_operand.vmem [shape: bf16[2,256,32], index: 0, kind: input, shape index: {}]   ;;  %s7345_s1 = inlined_call_operand.vmem [shape: bf16[32,128], index: 1, kind: input, shape index: {}]   ;;  %s7346_s2 = inlined_call_operand.vmem [shape: f32[1,128], index: 2, kind: input, shape index: {}]   ;;  %s7347_s3 = inlined_call_operand.vmem [shape: bf16[1152,128], index: 3, kind: input, shape index: {}]   ;;  %s7348_s4 = inlined_call_operand.vmem [shape: f32[1,128], index: 4, kind: input, shape index: {}]   ;;  %s7349_s5 = inlined_call_operand.vmem [shape: bf16[1152,128], index: 5, kind: input, shape index: {}]   ;;  %s7350_s6 = inlined_call_operand.vmem [shape: f32[1,128], index: 6, kind: input, shape index: {}]   ;;  %s7351_s7 = inlined_call_operand.vmem [shape: f32[2,4,128], index: 7, kind: output, shape index: {}]  }
   0x1 LB: > { %s4776_s25 = sadd.s32 4294967295, %s5650_s24   ;;  %p4780_p0 = scmp.ge.s32.totalorder %s5650_s24, 1  ;;  %s5650_s24 = sphi %s5693_s24, %s17_s24  }
   0x2   : > { %p237_p1 = scmp.lt.s32.totalorder %s5650_s24, 3 }
   0x4   : > { %p238_p2 = pnand %p4780_p0, %p237_p1 }
   0x6   : > { %241 = sbr.rel (%p238_p2) target bundleno = 1110 (0x456), region = 48 }
   0xb   : > { %v5484_v0 = vld [vmem:[%s7345_s1 + $0x8] sm:$0xff]  ;;  %p268_p3 = scmp.lt.s32.totalorder %s4776_s25, 1  ;;  %v5483_v1 = vld [vmem:[%s7345_s1] sm:$0xff]  ;;  %vm410_vm0 = vcmask 261120   ;;  %vm804_vm1 = vcmask 1041408   ;;  %vm1977_vm2 = vcmask 1042434  }
   0xc   : > { %465 = vmatpush.bf16.msra.mxu0 %v5484_v0  ;;  %v5734_v10 = vld [vmem:[%s7346_s2] ss:$0 sm:$0xff]  ;;  %v5652_v0 = vmov 0   ;;  %vm1979_vm3 = vcmask 1043459   ;;  %vm1981_vm4 = vcmask 1044484   ;;  %vm1983_vm5 = vcmask 1045509  }
   0xd   : > { %s7407_s25 = smov (!%p268_p3, %s4776_s25), 1  ;;  %1767 = vst [vmem:[#allocation2 + $0x8] sm:$0xf] %v5652_v0  ;;  %vm1985_vm6 = vcmask 1046534   ;;  %vm2070_vm7 = vcmask 1040384   ;;  %vm1987_vm9 = vcmask 1047559  }
   0xe   : > { %s5466_s30 = sshll.u32 %s7407_s25, 7  ;;  %1768 = vst [vmem:[#allocation2 + $0xc] sm:$0x1] %v5652_v0  ;;  %vm2071_vm8 = vsmask.f32 256  ;;  %vm2064_vm10 = vcmask 1043456  }
   0xf   : > { %s5713_s10 = scalar_lea.vmem %s7344_s0, %s5466_s30  ;;  %3573 = vst [vmem:[#allocation3] sm:$0x7] %v5652_v0  ;;  %vm2065_vm11 = vsmask.f32 7938  ;;  %vm5888_vm12 = vmand %vm2070_vm7, %vm2071_vm8  ;;  %vm2269_vm14 = vcmask 1042432   ;;  %vm2270_vm15 = vcmask 1046532  }
  0x10   : > { %466 = vmatpush.bf16.msra.mxu0 %v5483_v1  ;;  %v5467_v2 = vld [vmem:[%s5713_s10] sm:$0xff]  ;;  %v5468_v3 = vld [vmem:[%s5713_s10 + $0x8] sm:$0xff]  ;;  %v5469_v4 = vld [vmem:[%s5713_s10 + $0x10] sm:$0xff]  ;;  %3578 = vst [vmem:[#allocation3 + $0x14] sm:$0x7] %v5652_v0  ;;  %s4783_s19 = sshll.u32 %s7407_s25, 2 }
  0x11   : > { %v5470_v5 = vld [vmem:[%s5713_s10 + $0x18] sm:$0xff]  ;;  %v5471_v6 = vld [vmem:[%s5713_s10 + $0x20] sm:$0xff]  ;;  %v5472_v7 = vld [vmem:[%s5713_s10 + $0x28] sm:$0xff]  ;;  %1765 = vst [vmem:[#allocation2] sm:$0xf] %v5652_v0  ;;  %s276_s22 = scalar_lea.vmem %s7351_s7, %s4783_s19 }
  0x12   : > { %v5473_v8 = vld [vmem:[%s5713_s10 + $0x30] sm:$0xff]  ;;  %v5474_v9 = vld [vmem:[%s5713_s10 + $0x38] sm:$0xff]  ;;  %v5475_v11 = vld [vmem:[%s5713_s10 + $0x40] sm:$0xff]  ;;  %1766 = vst [vmem:[#allocation2 + $0x4] sm:$0x1] %v5652_v0 }
  0x13   : > { %4856 = vmatmul.msk.bf16.vlgmr.msra.gmra.mxu0 %vm410_vm0, %v5467_v2  ;;  %v5476_v46 = vld [vmem:[%s5713_s10 + $0x48] sm:$0xff]  ;;  %1769 = vst [vmem:[#allocation2 + $0x10] sm:$0xf] %v5652_v0  ;;  %vm5900_vm13 = vmand %vm2064_vm10, %vm2065_vm11  ;;  %vm2138_vm10 = vsmask.f32 3328 }
  0x14   : > { %1770 = vst [vmem:[#allocation2 + $0x14] sm:$0x1] %v5652_v0  ;;  %vm6004_vm8 = vmor %vm2269_vm14, %vm2270_vm15  ;;  %vm2139_vm11 = vsmask.f32 7440 }
  0x15   : > { %1771 = vst [vmem:[#allocation2 + $0x18] sm:$0xf] %v5652_v0  ;;  %vm6052_vm15 = vmor %vm2138_vm10, %vm2139_vm11  ;;  %vm3706_vm10 = vsmask.f32 7448 }
  0x16   : > { %1772 = vst [vmem:[#allocation2 + $0x1c] sm:$0x1] %v5652_v0 }
  0x17   : > { %1773 = vst [vmem:[#allocation2 + $0x20] sm:$0xf] %v5652_v0 }
  0x18   : > { %1774 = vst [vmem:[#allocation2 + $0x24] sm:$0x1] %v5652_v0 }
  0x19   : > { %1775 = vst [vmem:[#allocation2 + $0x28] sm:$0xf] %v5652_v0 }
  0x1a   : > { %1776 = vst [vmem:[#allocation2 + $0x2c] sm:$0x1] %v5652_v0 }
  0x1b   : > { %1777 = vst [vmem:[#allocation2 + $0x30] sm:$0xf] %v5652_v0 }
  0x1c   : > { %1778 = vst [vmem:[#allocation2 + $0x34] sm:$0x1] %v5652_v0 }
  0x1d   : > { %1779 = vst [vmem:[#allocation2 + $0x38] sm:$0xf] %v5652_v0 }
  0x1e   : > { %1780 = vst [vmem:[#allocation2 + $0x3c] sm:$0x1] %v5652_v0 }
  0x1f   : > { %1781 = vst [vmem:[#allocation2 + $0x40] sm:$0xf] %v5652_v0 }
  0x20   : > { %1782 = vst [vmem:[#allocation2 + $0x44] sm:$0x1] %v5652_v0 }
  0x21   : > { %1783 = vst [vmem:[#allocation2 + $0x48] sm:$0xf] %v5652_v0 }
  0x22   : > { %1784 = vst [vmem:[#allocation2 + $0x4c] sm:$0x1] %v5652_v0 }
  0x23   : > { %4857 = vmatmul.msk.bf16.gmra.mxu0 %vm410_vm0, %v5468_v3  ;;  %3574 = vst [vmem:[#allocation3 + $0x4] sm:$0x7] %v5652_v0 }
  0x24   : > { %3575 = vst [vmem:[#allocation3 + $0x8] sm:$0x7] %v5652_v0 }
  0x25   : > { %3576 = vst [vmem:[#allocation3 + $0xc] sm:$0x7] %v5652_v0 }
  0x26   : > { %3577 = vst [vmem:[#allocation3 + $0x10] sm:$0x7] %v5652_v0 }
  0x33   : > { %4858 = vmatmul.msk.bf16.gmra.mxu0 %vm410_vm0, %v5469_v4 }
  0x43   : > { %4859 = vmatmul.msk.bf16.gmra.mxu0 %vm410_vm0, %v5470_v5 }
  0x53   : > { %4860 = vmatmul.msk.bf16.gmra.mxu0 %vm410_vm0, %v5471_v6 }
  0x63   : > { %4861 = vmatmul.msk.bf16.gmra.mxu0 %vm410_vm0, %v5472_v7 }
  0x73   : > { %4862 = vmatmul.msk.bf16.gmra.mxu0 %vm410_vm0, %v5473_v8 }
  0x83   : > { %4863 = vmatmul.msk.bf16.gmra.mxu0 %vm410_vm0, %v5474_v9 }
  0x90   : > { %v468_v12 = vpop.f32.mrf.mxu0 }
  0x91   : > { %v469_v13 = vadd.f32 %v5734_v10, %v468_v12 }
  0x93   : > { %v548_v14 = vmax.f32 %v469_v13, 0.0  ;;  %4864 = vmatmul.msk.bf16.gmra.mxu0 %vm410_vm0, %v5475_v11 }
  0x95   : > { %v612_v15 = vrot.slane %v548_v14, 2  ;;  %v613_v16 = vrot.slane %v548_v14, 4  ;;  %v614_v17 = vrot.slane %v548_v14, 6  ;;  %v805_v18 = vsel %vm804_vm1, %v548_v14, -inf }
  0x96   : > { %v806_v19 = vrot.slane %v805_v18, 4 }
  0x97   : > { %v812_v20 = vsel %vm804_vm1, %v612_v15, -inf  ;;  %v819_v21 = vsel %vm804_vm1, %v613_v16, -inf  ;;  %v826_v22 = vsel %vm804_vm1, %v614_v17, -inf }
  0x98   : > { %v807_v23 = vmax.f32 %v805_v18, %v806_v19  ;;  %v813_v24 = vrot.slane %v812_v20, 4  ;;  %v820_v25 = vrot.slane %v819_v21, 4  ;;  %v827_v26 = vrot.slane %v826_v22, 4  ;;  %v470_v27 = vpop.f32.mrf.mxu0 }
  0x99   : > { %v471_v28 = vadd.f32 %v5734_v10, %v470_v27 }
  0x9a   : > { %v808_v29 = vrot.slane %v807_v23, 2  ;;  %v814_v30 = vmax.f32 %v812_v20, %v813_v24  ;;  %v821_v31 = vmax.f32 %v819_v21, %v820_v25  ;;  %v828_v32 = vmax.f32 %v826_v22, %v827_v26 }
  0x9b   : > { %v549_v33 = vmax.f32 %v471_v28, 0.0 }
  0x9c   : > { %v815_v34 = vrot.slane %v814_v30, 2  ;;  %v809_v39 = vmax.f32 %v807_v23, %v808_v29  ;;  %v822_v40 = vrot.slane %v821_v31, 2  ;;  %v829_v41 = vrot.slane %v828_v32, 2  ;;  %v5492_v23 = vld [vmem:[%s7347_s3 + $0x38] sm:$0xff] }
  0x9d   : > { %v615_v35 = vrot.slane %v549_v33, 2  ;;  %v616_v36 = vrot.slane %v549_v33, 4  ;;  %v617_v37 = vrot.slane %v549_v33, 6  ;;  %v833_v38 = vsel %vm804_vm1, %v549_v33, -inf  ;;  %3008 = vmatpush.bf16.msra.mxu1 %v5492_v23 }
  0x9e   : > { %v834_v42 = vrot.slane %v833_v38, 4  ;;  %v816_v47 = vmax.f32 %v814_v30, %v815_v34  ;;  %v810_v53 = vrot.slane %v809_v39, 1  ;;  %v823_v55 = vmax.f32 %v821_v31, %v822_v40 }
  0x9f   : > { %v840_v43 = vsel %vm804_vm1, %v615_v35, -inf  ;;  %v847_v44 = vsel %vm804_vm1, %v616_v36, -inf  ;;  %v854_v45 = vsel %vm804_vm1, %v617_v37, -inf  ;;  %v830_v56 = vmax.f32 %v828_v32, %v829_v41  ;;  %v5508_v32 = vld [vmem:[%s7347_s3 + $0xb8] sm:$0xff] }
  0xa0   : > { %v473_v48 = vpop.f32.mrf.mxu0  ;;  %v835_v49 = vmax.f32 %v833_v38, %v834_v42  ;;  %v841_v50 = vrot.slane %v840_v43, 4  ;;  %v848_v51 = vrot.slane %v847_v44, 4  ;;  %v855_v52 = vrot.slane %v854_v45, 4  ;;  %v5788_v41 = vld [vmem:[#allocation3] sm:$0x7]  ;;  %3066 = vmatpush.bf16.msra.mxu3 %v5508_v32  ;;  %v5491_v42 = vld [vmem:[%s7347_s3 + $0x30] sm:$0xff] }
  0xa1   : > { %v474_v54 = vadd.f32 %v5734_v10, %v473_v48  ;;  %v817_v60 = vrot.slane %v816_v47, 1  ;;  %v5754_v5 = vmax.f32 %v809_v39, %v810_v53  ;;  %v824_v6 = vrot.slane %v823_v55, 1  ;;  %7368 = vst [vmem:[#allocation4_spill] sm:$0xff] %v5788_v41  ;;  %3009 = vmatpush.bf16.msra.mxu1 %v5491_v42  ;;  %v5507_v53 = vld [vmem:[%s7347_s3 + $0xb0] sm:$0xff]  ;;  %v5505_v42 = vld [vmem:[%s7347_s3 + $0xa0] sm:$0xff] }
  0xa2   : > { %v836_v57 = vrot.slane %v835_v49, 2  ;;  %v842_v58 = vmax.f32 %v840_v43, %v841_v50  ;;  %v849_v62 = vmax.f32 %v847_v44, %v848_v51  ;;  %v856_v63 = vmax.f32 %v854_v45, %v855_v52  ;;  %3838 = vst [vmem:[#allocation1] ss:$4 sm:$0xff] %v5788_v41 }
  0xa3   : > { %4865 = vmatmul.msk.bf16.gmra.mxu0 %vm410_vm0, %v5476_v46  ;;  %v550_v59 = vmax.f32 %v474_v54, 0.0  ;;  %v831_v7 = vrot.slane %v830_v56, 1  ;;  %v5763_v15 = vmax.f32 %v816_v47, %v817_v60  ;;  %v5772_v24 = vmax.f32 %v823_v55, %v824_v6  ;;  %v5477_v47 = vld [vmem:[%s5713_s10 + $0x50] sm:$0xff] }
  0xa4   : > { %v843_v61 = vrot.slane %v842_v58, 2  ;;  %v5756_v8 = vmax.f32 %v835_v49, %v836_v57  ;;  %v850_v17 = vrot.slane %v849_v62, 2  ;;  %v857_v18 = vrot.slane %v856_v63, 2  ;;  %3067 = vmatpush.bf16.msra.mxu3 %v5507_v53 }
  0xa5   : > { %v618_v1 = vrot.slane %v550_v59, 2  ;;  %v619_v2 = vrot.slane %v550_v59, 4  ;;  %v620_v3 = vrot.slane %v550_v59, 6  ;;  %v861_v4 = vsel %vm804_vm1, %v550_v59, -inf }
  0xa6   : > { %v862_v9 = vrot.slane %v861_v4, 4  ;;  %v5765_v16 = vmax.f32 %v842_v58, %v843_v61  ;;  %v5774_v25 = vmax.f32 %v830_v56, %v831_v7  ;;  %v838_v26 = vrot.slane %v5756_v8, 1 }
  0xa7   : > { %v868_v11 = vsel %vm804_vm1, %v618_v1, -inf  ;;  %v875_v12 = vsel %vm804_vm1, %v619_v2, -inf  ;;  %v882_v13 = vsel %vm804_vm1, %v620_v3, -inf  ;;  %v5784_v34 = vmax.f32 %v849_v62, %v850_v17  ;;  %v5490_v62 = vld [vmem:[%s7347_s3 + $0x28] sm:$0xff] }
  0xa8   : > { %v475_v14 = vpop.f32.mrf.mxu0  ;;  %v863_v19 = vmax.f32 %v861_v4, %v862_v9  ;;  %v869_v20 = vrot.slane %v868_v11, 4  ;;  %v876_v21 = vrot.slane %v875_v12, 4  ;;  %v883_v22 = vrot.slane %v882_v13, 4  ;;  %v5500_v4 = vld [vmem:[%s7347_s3 + $0x78] sm:$0xff]  ;;  %3010 = vmatpush.bf16.msra.mxu1 %v5490_v62  ;;  %v5497_v62 = vld [vmem:[%s7347_s3 + $0x60] sm:$0xff] }
  0xa9   : > { %v476_v27 = vadd.f32 %v5734_v10, %v475_v14  ;;  %v845_v33 = vrot.slane %v5765_v16, 1  ;;  %v5786_v35 = vmax.f32 %v856_v63, %v857_v18  ;;  %3037 = vmatpush.bf16.msra.mxu2 %v5500_v4 }
  0xaa   : > { %v864_v28 = vrot.slane %v863_v19, 2  ;;  %v870_v29 = vmax.f32 %v868_v11, %v869_v20  ;;  %v877_v30 = vmax.f32 %v875_v12, %v876_v21  ;;  %v884_v31 = vmax.f32 %v882_v13, %v883_v22  ;;  %v5506_v12 = vld [vmem:[%s7347_s3 + $0xa8] sm:$0xff]  ;;  %v5489_v22 = vld [vmem:[%s7347_s3 + $0x20] sm:$0xff] }
  0xab   : > { %v551_v36 = vmax.f32 %v476_v27, 0.0  ;;  %3068 = vmatpush.bf16.msra.mxu3 %v5506_v12  ;;  %v5486_v12 = vld [vmem:[%s7347_s3 + $0x8] sm:$0xff] }
  0xac   : > { %v865_v37 = vmax.f32 %v863_v19, %v864_v28  ;;  %v871_v38 = vrot.slane %v870_v29, 2  ;;  %v878_v39 = vrot.slane %v877_v30, 2  ;;  %v885_v40 = vrot.slane %v884_v31, 2  ;;  %3011 = vmatpush.bf16.msra.mxu1 %v5489_v22 }
  0xad   : > { %v621_v43 = vrot.slane %v551_v36, 2  ;;  %v622_v44 = vrot.slane %v551_v36, 4  ;;  %v623_v45 = vrot.slane %v551_v36, 6  ;;  %v889_v46 = vsel %vm804_vm1, %v551_v36, -inf }
  0xae   : > { %v866_v48 = vrot.slane %v865_v37, 1  ;;  %v872_v49 = vmax.f32 %v870_v29, %v871_v38  ;;  %v879_v50 = vmax.f32 %v877_v30, %v878_v39  ;;  %v886_v51 = vmax.f32 %v884_v31, %v885_v40 }
  0xaf   : > { %v890_v54 = vrot.slane %v889_v46, 4  ;;  %v896_v55 = vsel %vm804_vm1, %v621_v43, -inf  ;;  %v903_v56 = vsel %vm804_vm1, %v622_v44, -inf  ;;  %v910_v57 = vsel %vm804_vm1, %v623_v45, -inf  ;;  %3069 = vmatpush.bf16.msra.mxu3 %v5505_v42 }
  0xb0   : > { %v5796_v52 = vpop.f32.mrf.mxu0  ;;  %v867_v58 = vmax.f32 %v865_v37, %v866_v48  ;;  %v873_v59 = vrot.slane %v872_v49, 1  ;;  %v880_v60 = vrot.slane %v879_v50, 1  ;;  %v887_v61 = vrot.slane %v886_v51, 1 }
  0xb1   : > { %v891_v63 = vmax.f32 %v889_v46, %v890_v54  ;;  %v897_v1 = vrot.slane %v896_v55, 4  ;;  %v904_v2 = vrot.slane %v903_v56, 4  ;;  %v911_v3 = vrot.slane %v910_v57, 4  ;;  %v5488_v46 = vld [vmem:[%s7347_s3 + $0x18] sm:$0xff] }
  0xb2   : > { %v874_v6 = vmax.f32 %v872_v49, %v873_v59  ;;  %v881_v7 = vmax.f32 %v879_v50, %v880_v60  ;;  %v888_v9 = vmax.f32 %v886_v51, %v887_v61  ;;  %v1701_v11 = vmax.f32 %v5754_v5, %v867_v58  ;;  %3012 = vmatpush.bf16.msra.mxu1 %v5488_v46  ;;  %v5478_v61 = vld [vmem:[%s5713_s10 + $0x58] sm:$0xff]  ;;  %v5485_v46 = vld [vmem:[%s7347_s3] sm:$0xff] }
  0xb3   : > { %4866 = vmatmul.msk.bf16.gmra.mxu0 %vm410_vm0, %v5477_v47  ;;  %v892_v13 = vrot.slane %v891_v63, 2  ;;  %v898_v14 = vmax.f32 %v896_v55, %v897_v1  ;;  %v905_v17 = vmax.f32 %v903_v56, %v904_v2  ;;  %v912_v18 = vmax.f32 %v910_v57, %v911_v3  ;;  %v5504_v57 = vld [vmem:[%s7347_s3 + $0x98] sm:$0xff] }
  0xb4   : > { %v852_v19 = vrot.slane %v5784_v34, 1  ;;  %v1702_v20 = vmax.f32 %v5763_v15, %v874_v6  ;;  %v1703_v5 = vmax.f32 %v5772_v24, %v881_v7  ;;  %v1785_v21 = vpack.c.bf16 %v1701_v11, %v1701_v11  ;;  %v5499_v15 = vld [vmem:[%s7347_s3 + $0x70] sm:$0xff]  ;;  %3070 = vmatpush.bf16.msra.mxu3 %v5504_v57 }
  0xb5   : > { %v893_v23 = vmax.f32 %v891_v63, %v892_v13  ;;  %v899_v27 = vrot.slane %v898_v14, 2  ;;  %v906_v28 = vrot.slane %v905_v17, 2  ;;  %v913_v29 = vrot.slane %v912_v18, 2  ;;  %3038 = vmatpush.bf16.msra.mxu2 %v5499_v15  ;;  %v5503_v7 = vld [vmem:[%s7347_s3 + $0x90] sm:$0xff] }
  0xb6   : > { %v859_v24 = vrot.slane %v5786_v35, 1  ;;  %v1704_v30 = vmax.f32 %v5774_v25, %v888_v9  ;;  %v1786_v31 = vpack.c.bf16 %v1702_v20, %v1702_v20  ;;  %v1787_v32 = vpack.c.bf16 %v1703_v5, %v1703_v5  ;;  %v2067_v15 = vld [vmem:[#allocation2 + $0x8] sm:$0xf] }
  0xb7   : > { %v894_v37 = vrot.slane %v893_v23, 1  ;;  %v900_v38 = vmax.f32 %v898_v14, %v899_v27  ;;  %v907_v39 = vmax.f32 %v905_v17, %v906_v28  ;;  %v914_v40 = vmax.f32 %v912_v18, %v913_v29  ;;  %v5502_v27 = vld [vmem:[%s7347_s3 + $0x88] sm:$0xff] }
  0xb8   : > { %v5834_v36 = vpop.f32.mrf.mxu0  ;;  %v839_v25 = vmax.f32 %v5756_v8, %v838_v26  ;;  %v846_v43 = vmax.f32 %v5765_v16, %v845_v33  ;;  %v1913_v44 = vunpack.c.l.b16 %v1785_v21  ;;  %v1914_v45 = vunpack.c.l.b16 %v1786_v31  ;;  %v5498_v8 = vld [vmem:[%s7347_s3 + $0x68] sm:$0xff]  ;;  %v2073_v21 = vld [vmem:[#allocation2 + $0xc] sm:$0x1]  ;;  %3071 = vmatpush.bf16.msra.mxu3 %v5503_v7 }
  0xb9   : > { %v895_v47 = vmax.f32 %v893_v23, %v894_v37  ;;  %v901_v48 = vrot.slane %v900_v38, 1  ;;  %v908_v49 = vrot.slane %v907_v39, 1  ;;  %v915_v50 = vrot.slane %v914_v40, 1  ;;  %3039 = vmatpush.bf16.msra.mxu2 %v5498_v8 }
  0xba   : > { %v853_v16 = vmax.f32 %v5784_v34, %v852_v19  ;;  %v860_v26 = vmax.f32 %v5786_v35, %v859_v24  ;;  %v1788_v33 = vpack.c.bf16 %v1704_v30, %v1704_v30  ;;  %v1915_v51 = vunpack.c.l.b16 %v1787_v32  ;;  %v5487_v34 = vld [vmem:[%s7347_s3 + $0x10] sm:$0xff]  ;;  %v5496_v19 = vld [vmem:[%s7347_s3 + $0x58] sm:$0xff] }
  0xbb   : > { %v1978_v53 = vsel %vm1977_vm2, %v1914_v45, %v1913_v44  ;;  %v902_v54 = vmax.f32 %v900_v38, %v901_v48  ;;  %v909_v55 = vmax.f32 %v907_v39, %v908_v49  ;;  %v916_v56 = vmax.f32 %v914_v40, %v915_v50  ;;  %3013 = vmatpush.bf16.msra.mxu1 %v5487_v34  ;;  %v5495_v50 = vld [vmem:[%s7347_s3 + $0x50] sm:$0xff] }
  0xbc   : > { %v1705_v58 = vmax.f32 %v839_v25, %v895_v47  ;;  %v1916_v63 = vunpack.c.l.b16 %v1788_v33  ;;  %v1980_v1 = vsel %vm1979_vm3, %v1915_v51, %v1978_v53  ;;  %v479_v0 = vadd.f32 %v5734_v10, %v5796_v52  ;;  %3072 = vmatpush.bf16.msra.mxu3 %v5502_v27 }
  0xbd   : > { %v1706_v35 = vmax.f32 %v846_v43, %v902_v54  ;;  %v1707_v59 = vmax.f32 %v853_v16, %v909_v55  ;;  %v1708_v60 = vmax.f32 %v860_v26, %v916_v56  ;;  %3040 = vmatpush.bf16.msra.mxu2 %v5497_v62  ;;  %v481_v39 = vadd.f32 %v5734_v10, %v5834_v36  ;;  %v5479_v56 = vld [vmem:[%s5713_s10 + $0x60] sm:$0xff] }
  0xbe   : > { %v1789_v2 = vpack.c.bf16 %v1705_v58, %v1705_v58  ;;  %v1982_v13 = vsel %vm1981_vm4, %v1916_v63, %v1980_v1  ;;  %v552_v31 = vmax.f32 %v479_v0, 0.0 }
  0xbf   : > { %v1790_v3 = vpack.c.bf16 %v1706_v35, %v1706_v35  ;;  %v1791_v4 = vpack.c.bf16 %v1707_v59, %v1707_v59  ;;  %v1792_v6 = vpack.c.bf16 %v1708_v60, %v1708_v60  ;;  %3014 = vmatpush.bf16.msra.mxu1 %v5486_v12  ;;  %v553_v49 = vmax.f32 %v481_v39, 0.0 }
  0xc0   : > { %v1917_v9 = vunpack.c.l.b16 %v1789_v2  ;;  %v483_v11 = vpop.f32.mrf.mxu0  ;;  %v624_v37 = vrot.slane %v552_v31, 2  ;;  %v625_v38 = vrot.slane %v552_v31, 4  ;;  %v626_v40 = vrot.slane %v552_v31, 6 }
  0xc1   : > { %v1918_v14 = vunpack.c.l.b16 %v1790_v3  ;;  %v1919_v17 = vunpack.c.l.b16 %v1791_v4  ;;  %v1920_v18 = vunpack.c.l.b16 %v1792_v6  ;;  %3041 = vmatpush.bf16.msra.mxu2 %v5496_v19  ;;  %v917_v52 = vsel %vm804_vm1, %v552_v31, -inf  ;;  %v5501_v31 = vld [vmem:[%s7347_s3 + $0x80] sm:$0xff] }
  0xc2   : > { %v1984_v20 = vsel %vm1983_vm5, %v1917_v9, %v1982_v13  ;;  %v924_v42 = vsel %vm804_vm1, %v624_v37, -inf  ;;  %v918_v43 = vrot.slane %v917_v52, 4  ;;  %v931_v45 = vsel %vm804_vm1, %v625_v38, -inf  ;;  %3073 = vmatpush.bf16.msra.mxu3 %v5501_v31 }
  0xc3   : > { %4867 = vmatmul.msk.bf16.gmra.mxu0 %vm410_vm0, %v5478_v61  ;;  %v1986_v22 = vsel %vm1985_vm6, %v1918_v14, %v1984_v20  ;;  %v2032_v23 = vpack.c.b16 %v1920_v18, %v1920_v18  ;;  %v925_v44 = vrot.slane %v924_v42, 4  ;;  %v932_v47 = vrot.slane %v931_v45, 4  ;;  %3015 = vmatpush.bf16.msra.mxu1 %v5485_v46 }
  0xc4   : > { %v1988_v28 = vsel %vm1987_vm9, %v1919_v17, %v1986_v22  ;;  %v938_v48 = vsel %vm804_vm1, %v626_v40, -inf  ;;  %v484_v36 = vadd.f32 %v5734_v10, %v483_v11  ;;  %v919_v8 = vmax.f32 %v917_v52, %v918_v43  ;;  %v5494_v43 = vld [vmem:[%s7347_s3 + $0x48] sm:$0xff] }
  0xc5   : > { %v2031_v24 = vpack.c.b16 %v1988_v28, %v1988_v28  ;;  %v2074_v30 = vsel %vm5888_vm12, %v2032_v23, %v2073_v21  ;;  %v926_v16 = vmax.f32 %v924_v42, %v925_v44  ;;  %v939_v26 = vrot.slane %v938_v48, 4  ;;  %3042 = vmatpush.bf16.msra.mxu2 %v5495_v50 }
  0xc6   : > { %2075 = vst [vmem:[#allocation2 + $0xc] sm:$0x1] %v2074_v30  ;;  %v933_v51 = vmax.f32 %v931_v45, %v932_v47  ;;  %v627_v53 = vrot.slane %v553_v49, 2  ;;  %v628_v54 = vrot.slane %v553_v49, 4  ;;  %v629_v55 = vrot.slane %v553_v49, 6 }
  0xc7   : > { %v2068_v32 = vsel %vm5900_vm13, %v2031_v24, %v2067_v15  ;;  %v920_v57 = vrot.slane %v919_v8, 2  ;;  %v927_v58 = vrot.slane %v926_v16, 2  ;;  %v940_v34 = vmax.f32 %v938_v48, %v939_v26 }
  0xc8   : > { %2069 = vst [vmem:[#allocation2 + $0x8] sm:$0xf] %v2068_v32  ;;  %v485_v25 = vpop.f32.mrf.mxu0  ;;  %v945_v35 = vsel %vm804_vm1, %v553_v49, -inf  ;;  %v934_v59 = vrot.slane %v933_v51, 2  ;;  %v952_v61 = vsel %vm804_vm1, %v627_v53, -inf  ;;  %v959_v62 = vsel %vm804_vm1, %v628_v54, -inf }
  0xc9   : > { %v486_v33 = vadd.f32 %v5734_v10, %v485_v25  ;;  %v946_v60 = vrot.slane %v945_v35, 4  ;;  %v921_v63 = vmax.f32 %v919_v8, %v920_v57  ;;  %v928_v1 = vmax.f32 %v926_v16, %v927_v58  ;;  %3043 = vmatpush.bf16.msra.mxu2 %v5494_v43 }
  0xca   : > { %v941_v2 = vrot.slane %v940_v34, 2  ;;  %v953_v3 = vrot.slane %v952_v61, 4  ;;  %v935_v4 = vmax.f32 %v933_v51, %v934_v59  ;;  %v960_v7 = vrot.slane %v959_v62, 4 }
  0xcb   : > { %v947_v6 = vmax.f32 %v945_v35, %v946_v60  ;;  %v966_v9 = vsel %vm804_vm1, %v629_v55, -inf  ;;  %v922_v11 = vrot.slane %v921_v63, 1  ;;  %v929_v12 = vrot.slane %v928_v1, 1 }
  0xcc   : > { %v942_v13 = vmax.f32 %v940_v34, %v941_v2  ;;  %v954_v14 = vmax.f32 %v952_v61, %v953_v3  ;;  %v936_v17 = vrot.slane %v935_v4, 1  ;;  %v961_v19 = vmax.f32 %v959_v62, %v960_v7 }
  0xcd   : > { %v948_v18 = vrot.slane %v947_v6, 2  ;;  %v967_v20 = vrot.slane %v966_v9, 4  ;;  %v5930_v21 = vmax.f32 %v921_v63, %v922_v11  ;;  %v5932_v22 = vmax.f32 %v928_v1, %v929_v12 }
  0xce   : > { %v943_v23 = vrot.slane %v942_v13, 1  ;;  %v955_v27 = vrot.slane %v954_v14, 2  ;;  %v5934_v15 = vmax.f32 %v935_v4, %v936_v17  ;;  %v962_v24 = vrot.slane %v961_v19, 2 }
  0xcf   : > { %v949_v0 = vmax.f32 %v947_v6, %v948_v18  ;;  %v968_v30 = vmax.f32 %v966_v9, %v967_v20  ;;  %v554_v38 = vmax.f32 %v484_v36, 0.0  ;;  %v555_v39 = vmax.f32 %v486_v33, 0.0 }
  0xd0   : > { %v488_v28 = vpop.f32.mrf.mxu0  ;;  %v5939_v32 = vmax.f32 %v942_v13, %v943_v23  ;;  %v956_v37 = vmax.f32 %v954_v14, %v955_v27  ;;  %v963_v52 = vmax.f32 %v961_v19, %v962_v24 }
  0xd1   : > { %v950_v40 = vrot.slane %v949_v0, 1  ;;  %v969_v42 = vrot.slane %v968_v30, 2  ;;  %v5942_v25 = vadd.f32 %v5734_v10, %v488_v28  ;;  %v630_v45 = vrot.slane %v554_v38, 2 }
  0xd2   : > { %v957_v44 = vrot.slane %v956_v37, 1  ;;  %v631_v46 = vrot.slane %v554_v38, 4  ;;  %v632_v47 = vrot.slane %v554_v38, 6  ;;  %v964_v49 = vrot.slane %v963_v52, 1 }
  0xd3   : > { %4868 = vmatmul.msk.bf16.gmra.mxu0 %vm410_vm0, %v5479_v56  ;;  %v5947_v48 = vmax.f32 %v949_v0, %v950_v40  ;;  %v970_v36 = vmax.f32 %v968_v30, %v969_v42  ;;  %v973_v50 = vsel %vm804_vm1, %v554_v38, -inf  ;;  %v980_v26 = vsel %vm804_vm1, %v630_v45, -inf }
  0xd4   : > { %v5950_v8 = vmax.f32 %v956_v37, %v957_v44  ;;  %v974_v16 = vrot.slane %v973_v50, 4  ;;  %v987_v33 = vsel %vm804_vm1, %v631_v46, -inf  ;;  %v5954_v51 = vmax.f32 %v963_v52, %v964_v49  ;;  %v5493_v37 = vld [vmem:[%s7347_s3 + $0x40] sm:$0xff] }
  0xd5   : > { %v971_v53 = vrot.slane %v970_v36, 1  ;;  %v981_v54 = vrot.slane %v980_v26, 4  ;;  %v988_v55 = vrot.slane %v987_v33, 4  ;;  %v994_v57 = vsel %vm804_vm1, %v632_v47, -inf  ;;  %3044 = vmatpush.bf16.msra.mxu2 %v5493_v37 }
  0xd6   : > { %v975_v56 = vmax.f32 %v973_v50, %v974_v16  ;;  %v633_v58 = vrot.slane %v555_v39, 2  ;;  %v634_v34 = vrot.slane %v555_v39, 4  ;;  %v995_v61 = vrot.slane %v994_v57, 4 }
  0xd7   : > { %v5957_v35 = vmax.f32 %v970_v36, %v971_v53  ;;  %v982_v59 = vmax.f32 %v980_v26, %v981_v54  ;;  %v989_v60 = vmax.f32 %v987_v33, %v988_v55  ;;  %v635_v63 = vrot.slane %v555_v39, 6 }
  0xd8   : > { %v976_v62 = vrot.slane %v975_v56, 2  ;;  %v1001_v1 = vsel %vm804_vm1, %v555_v39, -inf  ;;  %v1008_v2 = vsel %vm804_vm1, %v633_v58, -inf  ;;  %v996_v6 = vmax.f32 %v994_v57, %v995_v61 }
  0xd9   : > { %v983_v3 = vrot.slane %v982_v59, 2  ;;  %v990_v4 = vrot.slane %v989_v60, 2  ;;  %v1002_v7 = vrot.slane %v1001_v1, 4  ;;  %v1009_v11 = vrot.slane %v1008_v2, 4 }
  0xda   : > { %v977_v9 = vmax.f32 %v975_v56, %v976_v62  ;;  %v1015_v12 = vsel %vm804_vm1, %v634_v34, -inf  ;;  %v1022_v13 = vsel %vm804_vm1, %v635_v63, -inf  ;;  %v997_v18 = vrot.slane %v996_v6, 2  ;;  %v5970_v63 = vld [vmem:[#allocation2] sm:$0xf] }
  0xdb   : > { %v984_v14 = vmax.f32 %v982_v59, %v983_v3  ;;  %v991_v17 = vmax.f32 %v989_v60, %v990_v4  ;;  %v1003_v19 = vmax.f32 %v1001_v1, %v1002_v7  ;;  %v1010_v23 = vmax.f32 %v1008_v2, %v1009_v11  ;;  %v5973_v3 = vpop.f32.mrf.mxu0 }
  0xdc   : > { %v978_v20 = vrot.slane %v977_v9, 1  ;;  %v1016_v27 = vrot.slane %v1015_v12, 4  ;;  %v1023_v28 = vrot.slane %v1022_v13, 4  ;;  %v998_v30 = vmax.f32 %v996_v6, %v997_v18 }
  0xdd   : > { %v985_v0 = vrot.slane %v984_v14, 1  ;;  %v992_v24 = vrot.slane %v991_v17, 1  ;;  %v1004_v31 = vrot.slane %v1003_v19, 2  ;;  %v1011_v39 = vrot.slane %v1010_v23, 2 }
  0xde   : > { %v979_v38 = vmax.f32 %v977_v9, %v978_v20  ;;  %v1017_v40 = vmax.f32 %v1015_v12, %v1016_v27  ;;  %v1024_v52 = vmax.f32 %v1022_v13, %v1023_v28  ;;  %v999_v44 = vrot.slane %v998_v30, 1 }
  0xdf   : > { %v986_v42 = vmax.f32 %v984_v14, %v985_v0  ;;  %v993_v43 = vmax.f32 %v991_v17, %v992_v24  ;;  %v1005_v45 = vmax.f32 %v1003_v19, %v1004_v31  ;;  %v1012_v47 = vmax.f32 %v1010_v23, %v1011_v39  ;;  %v5983_v24 = vld [vmem:[#allocation2 + $0x8] sm:$0xf] }
  0xe0   : > { %v1709_v46 = vmax.f32 %v5930_v21, %v979_v38  ;;  %v1018_v49 = vrot.slane %v1017_v40, 2  ;;  %v1025_v36 = vrot.slane %v1024_v52, 2  ;;  %v1000_v50 = vmax.f32 %v998_v30, %v999_v44 }
  0xe1   : > { %v1710_v16 = vmax.f32 %v5932_v22, %v986_v42  ;;  %v1711_v26 = vmax.f32 %v5934_v15, %v993_v43  ;;  %v1006_v33 = vrot.slane %v1005_v45, 1  ;;  %v1013_v54 = vrot.slane %v1012_v47, 1 }
  0xe2   : > { %v1793_v53 = vpack.c.bf16 %v1709_v46, %v1709_v46  ;;  %v1019_v55 = vmax.f32 %v1017_v40, %v1018_v49  ;;  %v1026_v56 = vmax.f32 %v1024_v52, %v1025_v36  ;;  %v1712_v57 = vmax.f32 %v5939_v32, %v1000_v50  ;;  %v2079_v52 = vld [vmem:[#allocation2 + $0x14] sm:$0x1]  ;;  %v2076_v49 = vld [vmem:[#allocation2 + $0x10] sm:$0xf] }
  0xe3   : > { %v1794_v58 = vpack.c.bf16 %v1710_v16, %v1710_v16  ;;  %v1795_v34 = vpack.c.bf16 %v1711_v26, %v1711_v26  ;;  %v1007_v59 = vmax.f32 %v1005_v45, %v1006_v33  ;;  %v1014_v21 = vmax.f32 %v1012_v47, %v1013_v54  ;;  %v2119_v54 = vld [vmem:[#allocation2 + $0x4] sm:$0x1] }
  0xe4   : > { %v1921_v60 = vunpack.c.l.b16 %v1793_v53  ;;  %v1020_v61 = vrot.slane %v1019_v55, 1  ;;  %v1027_v62 = vrot.slane %v1026_v56, 1  ;;  %v1796_v1 = vpack.c.bf16 %v1712_v57, %v1712_v57 }
  0xe5   : > { %v1922_v22 = vunpack.c.l.b16 %v1794_v58  ;;  %v1923_v2 = vunpack.c.l.b16 %v1795_v34  ;;  %v1713_v15 = vmax.f32 %v5947_v48, %v1007_v59  ;;  %v1714_v32 = vmax.f32 %v5950_v8, %v1014_v21  ;;  %v5999_v34 = vld [vmem:[#allocation2 + $0xc] sm:$0x1] }
  0xe6   : > { %v1021_v4 = vmax.f32 %v1019_v55, %v1020_v61  ;;  %v1028_v6 = vmax.f32 %v1026_v56, %v1027_v62  ;;  %v556_v7 = vmax.f32 %v5942_v25, 0.0  ;;  %v1924_v9 = vunpack.c.l.b16 %v1796_v1  ;;  %v5995_v55 = vpop.f32.mrf.mxu0 }
  0xe7   : > { %v1989_v11 = vsel %vm1977_vm2, %v1922_v22, %v1921_v60  ;;  %v1797_v12 = vpack.c.bf16 %v1713_v15, %v1713_v15  ;;  %v2344_v13 = vunpack.c.l.b16 %v5970_v63  ;;  %v1798_v18 = vpack.c.bf16 %v1714_v32, %v1714_v32  ;;  %v5480_v15 = vld [vmem:[%s5713_s10 + $0x68] sm:$0xff] }
  0xe8   : > { %v1990_v14 = vsel %vm1979_vm3, %v1923_v2, %v1989_v11  ;;  %v1715_v17 = vmax.f32 %v5954_v51, %v1021_v4  ;;  %v1716_v48 = vmax.f32 %v5957_v35, %v1028_v6  ;;  %v636_v23 = vrot.slane %v556_v7, 2  ;;  %4869 = vmatmul.msk.bf16.gmra.mxu0 %vm410_vm0, %v5480_v15 }
  0xe9   : > { %v1991_v19 = vsel %vm1981_vm4, %v1924_v9, %v1990_v14  ;;  %v1925_v20 = vunpack.c.l.b16 %v1797_v12  ;;  %v637_v8 = vrot.slane %v556_v7, 4  ;;  %v1926_v28 = vunpack.c.l.b16 %v1798_v18 }
  0xea   : > { %v1799_v27 = vpack.c.bf16 %v1715_v17, %v1715_v17  ;;  %v1800_v25 = vpack.c.bf16 %v1716_v48, %v1716_v48  ;;  %v638_v0 = vrot.slane %v556_v7, 6  ;;  %v1029_v31 = vsel %vm804_vm1, %v556_v7, -inf }
  0xeb   : > { %v1992_v30 = vsel %vm1983_vm5, %v1925_v20, %v1991_v19  ;;  %v1036_v51 = vsel %vm804_vm1, %v636_v23, -inf  ;;  %v1043_v35 = vsel %vm804_vm1, %v637_v8, -inf  ;;  %v1030_v40 = vrot.slane %v1029_v31, 4 }
  0xec   : > { %v1927_v37 = vunpack.c.l.b16 %v1799_v27  ;;  %v1928_v38 = vunpack.c.l.b16 %v1800_v25  ;;  %v1993_v39 = vsel %vm1985_vm6, %v1926_v28, %v1992_v30  ;;  %v1037_v42 = vrot.slane %v1036_v51, 4 }
  0xed   : > { %v1044_v43 = vrot.slane %v1043_v35, 4  ;;  %v1050_v44 = vsel %vm804_vm1, %v638_v0, -inf  ;;  %v7361_v45 = vunpack.c.l.b16 %v5983_v24  ;;  %v1031_v36 = vmax.f32 %v1029_v31, %v1030_v40 }
  0xee   : > { %v1994_v46 = vsel %vm1987_vm9, %v1927_v37, %v1993_v39  ;;  %v2034_v47 = vpack.c.b16 %v1928_v38, %v1928_v38  ;;  %v1051_v50 = vrot.slane %v1050_v44, 4  ;;  %v1038_v26 = vmax.f32 %v1036_v51, %v1037_v42 }
  0xef   : > { %v2033_v16 = vpack.c.b16 %v1994_v46, %v1994_v46  ;;  %v1045_v33 = vmax.f32 %v1043_v35, %v1044_v43  ;;  %v2352_v53 = vpack.c.b16 %v7361_v45, %v2344_v13  ;;  %v1032_v57 = vrot.slane %v1031_v36, 2 }
  0xf0   : > { %v2080_v56 = vsel %vm5888_vm12, %v2034_v47, %v2079_v52  ;;  %v1052_v58 = vmax.f32 %v1050_v44, %v1051_v50  ;;  %v1039_v60 = vrot.slane %v1038_v26, 2  ;;  %v4872_v22 = vrot.slane %v5970_v63, 9 }
  0xf1   : > { %v2077_v59 = vsel %vm5900_vm13, %v2033_v16, %v2076_v49  ;;  %2081 = vst [vmem:[#allocation2 + $0x14] sm:$0x1] %v2080_v56  ;;  %v1046_v21 = vrot.slane %v1045_v33, 2  ;;  %3016 = vmatmul.bf16.vlgmr.msra.gmra.mxu1 %v2352_v53  ;;  %v1033_v61 = vmax.f32 %v1031_v36, %v1032_v57  ;;  %v2274_v2 = vrot.slane %v2119_v54, 5  ;;  %v6046_v56 = vld [vmem:[%s7346_s2] ss:$0 sm:$0xff] }
  0xf2   : > { %2078 = vst [vmem:[#allocation2 + $0x10] sm:$0xf] %v2077_v59  ;;  %v1053_v62 = vrot.slane %v1052_v58, 2  ;;  %v1040_v4 = vmax.f32 %v1038_v26, %v1039_v60  ;;  %v4873_v32 = vrot.slane %v5983_v24, 9  ;;  %v2278_v7 = vrot.slane %v5999_v34, 5 }
  0xf3   : > { %v1047_v6 = vmax.f32 %v1045_v33, %v1046_v21  ;;  %v1034_v9 = vrot.slane %v1033_v61, 1  ;;  %v2275_v12 = vsel %vm6004_vm8, %v4872_v22, %v2274_v2  ;;  %v491_v23 = vadd.f32 %v5734_v10, %v5973_v3  ;;  %v6036_v3 = vpop.f32.mrf.mxu0 }
  0xf4   : > { %v1054_v11 = vmax.f32 %v1052_v58, %v1053_v62  ;;  %v1041_v13 = vrot.slane %v1040_v4, 1  ;;  %v6017_v17 = vsel %vm6004_vm8, %v4873_v32, %v2278_v7  ;;  %v2376_v48 = vunpack.c.l.b16 %v2275_v12 }
  0xf5   : > { %v1048_v14 = vrot.slane %v1047_v6, 1  ;;  %v6019_v18 = vmax.f32 %v1033_v61, %v1034_v9  ;;  %v7359_v20 = vunpack.c.l.b16 %v6017_v17  ;;  %v557_v0 = vmax.f32 %v491_v23, 0.0 }
  0xf6   : > { %v1055_v19 = vrot.slane %v1054_v11, 1  ;;  %v6024_v8 = vmax.f32 %v1040_v4, %v1041_v13  ;;  %v2142_v30 = vshrl.u32 %v5970_v63, 16  ;;  %v2145_v31 = vshll.u32 %v5970_v63, 16  ;;  %v5481_v13 = vld [vmem:[%s5713_s10 + $0x70] sm:$0xff] }
  0xf7   : > { %v6026_v27 = vmax.f32 %v1047_v6, %v1048_v14  ;;  %v2384_v28 = vpack.c.b16 %v7359_v20, %v2376_v48  ;;  %v2151_v51 = vshll.u32 %v2119_v54, 16  ;;  %v2156_v35 = vshrl.u32 %v5983_v24, 16 }
  0xf8   : > { %v6028_v25 = vmax.f32 %v1054_v11, %v1055_v19  ;;  %v2159_v10 = vshll.u32 %v5983_v24, 16  ;;  %v639_v37 = vrot.slane %v557_v0, 2  ;;  %v640_v38 = vrot.slane %v557_v0, 4  ;;  %4870 = vmatmul.msk.bf16.gmra.mxu0 %vm410_vm0, %v5481_v13 }
  0xf9   : > { %3074 = vmatmul.bf16.vlgmr.msra.gmra.mxu3 %v2384_v28  ;;  %v641_v39 = vrot.slane %v557_v0, 6  ;;  %v1057_v40 = vsel %vm804_vm1, %v557_v0, -inf  ;;  %v2144_v42 = vrot.slane %v2142_v30, 4  ;;  %v2147_v43 = vrot.slane %v2145_v31, 5 }
  0xfa   : > { %v1058_v52 = vrot.slane %v1057_v40, 4  ;;  %v2153_v44 = vrot.slane %v2151_v51, 5  ;;  %v1064_v46 = vsel %vm804_vm1, %v639_v37, -inf  ;;  %v1071_v63 = vsel %vm804_vm1, %v640_v38, -inf }
  0xfb   : > { %v1078_v47 = vsel %vm804_vm1, %v641_v39, -inf  ;;  %v2158_v49 = vrot.slane %v2156_v35, 4  ;;  %v1065_v50 = vrot.slane %v1064_v46, 4  ;;  %v1072_v16 = vrot.slane %v1071_v63, 4 }
  0xfc   : > { %v1059_v36 = vmax.f32 %v1057_v40, %v1058_v52  ;;  %v1079_v26 = vrot.slane %v1078_v47, 4  ;;  %v2148_v33 = vor.u32 %v2147_v43, %v2144_v42  ;;  %v2161_v53 = vrot.slane %v2159_v10, 5 }
  0xfd   : > { %v2165_v54 = vshll.u32 %v5999_v34, 16  ;;  %v494_v57 = vadd.f32 %v6046_v56, %v5995_v55  ;;  %v1066_v59 = vmax.f32 %v1064_v46, %v1065_v50  ;;  %v1073_v60 = vmax.f32 %v1071_v63, %v1072_v16  ;;  %v498_v55 = vpop.f32.mrf.mxu0  ;;  %v6075_v63 = vld [vmem:[#allocation2 + $0x10] sm:$0xf] }
  0xfe   : > { %v1060_v58 = vrot.slane %v1059_v36, 2  ;;  %v1080_v21 = vmax.f32 %v1078_v47, %v1079_v26  ;;  %v2149_v34 = vrot.slane %v2148_v33, 4  ;;  %v2162_v62 = vor.u32 %v2161_v53, %v2158_v49 }
  0xff   : > { %v2167_v22 = vrot.slane %v2165_v54, 5  ;;  %v558_v2 = vmax.f32 %v494_v57, 0.0  ;;  %v1067_v4 = vrot.slane %v1066_v59, 2  ;;  %v1074_v6 = vrot.slane %v1073_v60, 2 }
 0x100   : > { %v1061_v15 = vmax.f32 %v1059_v36, %v1060_v58  ;;  %v1081_v32 = vrot.slane %v1080_v21, 2  ;;  %v2154_v7 = vsel %vm6052_vm15, %v2149_v34, %v2153_v44  ;;  %v2163_v9 = vrot.slane %v2162_v62, 4 }
 0x101   : > { %v642_v11 = vrot.slane %v558_v2, 2  ;;  %v643_v12 = vrot.slane %v558_v2, 4  ;;  %v1068_v48 = vmax.f32 %v1066_v59, %v1067_v4  ;;  %v1075_v19 = vmax.f32 %v1073_v60, %v1074_v6 }
 0x102   : > { %v1062_v14 = vrot.slane %v1061_v15, 1  ;;  %v1082_v23 = vmax.f32 %v1080_v21, %v1081_v32  ;;  %v2168_v28 = vsel %vm6052_vm15, %v2163_v9, %v2167_v22  ;;  %v2360_v0 = vunpack.c.l.b16 %v2154_v7 }
 0x103   : > { %v644_v30 = vrot.slane %v558_v2, 6  ;;  %v1085_v31 = vsel %vm804_vm1, %v558_v2, -inf  ;;  %v1069_v35 = vrot.slane %v1068_v48, 1  ;;  %v1076_v10 = vrot.slane %v1075_v19, 1 }
 0x104   : > { %v6063_v51 = vmax.f32 %v1061_v15, %v1062_v14  ;;  %v1083_v37 = vrot.slane %v1082_v23, 1  ;;  %v6065_v38 = vunpack.c.l.b16 %v2168_v28  ;;  %v1086_v39 = vrot.slane %v1085_v31, 4 }
 0x105   : > { %v1092_v40 = vsel %vm804_vm1, %v642_v11, -inf  ;;  %v1099_v52 = vsel %vm804_vm1, %v643_v12, -inf  ;;  %v6069_v42 = vmax.f32 %v1068_v48, %v1069_v35  ;;  %v6071_v43 = vmax.f32 %v1075_v19, %v1076_v10  ;;  %v500_v54 = vpop.f32.mrf.mxu0 }
 0x106   : > { %v6073_v44 = vmax.f32 %v1082_v23, %v1083_v37  ;;  %v1093_v46 = vrot.slane %v1092_v40, 4  ;;  %v2368_v47 = vpack.c.b16 %v6065_v38, %v2360_v0  ;;  %v1087_v49 = vmax.f32 %v1085_v31, %v1086_v39 }
 0x107   : > { %v1100_v36 = vrot.slane %v1099_v52, 4  ;;  %v1106_v50 = vsel %vm804_vm1, %v644_v30, -inf  ;;  %v496_v33 = vadd.f32 %v6046_v56, %v6036_v3  ;;  %v499_v53 = vadd.f32 %v6046_v56, %v498_v55 }
 0x108   : > { %v1094_v16 = vmax.f32 %v1092_v40, %v1093_v46  ;;  %v1107_v26 = vrot.slane %v1106_v50, 4  ;;  %3045 = vmatmul.bf16.vlgmr.msra.gmra.mxu2 %v2368_v47  ;;  %v1088_v57 = vrot.slane %v1087_v49, 2  ;;  %v501_v59 = vadd.f32 %v6046_v56, %v500_v54 }
 0x109   : > { %v1101_v58 = vmax.f32 %v1099_v52, %v1100_v36  ;;  %v7360_v60 = vunpack.c.l.b16 %v6075_v63  ;;  %v559_v62 = vmax.f32 %v496_v33, 0.0  ;;  %v6084_v22 = vmax.f32 %v499_v53, 0.0 }
 0x10a   : > { %v1095_v21 = vrot.slane %v1094_v16, 2  ;;  %v1108_v34 = vmax.f32 %v1106_v50, %v1107_v26  ;;  %v1089_v2 = vmax.f32 %v1087_v49, %v1088_v57  ;;  %v6086_v4 = vmax.f32 %v501_v59, 0.0  ;;  %v5482_v49 = vld [vmem:[%s5713_s10 + $0x78] sm:$0xff] }
 0x10b   : > { %v1102_v15 = vrot.slane %v1101_v58, 2  ;;  %v4874_v3 = vrot.slane %v6075_v63, 9  ;;  %v645_v55 = vrot.slane %v559_v62, 2  ;;  %v646_v7 = vrot.slane %v559_v62, 4  ;;  %4871 = vmatmul.msk.bf16.gmra.mxu0 %vm410_vm0, %v5482_v49 }
 0x10c   : > { %v1096_v6 = vmax.f32 %v1094_v16, %v1095_v21  ;;  %v1109_v32 = vrot.slane %v1108_v34, 2  ;;  %v1090_v9 = vrot.slane %v1089_v2, 1  ;;  %v647_v12 = vrot.slane %v559_v62, 6 }
 0x10d   : > { %v1103_v11 = vmax.f32 %v1101_v58, %v1102_v15  ;;  %v1113_v13 = vsel %vm804_vm1, %v559_v62, -inf  ;;  %v1120_v23 = vsel %vm804_vm1, %v645_v55, -inf  ;;  %v1127_v31 = vsel %vm804_vm1, %v646_v7, -inf }
 0x10e   : > { %v1097_v14 = vrot.slane %v1096_v6, 1  ;;  %v1110_v48 = vmax.f32 %v1108_v34, %v1109_v32  ;;  %v1114_v19 = vrot.slane %v1113_v13, 4  ;;  %v1091_v28 = vmax.f32 %v1089_v2, %v1090_v9  ;;  %v6099_v34 = vpop.f32.mrf.mxu0 }
 0x10f   : > { %v1104_v0 = vrot.slane %v1103_v11, 1  ;;  %v1121_v30 = vrot.slane %v1120_v23, 4  ;;  %v1128_v39 = vrot.slane %v1127_v31, 4  ;;  %v1134_v47 = vsel %vm804_vm1, %v647_v12, -inf }
 0x110   : > { %v1098_v35 = vmax.f32 %v1096_v6, %v1097_v14  ;;  %v1111_v10 = vrot.slane %v1110_v48, 1  ;;  %v1115_v37 = vmax.f32 %v1113_v13, %v1114_v19  ;;  %v1717_v52 = vmax.f32 %v6019_v18, %v1091_v28 }
 0x111   : > { %v1105_v40 = vmax.f32 %v1103_v11, %v1104_v0  ;;  %v1122_v46 = vmax.f32 %v1120_v23, %v1121_v30  ;;  %v1129_v26 = vmax.f32 %v1127_v31, %v1128_v39  ;;  %v1135_v57 = vrot.slane %v1134_v47, 4 }
 0x112   : > { %v1112_v36 = vmax.f32 %v1110_v48, %v1111_v10  ;;  %v1718_v50 = vmax.f32 %v6024_v8, %v1098_v35  ;;  %v1116_v16 = vrot.slane %v1115_v37, 2  ;;  %v1801_v53 = vpack.c.bf16 %v1717_v52, %v1717_v52 }
 0x113   : > { %v1719_v33 = vmax.f32 %v6026_v27, %v1105_v40  ;;  %v1123_v54 = vrot.slane %v1122_v46, 2  ;;  %v1130_v21 = vrot.slane %v1129_v26, 2  ;;  %v1136_v8 = vmax.f32 %v1134_v47, %v1135_v57 }
 0x114   : > { %v1720_v58 = vmax.f32 %v6028_v25, %v1112_v36  ;;  %v1802_v59 = vpack.c.bf16 %v1718_v50, %v1718_v50  ;;  %v1117_v18 = vmax.f32 %v1115_v37, %v1116_v16  ;;  %v1929_v2 = vunpack.c.l.b16 %v1801_v53 }
 0x115   : > { %v1803_v62 = vpack.c.bf16 %v1719_v33, %v1719_v33  ;;  %v1124_v15 = vmax.f32 %v1122_v46, %v1123_v54  ;;  %v1131_v27 = vmax.f32 %v1129_v26, %v1130_v21  ;;  %v1137_v11 = vrot.slane %v1136_v8, 2 }
 0x116   : > { %v1804_v6 = vpack.c.bf16 %v1720_v58, %v1720_v58  ;;  %v1930_v32 = vunpack.c.l.b16 %v1802_v59  ;;  %v1118_v55 = vrot.slane %v1117_v18, 1  ;;  %v648_v12 = vrot.slane %v6084_v22, 2  ;;  %v505_v57 = vpop.f32.mrf.mxu0 }
 0x117   : > { %v1931_v7 = vunpack.c.l.b16 %v1803_v62  ;;  %v1125_v9 = vrot.slane %v1124_v15, 1  ;;  %v1132_v48 = vrot.slane %v1131_v27, 1  ;;  %v1138_v28 = vmax.f32 %v1136_v8, %v1137_v11 }
 0x118   : > { %v1932_v13 = vunpack.c.l.b16 %v1804_v6  ;;  %v1995_v25 = vsel %vm1977_vm2, %v1930_v32, %v1929_v2  ;;  %v1119_v14 = vmax.f32 %v1117_v18, %v1118_v55  ;;  %v649_v0 = vrot.slane %v6084_v22, 4 }
 0x119   : > { %v1996_v19 = vsel %vm1979_vm3, %v1931_v7, %v1995_v25  ;;  %v1126_v23 = vmax.f32 %v1124_v15, %v1125_v9  ;;  %v1133_v31 = vmax.f32 %v1131_v27, %v1132_v48  ;;  %v650_v10 = vrot.slane %v6084_v22, 6  ;;  %v2082_v27 = vld [vmem:[#allocation2 + $0x18] sm:$0xf] }
 0x11a   : > { %v1997_v30 = vsel %vm1981_vm4, %v1932_v13, %v1996_v19  ;;  %v1721_v35 = vmax.f32 %v6063_v51, %v1119_v14  ;;  %v1139_v37 = vrot.slane %v1138_v28, 1  ;;  %v1141_v40 = vsel %vm804_vm1, %v6084_v22, -inf  ;;  %v2085_v14 = vld [vmem:[#allocation2 + $0x1c] sm:$0x1] }
 0x11b   : > { %v1722_v39 = vmax.f32 %v6069_v42, %v1126_v23  ;;  %v1148_v52 = vsel %vm804_vm1, %v648_v12, -inf  ;;  %v1723_v46 = vmax.f32 %v6071_v43, %v1133_v31  ;;  %v1142_v49 = vrot.slane %v1141_v40, 4 }
 0x11c   : > { %v1805_v47 = vpack.c.bf16 %v1721_v35, %v1721_v35  ;;  %v1149_v36 = vrot.slane %v1148_v52, 4  ;;  %v1140_v50 = vmax.f32 %v1138_v28, %v1139_v37  ;;  %v1155_v26 = vsel %vm804_vm1, %v649_v0, -inf }
 0x11d   : > { %v1806_v16 = vpack.c.bf16 %v1722_v39, %v1722_v39  ;;  %v1162_v51 = vsel %vm804_vm1, %v650_v10, -inf  ;;  %v1807_v33 = vpack.c.bf16 %v1723_v46, %v1723_v46  ;;  %v1143_v54 = vmax.f32 %v1141_v40, %v1142_v49 }
 0x11e   : > { %v1933_v53 = vunpack.c.l.b16 %v1805_v47  ;;  %v1150_v42 = vmax.f32 %v1148_v52, %v1149_v36  ;;  %v1724_v22 = vmax.f32 %v6073_v44, %v1140_v50  ;;  %v1156_v59 = vrot.slane %v1155_v26, 4  ;;  %v6133_v36 = vld [vmem:[#allocation2 + $0x14] sm:$0x1] }
 0x11f   : > { %v1934_v58 = vunpack.c.l.b16 %v1806_v16  ;;  %v1163_v18 = vrot.slane %v1162_v51, 4  ;;  %v1935_v43 = vunpack.c.l.b16 %v1807_v33  ;;  %v1144_v62 = vrot.slane %v1143_v54, 2 }
 0x120   : > { %v1998_v21 = vsel %vm1983_vm5, %v1933_v53, %v1997_v30  ;;  %v1151_v2 = vrot.slane %v1150_v42, 2  ;;  %v1808_v15 = vpack.c.bf16 %v1724_v22, %v1724_v22  ;;  %v1157_v6 = vmax.f32 %v1155_v26, %v1156_v59 }
 0x121   : > { %v1999_v8 = vsel %vm1985_vm6, %v1934_v58, %v1998_v21  ;;  %v1164_v32 = vmax.f32 %v1162_v51, %v1163_v18  ;;  %v1145_v7 = vmax.f32 %v1143_v54, %v1144_v62  ;;  %v651_v44 = vrot.slane %v6086_v4, 2 }
 0x122   : > { %v2000_v55 = vsel %vm1987_vm9, %v1935_v43, %v1999_v8  ;;  %v1152_v9 = vmax.f32 %v1150_v42, %v1151_v2  ;;  %v1936_v11 = vunpack.c.l.b16 %v1808_v15  ;;  %v1158_v13 = vrot.slane %v1157_v6, 2 }
 0x123   : > { %v2035_v12 = vpack.c.b16 %v2000_v55, %v2000_v55  ;;  %v1165_v25 = vrot.slane %v1164_v32, 2  ;;  %v1146_v48 = vrot.slane %v1145_v7, 1  ;;  %v652_v23 = vrot.slane %v6086_v4, 4 }
 0x124   : > { %v1153_v19 = vrot.slane %v1152_v9, 1  ;;  %v653_v28 = vrot.slane %v6086_v4, 6  ;;  %v2036_v0 = vpack.c.b16 %v1936_v11, %v1936_v11  ;;  %v1159_v31 = vmax.f32 %v1157_v6, %v1158_v13 }
 0x125   : > { %v2083_v30 = vsel %vm5900_vm13, %v2035_v12, %v2082_v27  ;;  %v1166_v35 = vmax.f32 %v1164_v32, %v1165_v25  ;;  %v6124_v10 = vmax.f32 %v1145_v7, %v1146_v48  ;;  %v1169_v39 = vsel %vm804_vm1, %v6086_v4, -inf  ;;  %v508_v4 = vpop.f32.mrf.mxu0 }
 0x126   : > { %2084 = vst [vmem:[#allocation2 + $0x18] sm:$0xf] %v2083_v30  ;;  %v6126_v37 = vmax.f32 %v1152_v9, %v1153_v19  ;;  %v1176_v40 = vsel %vm804_vm1, %v651_v44, -inf  ;;  %v2086_v52 = vsel %vm5888_vm12, %v2036_v0, %v2085_v14  ;;  %v1160_v46 = vrot.slane %v1159_v31, 1 }
 0x127   : > { %v1167_v47 = vrot.slane %v1166_v35, 1  ;;  %v1170_v49 = vrot.slane %v1169_v39, 4  ;;  %2087 = vst [vmem:[#allocation2 + $0x1c] sm:$0x1] %v2086_v52  ;;  %v1177_v50 = vrot.slane %v1176_v40, 4  ;;  %v1183_v16 = vsel %vm804_vm1, %v652_v23, -inf }
 0x128   : > { %v1190_v26 = vsel %vm804_vm1, %v653_v28, -inf  ;;  %v504_v51 = vadd.f32 %v6046_v56, %v6099_v34  ;;  %v6139_v33 = vmax.f32 %v1159_v31, %v1160_v46  ;;  %v1184_v42 = vrot.slane %v1183_v16, 4 }
 0x129   : > { %v6141_v53 = vmax.f32 %v1166_v35, %v1167_v47  ;;  %v1171_v54 = vmax.f32 %v1169_v39, %v1170_v49  ;;  %v1178_v22 = vmax.f32 %v1176_v40, %v1177_v50  ;;  %v1191_v58 = vrot.slane %v1190_v26, 4 }
 0x12a   : > { %v562_v59 = vmax.f32 %v504_v51, 0.0  ;;  %v506_v18 = vadd.f32 %v6046_v56, %v505_v57  ;;  %v1185_v21 = vmax.f32 %v1183_v16, %v1184_v42  ;;  %v509_v62 = vadd.f32 %v6046_v56, %v508_v4 }
 0x12b   : > { %v1172_v43 = vrot.slane %v1171_v54, 2  ;;  %v2282_v2 = vrot.slane %v6133_v36, 5  ;;  %v1179_v15 = vrot.slane %v1178_v22, 2  ;;  %v1192_v34 = vmax.f32 %v1190_v26, %v1191_v58 }
 0x12c   : > { %v654_v8 = vrot.slane %v562_v59, 2  ;;  %v655_v6 = vrot.slane %v562_v59, 4  ;;  %v1186_v55 = vrot.slane %v1185_v21, 2  ;;  %v656_v27 = vrot.slane %v562_v59, 6 }
 0x12d   : > { %v1173_v32 = vmax.f32 %v1171_v54, %v1172_v43  ;;  %v1197_v7 = vsel %vm804_vm1, %v562_v59, -inf  ;;  %v1180_v9 = vmax.f32 %v1178_v22, %v1179_v15  ;;  %v1193_v44 = vrot.slane %v1192_v34, 2 }
 0x12e   : > { %v1198_v11 = vrot.slane %v1197_v7, 4  ;;  %v1204_v57 = vsel %vm804_vm1, %v654_v8, -inf  ;;  %v1187_v13 = vmax.f32 %v1185_v21, %v1186_v55  ;;  %v1211_v14 = vsel %vm804_vm1, %v655_v6, -inf }
 0x12f   : > { %v1174_v12 = vrot.slane %v1173_v32, 1  ;;  %v1205_v25 = vrot.slane %v1204_v57, 4  ;;  %v1181_v48 = vrot.slane %v1180_v9, 1  ;;  %v1194_v19 = vmax.f32 %v1192_v34, %v1193_v44 }
 0x130   : > { %v1199_v23 = vmax.f32 %v1197_v7, %v1198_v11  ;;  %v1212_v28 = vrot.slane %v1211_v14, 4  ;;  %v1188_v30 = vrot.slane %v1187_v13, 1  ;;  %v1218_v35 = vsel %vm804_vm1, %v656_v27, -inf }
 0x131   : > { %v6149_v0 = vmax.f32 %v1173_v32, %v1174_v12  ;;  %v1206_v31 = vmax.f32 %v1204_v57, %v1205_v25  ;;  %v6152_v39 = vmax.f32 %v1180_v9, %v1181_v48  ;;  %v1195_v40 = vrot.slane %v1194_v19, 1 }
 0x132   : > { %v1200_v52 = vrot.slane %v1199_v23, 2  ;;  %v1213_v46 = vmax.f32 %v1211_v14, %v1212_v28  ;;  %v6154_v47 = vmax.f32 %v1187_v13, %v1188_v30  ;;  %v1219_v50 = vrot.slane %v1218_v35, 4 }
 0x133   : > { %v1207_v49 = vrot.slane %v1206_v31, 2  ;;  %v563_v16 = vmax.f32 %v506_v18, 0.0  ;;  %v6156_v26 = vmax.f32 %v1194_v19, %v1195_v40  ;;  %v6158_v54 = vmax.f32 %v509_v62, 0.0 }
 0x134   : > { %v1201_v51 = vmax.f32 %v1199_v23, %v1200_v52  ;;  %v1214_v4 = vrot.slane %v1213_v46, 2  ;;  %v1220_v22 = vmax.f32 %v1218_v35, %v1219_v50  ;;  %vm3648_vm0 = vsmask.f32 2306 }
 0x135   : > { %v1208_v42 = vmax.f32 %v1206_v31, %v1207_v49  ;;  %v657_v58 = vrot.slane %v563_v16, 2  ;;  %v658_v59 = vrot.slane %v563_v16, 4  ;;  %v659_v15 = vrot.slane %v563_v16, 6 }
 0x136   : > { %v1202_v43 = vrot.slane %v1201_v51, 1  ;;  %v1215_v21 = vmax.f32 %v1213_v46, %v1214_v4  ;;  %v1225_v34 = vsel %vm804_vm1, %v563_v16, -inf  ;;  %v1221_v6 = vrot.slane %v1220_v22, 2 }
 0x137   : > { %v1209_v8 = vrot.slane %v1208_v42, 1  ;;  %v1226_v32 = vrot.slane %v1225_v34, 4  ;;  %v1232_v18 = vsel %vm804_vm1, %v657_v58, -inf  ;;  %v1239_v62 = vsel %vm804_vm1, %v658_v59, -inf }
 0x138   : > { %v1203_v55 = vmax.f32 %v1201_v51, %v1202_v43  ;;  %v1216_v27 = vrot.slane %v1215_v21, 1  ;;  %v1233_v7 = vrot.slane %v1232_v18, 4  ;;  %v1222_v44 = vmax.f32 %v1220_v22, %v1221_v6 }
 0x139   : > { %v1210_v9 = vmax.f32 %v1208_v42, %v1209_v8  ;;  %v1227_v11 = vmax.f32 %v1225_v34, %v1226_v32  ;;  %v1240_v57 = vrot.slane %v1239_v62, 4  ;;  %v1246_v14 = vsel %vm804_vm1, %v659_v15, -inf }
 0x13a   : > { %v1217_v12 = vmax.f32 %v1215_v21, %v1216_v27  ;;  %v1725_v13 = vmax.f32 %v6124_v10, %v1203_v55  ;;  %v1234_v25 = vmax.f32 %v1232_v18, %v1233_v7  ;;  %v1223_v48 = vrot.slane %v1222_v44, 1 }
 0x13b   : > { %v1726_v19 = vmax.f32 %v6126_v37, %v1210_v9  ;;  %v1228_v23 = vrot.slane %v1227_v11, 2  ;;  %v1241_v28 = vmax.f32 %v1239_v62, %v1240_v57  ;;  %v1247_v40 = vrot.slane %v1246_v14, 4 }
 0x13c   : > { %v1727_v30 = vmax.f32 %v6139_v33, %v1217_v12  ;;  %v1809_v31 = vpack.c.bf16 %v1725_v13, %v1725_v13  ;;  %v1235_v35 = vrot.slane %v1234_v25, 2  ;;  %v1224_v52 = vmax.f32 %v1222_v44, %v1223_v48  ;;  %v510_v44 = vpop.f32.mrf.mxu0 }
 0x13d   : > { %v1810_v46 = vpack.c.bf16 %v1726_v19, %v1726_v19  ;;  %v1229_v49 = vmax.f32 %v1227_v11, %v1228_v23  ;;  %v1242_v50 = vrot.slane %v1241_v28, 2  ;;  %v1248_v4 = vmax.f32 %v1246_v14, %v1247_v40 }
 0x13e   : > { %v1811_v16 = vpack.c.bf16 %v1727_v30, %v1727_v30  ;;  %v1937_v51 = vunpack.c.l.b16 %v1809_v31  ;;  %v1236_v10 = vmax.f32 %v1234_v25, %v1235_v35  ;;  %v1728_v42 = vmax.f32 %v6141_v53, %v1224_v52 }
 0x13f   : > { %v1938_v22 = vunpack.c.l.b16 %v1810_v46  ;;  %v1230_v58 = vrot.slane %v1229_v49, 1  ;;  %v1243_v37 = vmax.f32 %v1241_v28, %v1242_v50  ;;  %v1249_v21 = vrot.slane %v1248_v4, 2  ;;  %v6183_v50 = vld [vmem:[#allocation2 + $0x18] sm:$0xf] }
 0x140   : > { %v1939_v59 = vunpack.c.l.b16 %v1811_v16  ;;  %v1237_v43 = vrot.slane %v1236_v10, 1  ;;  %v660_v33 = vrot.slane %v6158_v54, 2  ;;  %v1812_v15 = vpack.c.bf16 %v1728_v42, %v1728_v42 }
 0x141   : > { %v2001_v34 = vsel %vm1977_vm2, %v1938_v22, %v1937_v51  ;;  %v1231_v8 = vmax.f32 %v1229_v49, %v1230_v58  ;;  %v1244_v6 = vrot.slane %v1243_v37, 1  ;;  %v1250_v55 = vmax.f32 %v1248_v4, %v1249_v21 }
 0x142   : > { %v2002_v32 = vsel %vm1979_vm3, %v1939_v59, %v2001_v34  ;;  %v1238_v18 = vmax.f32 %v1236_v10, %v1237_v43  ;;  %v661_v27 = vrot.slane %v6158_v54, 4  ;;  %v1940_v53 = vunpack.c.l.b16 %v1812_v15  ;;  %v2088_v59 = vld [vmem:[#allocation2 + $0x20] sm:$0xf] }
 0x143   : > { %v1245_v7 = vmax.f32 %v1243_v37, %v1244_v6  ;;  %v1729_v62 = vmax.f32 %v6149_v0, %v1231_v8  ;;  %v662_v9 = vrot.slane %v6158_v54, 6  ;;  %v1251_v11 = vrot.slane %v1250_v55, 1  ;;  %v2125_v6 = vld [vmem:[#allocation2 + $0x1c] sm:$0x1] }
 0x144   : > { %v1730_v57 = vmax.f32 %v6152_v39, %v1238_v18  ;;  %v1253_v12 = vsel %vm804_vm1, %v6158_v54, -inf  ;;  %v1260_v13 = vsel %vm804_vm1, %v660_v33, -inf  ;;  %v2003_v25 = vsel %vm1981_vm4, %v1940_v53, %v2002_v32  ;;  %v2091_v32 = vld [vmem:[#allocation2 + $0x24] sm:$0x1] }
 0x145   : > { %v1731_v14 = vmax.f32 %v6154_v47, %v1245_v7  ;;  %v1813_v48 = vpack.c.bf16 %v1729_v62, %v1729_v62  ;;  %v1254_v19 = vrot.slane %v1253_v12, 4  ;;  %v1252_v23 = vmax.f32 %v1250_v55, %v1251_v11  ;;  %v513_v7 = vpop.f32.mrf.mxu0 }
 0x146   : > { %v1814_v28 = vpack.c.bf16 %v1730_v57, %v1730_v57  ;;  %v1261_v0 = vrot.slane %v1260_v13, 4  ;;  %v1267_v30 = vsel %vm804_vm1, %v661_v27, -inf  ;;  %v1274_v49 = vsel %vm804_vm1, %v662_v9, -inf }
 0x147   : > { %v1815_v31 = vpack.c.bf16 %v1731_v14, %v1731_v14  ;;  %v1941_v35 = vunpack.c.l.b16 %v1813_v48  ;;  %v1255_v40 = vmax.f32 %v1253_v12, %v1254_v19  ;;  %v1268_v39 = vrot.slane %v1267_v30, 4 }
 0x148   : > { %v1732_v52 = vmax.f32 %v6156_v26, %v1252_v23  ;;  %v1942_v54 = vunpack.c.l.b16 %v1814_v28  ;;  %v1262_v46 = vmax.f32 %v1260_v13, %v1261_v0  ;;  %v1275_v58 = vrot.slane %v1274_v49, 4 }
 0x149   : > { %v1943_v47 = vunpack.c.l.b16 %v1815_v31  ;;  %v2004_v16 = vsel %vm1983_vm5, %v1941_v35, %v2003_v25  ;;  %v1256_v51 = vrot.slane %v1255_v40, 2  ;;  %v1269_v10 = vmax.f32 %v1267_v30, %v1268_v39 }
 0x14a   : > { %v1816_v4 = vpack.c.bf16 %v1732_v52, %v1732_v52  ;;  %v2005_v42 = vsel %vm1985_vm6, %v1942_v54, %v2004_v16  ;;  %v1263_v22 = vrot.slane %v1262_v46, 2  ;;  %v7357_v21 = vunpack.c.l.b16 %v6183_v50 }
 0x14b   : > { %v2006_v37 = vsel %vm1987_vm9, %v1943_v47, %v2005_v42  ;;  %v1257_v26 = vmax.f32 %v1255_v40, %v1256_v51  ;;  %v1270_v43 = vrot.slane %v1269_v10, 2  ;;  %v1276_v8 = vmax.f32 %v1274_v49, %v1275_v58 }
 0x14c   : > { %v1944_v33 = vunpack.c.l.b16 %v1816_v4  ;;  %v2037_v15 = vpack.c.b16 %v2006_v37, %v2006_v37  ;;  %v1264_v34 = vmax.f32 %v1262_v46, %v1263_v22  ;;  %v6193_v27 = vpack.c.b16 %v7357_v21, %v7360_v60 }
 0x14d   : > { %v1258_v18 = vrot.slane %v1257_v26, 1  ;;  %v1271_v55 = vmax.f32 %v1269_v10, %v1270_v43  ;;  %v6201_v53 = vsel %vm6004_vm8, %v4874_v3, %v2282_v2  ;;  %v1277_v57 = vrot.slane %v1276_v8, 2 }
 0x14e   : > { %v2038_v62 = vpack.c.b16 %v1944_v33, %v1944_v33  ;;  %v2089_v9 = vsel %vm5900_vm13, %v2037_v15, %v2088_v59  ;;  %v1265_v11 = vrot.slane %v1264_v34, 1  ;;  %3021 = vmatmul.bf16.gmra.mxu1 %v6193_v27  ;;  %v4875_v13 = vrot.slane %v6183_v50, 9  ;;  %v515_v15 = vpop.f32.mrf.mxu0 }
 0x14f   : > { %2090 = vst [vmem:[#allocation2 + $0x20] sm:$0xf] %v2089_v9  ;;  %v1272_v12 = vrot.slane %v1271_v55, 1  ;;  %v2286_v25 = vrot.slane %v2125_v6, 5  ;;  %v6209_v48 = vmax.f32 %v1257_v26, %v1258_v18  ;;  %v6213_v2 = vmax.f32 %v1276_v8, %v1277_v57 }
 0x150   : > { %v2092_v14 = vsel %vm5888_vm12, %v2038_v62, %v2091_v32  ;;  %v6211_v3 = vmax.f32 %v1264_v34, %v1265_v11  ;;  %v7358_v23 = vunpack.c.l.b16 %v6201_v53  ;;  %v511_v28 = vadd.f32 %v6046_v56, %v510_v44 }
 0x151   : > { %2093 = vst [vmem:[#allocation2 + $0x24] sm:$0x1] %v2092_v14  ;;  %v6217_v19 = vsel %vm6004_vm8, %v4875_v13, %v2286_v25  ;;  %v2170_v0 = vshrl.u32 %v6075_v63, 16  ;;  %v6222_v30 = vmax.f32 %v1271_v55, %v1272_v12  ;;  %v2173_v35 = vshll.u32 %v6075_v63, 16 }
 0x152   : > { %v7355_v31 = vunpack.c.l.b16 %v6217_v19  ;;  %v2179_v40 = vshll.u32 %v6133_v36, 16  ;;  %v565_v39 = vmax.f32 %v511_v28, 0.0  ;;  %v2184_v54 = vshrl.u32 %v6183_v50, 16 }
 0x153   : > { %v2172_v52 = vrot.slane %v2170_v0, 4  ;;  %v2187_v46 = vshll.u32 %v6183_v50, 16  ;;  %v1279_v49 = vrot.slane %v6213_v2, 1  ;;  %v2175_v47 = vrot.slane %v2173_v35, 5 }
 0x154   : > { %v6234_v44 = vpack.c.b16 %v7355_v31, %v7358_v23  ;;  %v2181_v16 = vrot.slane %v2179_v40, 5  ;;  %v663_v51 = vrot.slane %v565_v39, 2  ;;  %v664_v10 = vrot.slane %v565_v39, 4 }
 0x155   : > { %v665_v4 = vrot.slane %v565_v39, 6  ;;  %v1281_v36 = vsel %vm804_vm1, %v565_v39, -inf  ;;  %v2176_v22 = vor.u32 %v2175_v47, %v2172_v52  ;;  %v2186_v58 = vrot.slane %v2184_v54, 4 }
 0x156   : > { %3079 = vmatmul.bf16.gmra.mxu3 %v6234_v44  ;;  %v1282_v42 = vrot.slane %v1281_v36, 4  ;;  %v2189_v37 = vrot.slane %v2187_v46, 5  ;;  %v1288_v59 = vsel %vm804_vm1, %v663_v51, -inf  ;;  %v1295_v26 = vsel %vm804_vm1, %v664_v10, -inf }
 0x157   : > { %v1302_v43 = vsel %vm804_vm1, %v665_v4, -inf  ;;  %v2193_v33 = vshll.u32 %v2125_v6, 16  ;;  %v1289_v8 = vrot.slane %v1288_v59, 4  ;;  %v1296_v32 = vrot.slane %v1295_v26, 4 }
 0x158   : > { %v1283_v34 = vmax.f32 %v1281_v36, %v1282_v42  ;;  %v1303_v18 = vrot.slane %v1302_v43, 4  ;;  %v2177_v55 = vrot.slane %v2176_v22, 4  ;;  %v2190_v62 = vor.u32 %v2189_v37, %v2186_v58 }
 0x159   : > { %v2195_v9 = vrot.slane %v2193_v33, 5  ;;  %v514_v11 = vadd.f32 %v6046_v56, %v513_v7  ;;  %v1290_v12 = vmax.f32 %v1288_v59, %v1289_v8  ;;  %v1297_v13 = vmax.f32 %v1295_v26, %v1296_v32  ;;  %v518_v32 = vpop.f32.mrf.mxu0 }
 0x15a   : > { %v1284_v57 = vrot.slane %v1283_v34, 2  ;;  %v1304_v25 = vmax.f32 %v1302_v43, %v1303_v18  ;;  %v2182_v14 = vsel %vm6052_vm15, %v2177_v55, %v2181_v16  ;;  %v2191_v28 = vrot.slane %v2190_v62, 4 }
 0x15b   : > { %v566_v0 = vmax.f32 %v514_v11, 0.0  ;;  %v516_v6 = vadd.f32 %v6046_v56, %v515_v15  ;;  %v1291_v40 = vrot.slane %v1290_v12, 2  ;;  %v1298_v39 = vrot.slane %v1297_v13, 2 }
 0x15c   : > { %v1285_v35 = vmax.f32 %v1283_v34, %v1284_v57  ;;  %v1305_v52 = vrot.slane %v1304_v25, 2  ;;  %v2196_v54 = vsel %vm6052_vm15, %v2191_v28, %v2195_v9  ;;  %v6247_v46 = vunpack.c.l.b16 %v2182_v14 }
 0x15d   : > { %v666_v7 = vrot.slane %v566_v0, 2  ;;  %v667_v47 = vrot.slane %v566_v0, 4  ;;  %v1292_v10 = vmax.f32 %v1290_v12, %v1291_v40  ;;  %v1299_v4 = vmax.f32 %v1297_v13, %v1298_v39 }
 0x15e   : > { %v1286_v51 = vrot.slane %v1285_v35, 1  ;;  %v1306_v36 = vmax.f32 %v1304_v25, %v1305_v52  ;;  %v6249_v16 = vunpack.c.l.b16 %v2196_v54  ;;  %v668_v42 = vrot.slane %v566_v0, 6 }
 0x15f   : > { %v1309_v22 = vsel %vm804_vm1, %v566_v0, -inf  ;;  %v1316_v58 = vsel %vm804_vm1, %v666_v7, -inf  ;;  %v6254_v37 = vmax.f32 %v6213_v2, %v1279_v49  ;;  %v1293_v59 = vrot.slane %v1292_v10, 1 }
 0x160   : > { %v1300_v26 = vrot.slane %v1299_v4, 1  ;;  %v1307_v43 = vrot.slane %v1306_v36, 1  ;;  %v6258_v33 = vpack.c.b16 %v6249_v16, %v6247_v46  ;;  %v1310_v15 = vrot.slane %v1309_v22, 4 }
 0x161   : > { %v1317_v34 = vrot.slane %v1316_v58, 4  ;;  %v1323_v8 = vsel %vm804_vm1, %v667_v47, -inf  ;;  %v6261_v18 = vmax.f32 %v1285_v35, %v1286_v51  ;;  %v6263_v55 = vmax.f32 %v1292_v10, %v1293_v59 }
 0x162   : > { %7377 = vst [vmem:[#allocation5_spill] sm:$0xff] %v6258_v33  ;;  %v6265_v62 = vmax.f32 %v1299_v4, %v1300_v26  ;;  %v1324_v2 = vrot.slane %v1323_v8, 4  ;;  %3050 = vmatmul.bf16.gmra.mxu2 %v6258_v33  ;;  %v1311_v49 = vmax.f32 %v1309_v22, %v1310_v15  ;;  %v1330_v11 = vsel %vm804_vm1, %v668_v42, -inf }
 0x163   : > { %v1318_v9 = vmax.f32 %v1316_v58, %v1317_v34  ;;  %v567_v57 = vmax.f32 %v516_v6, 0.0  ;;  %v6269_v12 = vmax.f32 %v1306_v36, %v1307_v43  ;;  %v1331_v25 = vrot.slane %v1330_v11, 4 }
 0x164   : > { %v1325_v13 = vmax.f32 %v1323_v8, %v1324_v2  ;;  %v519_v14 = vadd.f32 %v6046_v56, %v518_v32  ;;  %v1312_v28 = vrot.slane %v1311_v49, 2 }
 0x165   : > { %v1319_v0 = vrot.slane %v1318_v9, 2  ;;  %v669_v35 = vrot.slane %v567_v57, 2  ;;  %v670_v40 = vrot.slane %v567_v57, 4  ;;  %v1332_v52 = vmax.f32 %v1330_v11, %v1331_v25 }
 0x166   : > { %v1326_v39 = vrot.slane %v1325_v13, 2  ;;  %v671_v54 = vrot.slane %v567_v57, 6  ;;  %v1337_v7 = vsel %vm804_vm1, %v567_v57, -inf  ;;  %v1313_v47 = vmax.f32 %v1311_v49, %v1312_v28 }
 0x167   : > { %v1320_v51 = vmax.f32 %v1318_v9, %v1319_v0  ;;  %v1338_v10 = vrot.slane %v1337_v7, 4  ;;  %v1344_v6 = vsel %vm804_vm1, %v669_v35, -inf  ;;  %v1333_v36 = vrot.slane %v1332_v52, 2 }
 0x168   : > { %v1327_v4 = vmax.f32 %v1325_v13, %v1326_v39  ;;  %v1345_v42 = vrot.slane %v1344_v6, 4  ;;  %v1351_v22 = vsel %vm804_vm1, %v670_v40, -inf  ;;  %v1314_v56 = vrot.slane %v1313_v47, 1  ;;  %v520_v39 = vpop.f32.mrf.mxu0 }
 0x169   : > { %v1321_v58 = vrot.slane %v1320_v51, 1  ;;  %v1339_v59 = vmax.f32 %v1337_v7, %v1338_v10  ;;  %v1352_v26 = vrot.slane %v1351_v22, 4  ;;  %v1334_v15 = vmax.f32 %v1332_v52, %v1333_v36 }
 0x16a   : > { %v1328_v43 = vrot.slane %v1327_v4, 1  ;;  %v1346_v34 = vmax.f32 %v1344_v6, %v1345_v42  ;;  %v1358_v8 = vsel %vm804_vm1, %v671_v54, -inf  ;;  %v1315_v32 = vmax.f32 %v1313_v47, %v1314_v56 }
 0x16b   : > { %v1322_v2 = vmax.f32 %v1320_v51, %v1321_v58  ;;  %v1340_v49 = vrot.slane %v1339_v59, 2  ;;  %v1353_v9 = vmax.f32 %v1351_v22, %v1352_v26  ;;  %v1335_v57 = vrot.slane %v1334_v15, 1 }
 0x16c   : > { %v1329_v11 = vmax.f32 %v1327_v4, %v1328_v43  ;;  %v1347_v13 = vrot.slane %v1346_v34, 2  ;;  %v1359_v25 = vrot.slane %v1358_v8, 4  ;;  %v1733_v28 = vmax.f32 %v6209_v48, %v1315_v32 }
 0x16d   : > { %v1734_v0 = vmax.f32 %v6211_v3, %v1322_v2  ;;  %v1341_v35 = vmax.f32 %v1339_v59, %v1340_v49  ;;  %v1354_v40 = vrot.slane %v1353_v9, 2  ;;  %v1336_v7 = vmax.f32 %v1334_v15, %v1335_v57 }
 0x16e   : > { %v1735_v52 = vmax.f32 %v6222_v30, %v1329_v11  ;;  %v1348_v10 = vmax.f32 %v1346_v34, %v1347_v13  ;;  %v1360_v54 = vmax.f32 %v1358_v8, %v1359_v25  ;;  %v1817_v47 = vpack.c.bf16 %v1733_v28, %v1733_v28 }
 0x16f   : > { %v1818_v51 = vpack.c.bf16 %v1734_v0, %v1734_v0  ;;  %v1342_v6 = vrot.slane %v1341_v35, 1  ;;  %v1355_v36 = vmax.f32 %v1353_v9, %v1354_v40  ;;  %v1736_v4 = vmax.f32 %v6254_v37, %v1336_v7 }
 0x170   : > { %v1819_v42 = vpack.c.bf16 %v1735_v52, %v1735_v52  ;;  %v1349_v22 = vrot.slane %v1348_v10, 1  ;;  %v1361_v56 = vrot.slane %v1360_v54, 2  ;;  %v1945_v48 = vunpack.c.l.b16 %v1817_v47 }
 0x171   : > { %v1946_v58 = vunpack.c.l.b16 %v1818_v51  ;;  %v1343_v3 = vmax.f32 %v1341_v35, %v1342_v6  ;;  %v1356_v59 = vrot.slane %v1355_v36, 1  ;;  %v1820_v26 = vpack.c.bf16 %v1736_v4, %v1736_v4 }
 0x172   : > { %v1947_v43 = vunpack.c.l.b16 %v1819_v42  ;;  %v1350_v15 = vmax.f32 %v1348_v10, %v1349_v22  ;;  %v1362_v32 = vmax.f32 %v1360_v54, %v1361_v56  ;;  %v568_v2 = vmax.f32 %v519_v14, 0.0  ;;  %v523_v54 = vpop.f32.mrf.mxu0 }
 0x173   : > { %v2007_v30 = vsel %vm1977_vm2, %v1946_v58, %v1945_v48  ;;  %v1357_v34 = vmax.f32 %v1355_v36, %v1356_v59  ;;  %v1737_v8 = vmax.f32 %v6261_v18, %v1343_v3  ;;  %v1948_v49 = vunpack.c.l.b16 %v1820_v26  ;;  %v2094_v59 = vld [vmem:[#allocation2 + $0x28] sm:$0xf] }
 0x174   : > { %v2008_v37 = vsel %vm1979_vm3, %v1947_v43, %v2007_v30  ;;  %v1363_v9 = vrot.slane %v1362_v32, 1  ;;  %v1738_v11 = vmax.f32 %v6263_v55, %v1350_v15  ;;  %v672_v25 = vrot.slane %v568_v2, 2  ;;  %v6297_v43 = vld [vmem:[%s7346_s2] ss:$0 sm:$0xff] }
 0x175   : > { %v1739_v57 = vmax.f32 %v6265_v62, %v1357_v34  ;;  %v1821_v13 = vpack.c.bf16 %v1737_v8, %v1737_v8  ;;  %v673_v28 = vrot.slane %v568_v2, 4  ;;  %v2009_v0 = vsel %vm1981_vm4, %v1948_v49, %v2008_v37 }
 0x176   : > { %v1364_v35 = vmax.f32 %v1362_v32, %v1363_v9  ;;  %v1822_v40 = vpack.c.bf16 %v1738_v11, %v1738_v11  ;;  %v674_v7 = vrot.slane %v568_v2, 6  ;;  %v1365_v18 = vsel %vm804_vm1, %v568_v2, -inf  ;;  %v2097_v2 = vld [vmem:[#allocation2 + $0x2c] sm:$0x1] }
 0x177   : > { %v1823_v52 = vpack.c.bf16 %v1739_v57, %v1739_v57  ;;  %v1949_v10 = vunpack.c.l.b16 %v1821_v13  ;;  %v1372_v14 = vsel %vm804_vm1, %v672_v25, -inf  ;;  %v1366_v51 = vrot.slane %v1365_v18, 4 }
 0x178   : > { %v1740_v47 = vmax.f32 %v6269_v12, %v1364_v35  ;;  %v1950_v55 = vunpack.c.l.b16 %v1822_v40  ;;  %v1373_v62 = vrot.slane %v1372_v14, 4  ;;  %v1379_v4 = vsel %vm804_vm1, %v673_v28, -inf }
 0x179   : > { %v1951_v6 = vunpack.c.l.b16 %v1823_v52  ;;  %v2010_v36 = vsel %vm1983_vm5, %v1949_v10, %v2009_v0  ;;  %v1386_v42 = vsel %vm804_vm1, %v674_v7, -inf  ;;  %v1367_v48 = vmax.f32 %v1365_v18, %v1366_v51 }
 0x17a   : > { %v1824_v22 = vpack.c.bf16 %v1740_v47, %v1740_v47  ;;  %v2011_v56 = vsel %vm1985_vm6, %v1950_v55, %v2010_v36  ;;  %v1374_v58 = vmax.f32 %v1372_v14, %v1373_v62  ;;  %v1380_v26 = vrot.slane %v1379_v4, 4  ;;  %v525_v51 = vpop.f32.mrf.mxu0 }
 0x17b   : > { %v2012_v3 = vsel %vm1987_vm9, %v1951_v6, %v2011_v56  ;;  %v1387_v12 = vrot.slane %v1386_v42, 4  ;;  %v521_v15 = vadd.f32 %v6297_v43, %v520_v39  ;;  %v1368_v34 = vrot.slane %v1367_v48, 2 }
 0x17c   : > { %v1952_v32 = vunpack.c.l.b16 %v1824_v22  ;;  %v2039_v30 = vpack.c.b16 %v2012_v3, %v2012_v3  ;;  %v1375_v8 = vrot.slane %v1374_v58, 2  ;;  %v1381_v49 = vmax.f32 %v1379_v4, %v1380_v26 }
 0x17d   : > { %v1388_v37 = vmax.f32 %v1386_v42, %v1387_v12  ;;  %v569_v9 = vmax.f32 %v521_v15, 0.0  ;;  %v524_v11 = vadd.f32 %v6297_v43, %v523_v54  ;;  %v1369_v25 = vmax.f32 %v1367_v48, %v1368_v34 }
 0x17e   : > { %v2040_v57 = vpack.c.b16 %v1952_v32, %v1952_v32  ;;  %v2095_v13 = vsel %vm5900_vm13, %v2039_v30, %v2094_v59  ;;  %v1376_v28 = vmax.f32 %v1374_v58, %v1375_v8  ;;  %v1382_v0 = vrot.slane %v1381_v49, 2 }
 0x17f   : > { %2096 = vst [vmem:[#allocation2 + $0x28] sm:$0xf] %v2095_v13  ;;  %v1389_v35 = vrot.slane %v1388_v37, 2  ;;  %v675_v39 = vrot.slane %v569_v9, 2  ;;  %v676_v40 = vrot.slane %v569_v9, 4  ;;  %v1370_v52 = vrot.slane %v1369_v25, 1 }
 0x180   : > { %v2098_v7 = vsel %vm5888_vm12, %v2040_v57, %v2097_v2  ;;  %v1377_v10 = vrot.slane %v1376_v28, 1  ;;  %v677_v18 = vrot.slane %v569_v9, 6  ;;  %v1383_v14 = vmax.f32 %v1381_v49, %v1382_v0 }
 0x181   : > { %2099 = vst [vmem:[#allocation2 + $0x2c] sm:$0x1] %v2098_v7  ;;  %v1390_v54 = vmax.f32 %v1388_v37, %v1389_v35  ;;  %v1393_v47 = vsel %vm804_vm1, %v569_v9, -inf  ;;  %v1400_v55 = vsel %vm804_vm1, %v675_v39, -inf  ;;  %v6307_v62 = vmax.f32 %v1369_v25, %v1370_v52 }
 0x182   : > { %v6309_v6 = vmax.f32 %v1376_v28, %v1377_v10  ;;  %v1394_v36 = vrot.slane %v1393_v47, 4  ;;  %v1401_v4 = vrot.slane %v1400_v55, 4  ;;  %v1384_v42 = vrot.slane %v1383_v14, 1 }
 0x183   : > { %v1391_v22 = vrot.slane %v1390_v54, 1  ;;  %v1407_v56 = vsel %vm804_vm1, %v676_v40, -inf  ;;  %v1414_v48 = vsel %vm804_vm1, %v677_v18, -inf  ;;  %v570_v32 = vmax.f32 %v524_v11, 0.0 }
 0x184   : > { %v1395_v58 = vmax.f32 %v1393_v47, %v1394_v36  ;;  %v1402_v3 = vmax.f32 %v1400_v55, %v1401_v4  ;;  %v1408_v59 = vrot.slane %v1407_v56, 4  ;;  %v1415_v26 = vrot.slane %v1414_v48, 4  ;;  %v528_v36 = vpop.f32.mrf.mxu0 }
 0x185   : > { %v6313_v12 = vmax.f32 %v1383_v14, %v1384_v42  ;;  %v6315_v15 = vmax.f32 %v1390_v54, %v1391_v22  ;;  %v526_v30 = vadd.f32 %v6297_v43, %v525_v51  ;;  %v678_v37 = vrot.slane %v570_v32, 2 }
 0x186   : > { %v1396_v34 = vrot.slane %v1395_v58, 2  ;;  %v1403_v8 = vrot.slane %v1402_v3, 2  ;;  %v1409_v2 = vmax.f32 %v1407_v56, %v1408_v59  ;;  %v1416_v49 = vmax.f32 %v1414_v48, %v1415_v26 }
 0x187   : > { %v679_v9 = vrot.slane %v570_v32, 4  ;;  %v680_v57 = vrot.slane %v570_v32, 6  ;;  %v1421_v13 = vsel %vm804_vm1, %v570_v32, -inf  ;;  %v1428_v40 = vsel %vm804_vm1, %v678_v37, -inf }
 0x188   : > { %v1397_v25 = vmax.f32 %v1395_v58, %v1396_v34  ;;  %v1404_v28 = vmax.f32 %v1402_v3, %v1403_v8  ;;  %v1410_v0 = vrot.slane %v1409_v2, 2  ;;  %v1417_v35 = vrot.slane %v1416_v49, 2 }
 0x189   : > { %v1422_v39 = vrot.slane %v1421_v13, 4  ;;  %v1435_v11 = vsel %vm804_vm1, %v679_v9, -inf  ;;  %v1442_v7 = vsel %vm804_vm1, %v680_v57, -inf  ;;  %v1429_v47 = vrot.slane %v1428_v40, 4 }
 0x18a   : > { %v1398_v52 = vrot.slane %v1397_v25, 1  ;;  %v1405_v10 = vrot.slane %v1404_v28, 1  ;;  %v1411_v18 = vmax.f32 %v1409_v2, %v1410_v0  ;;  %v1418_v14 = vmax.f32 %v1416_v49, %v1417_v35 }
 0x18b   : > { %v1423_v54 = vmax.f32 %v1421_v13, %v1422_v39  ;;  %v1436_v55 = vrot.slane %v1435_v11, 4  ;;  %v1443_v51 = vrot.slane %v1442_v7, 4  ;;  %v1430_v58 = vmax.f32 %v1428_v40, %v1429_v47 }
 0x18c   : > { %v6322_v4 = vmax.f32 %v1397_v25, %v1398_v52  ;;  %v6324_v42 = vmax.f32 %v1404_v28, %v1405_v10  ;;  %v1412_v22 = vrot.slane %v1411_v18, 1  ;;  %v1419_v56 = vrot.slane %v1418_v14, 1 }
 0x18d   : > { %v1424_v48 = vrot.slane %v1423_v54, 2  ;;  %v1437_v3 = vmax.f32 %v1435_v11, %v1436_v55  ;;  %v1444_v59 = vmax.f32 %v1442_v7, %v1443_v51  ;;  %v571_v34 = vmax.f32 %v526_v30, 0.0 }
 0x18e   : > { %v6326_v26 = vmax.f32 %v1411_v18, %v1412_v22  ;;  %v6328_v32 = vmax.f32 %v1418_v14, %v1419_v56  ;;  %v529_v8 = vadd.f32 %v6297_v43, %v528_v36  ;;  %v1431_v49 = vrot.slane %v1430_v58, 2 }
 0x18f   : > { %v1425_v2 = vmax.f32 %v1423_v54, %v1424_v48  ;;  %v1438_v37 = vrot.slane %v1437_v3, 2  ;;  %v1445_v9 = vrot.slane %v1444_v59, 2  ;;  %v681_v57 = vrot.slane %v571_v34, 2 }
 0x190   : > { %v682_v13 = vrot.slane %v571_v34, 4  ;;  %v683_v25 = vrot.slane %v571_v34, 6  ;;  %v1449_v28 = vsel %vm804_vm1, %v571_v34, -inf  ;;  %v1432_v35 = vmax.f32 %v1430_v58, %v1431_v49 }
 0x191   : > { %v1426_v0 = vrot.slane %v1425_v2, 1  ;;  %v1439_v39 = vmax.f32 %v1437_v3, %v1438_v37  ;;  %v1446_v40 = vmax.f32 %v1444_v59, %v1445_v9  ;;  %v1450_v11 = vrot.slane %v1449_v28, 4 }
 0x192   : > { %v1456_v7 = vsel %vm804_vm1, %v681_v57, -inf  ;;  %v1463_v30 = vsel %vm804_vm1, %v682_v13, -inf  ;;  %v1470_v52 = vsel %vm804_vm1, %v683_v25, -inf  ;;  %v1433_v18 = vrot.slane %v1432_v35, 1 }
 0x193   : > { %v1427_v10 = vmax.f32 %v1425_v2, %v1426_v0  ;;  %v1440_v14 = vrot.slane %v1439_v39, 1  ;;  %v1447_v54 = vrot.slane %v1446_v40, 1  ;;  %v1451_v47 = vmax.f32 %v1449_v28, %v1450_v11 }
 0x194   : > { %v1457_v55 = vrot.slane %v1456_v7, 4  ;;  %v1464_v51 = vrot.slane %v1463_v30, 4  ;;  %v1471_v36 = vrot.slane %v1470_v52, 4  ;;  %v1434_v22 = vmax.f32 %v1432_v35, %v1433_v18 }
 0x195   : > { %v1441_v56 = vmax.f32 %v1439_v39, %v1440_v14  ;;  %v1448_v48 = vmax.f32 %v1446_v40, %v1447_v54  ;;  %v1741_v58 = vmax.f32 %v6307_v62, %v1427_v10  ;;  %v1452_v3 = vrot.slane %v1451_v47, 2 }
 0x196   : > { %v1458_v59 = vmax.f32 %v1456_v7, %v1457_v55  ;;  %v1465_v34 = vmax.f32 %v1463_v30, %v1464_v51  ;;  %v1472_v49 = vmax.f32 %v1470_v52, %v1471_v36  ;;  %v1742_v37 = vmax.f32 %v6309_v6, %v1434_v22 }
 0x197   : > { %v1743_v2 = vmax.f32 %v6313_v12, %v1441_v56  ;;  %v1744_v9 = vmax.f32 %v6315_v15, %v1448_v48  ;;  %v1825_v57 = vpack.c.bf16 %v1741_v58, %v1741_v58  ;;  %v1453_v13 = vmax.f32 %v1451_v47, %v1452_v3 }
 0x198   : > { %v1459_v25 = vrot.slane %v1458_v59, 2  ;;  %v1466_v28 = vrot.slane %v1465_v34, 2  ;;  %v1473_v0 = vrot.slane %v1472_v49, 2  ;;  %v1826_v35 = vpack.c.bf16 %v1742_v37, %v1742_v37 }
 0x199   : > { %v1827_v39 = vpack.c.bf16 %v1743_v2, %v1743_v2  ;;  %v1828_v40 = vpack.c.bf16 %v1744_v9, %v1744_v9  ;;  %v1953_v11 = vunpack.c.l.b16 %v1825_v57  ;;  %v1454_v62 = vrot.slane %v1453_v13, 1 }
 0x19a   : > { %v1460_v10 = vmax.f32 %v1458_v59, %v1459_v25  ;;  %v1467_v7 = vmax.f32 %v1465_v34, %v1466_v28  ;;  %v1474_v30 = vmax.f32 %v1472_v49, %v1473_v0  ;;  %v1954_v52 = vunpack.c.l.b16 %v1826_v35  ;;  %v530_v35 = vpop.f32.mrf.mxu0 }
 0x19b   : > { %v1955_v18 = vunpack.c.l.b16 %v1827_v39  ;;  %v1956_v6 = vunpack.c.l.b16 %v1828_v40  ;;  %v572_v14 = vmax.f32 %v529_v8, 0.0  ;;  %v1455_v12 = vmax.f32 %v1453_v13, %v1454_v62 }
 0x19c   : > { %v1461_v54 = vrot.slane %v1460_v10, 1  ;;  %v1468_v15 = vrot.slane %v1467_v7, 1  ;;  %v1475_v55 = vrot.slane %v1474_v30, 1  ;;  %v2013_v47 = vsel %vm1977_vm2, %v1954_v52, %v1953_v11 }
 0x19d   : > { %v684_v51 = vrot.slane %v572_v14, 2  ;;  %v685_v36 = vrot.slane %v572_v14, 4  ;;  %v686_v22 = vrot.slane %v572_v14, 6  ;;  %v2014_v56 = vsel %vm1979_vm3, %v1955_v18, %v2013_v47 }
 0x19e   : > { %v1462_v48 = vmax.f32 %v1460_v10, %v1461_v54  ;;  %v1469_v58 = vmax.f32 %v1467_v7, %v1468_v15  ;;  %v1476_v3 = vmax.f32 %v1474_v30, %v1475_v55  ;;  %v2015_v59 = vsel %vm1981_vm4, %v1956_v6, %v2014_v56  ;;  %v2103_v6 = vld [vmem:[#allocation2 + $0x34] sm:$0x1]  ;;  %v6351_v15 = vld [vmem:[#allocation2 + $0x20] sm:$0xf] }
 0x19f   : > { %v1745_v34 = vmax.f32 %v6322_v4, %v1455_v12  ;;  %v1477_v8 = vsel %vm804_vm1, %v572_v14, -inf  ;;  %v1484_v49 = vsel %vm804_vm1, %v684_v51, -inf  ;;  %v1491_v28 = vsel %vm804_vm1, %v685_v36, -inf  ;;  %v6354_v36 = vld [vmem:[#allocation2 + $0x28] sm:$0xf] }
 0x1a0   : > { %v1746_v37 = vmax.f32 %v6324_v42, %v1462_v48  ;;  %v1747_v2 = vmax.f32 %v6326_v26, %v1469_v58  ;;  %v1748_v9 = vmax.f32 %v6328_v32, %v1476_v3  ;;  %v1478_v57 = vrot.slane %v1477_v8, 4  ;;  %v2100_v48 = vld [vmem:[#allocation2 + $0x30] sm:$0xf] }
 0x1a1   : > { %v1829_v13 = vpack.c.bf16 %v1745_v34, %v1745_v34  ;;  %v1485_v25 = vrot.slane %v1484_v49, 4  ;;  %v1498_v0 = vsel %vm804_vm1, %v686_v22, -inf  ;;  %v1492_v7 = vrot.slane %v1491_v28, 4  ;;  %v6356_v22 = vld [vmem:[#allocation2 + $0x24] sm:$0x1] }
 0x1a2   : > { %v1830_v39 = vpack.c.bf16 %v1746_v37, %v1746_v37  ;;  %v1831_v4 = vpack.c.bf16 %v1747_v2, %v1747_v2  ;;  %v1832_v40 = vpack.c.bf16 %v1748_v9, %v1748_v9  ;;  %v1479_v11 = vmax.f32 %v1477_v8, %v1478_v57  ;;  %v6362_v34 = vld [vmem:[%s7348_s4] ss:$0 sm:$0xff]  ;;  %v3017_v2 = vpop.f32.mrf.mxu1 }
 0x1a3   : > { %v1957_v62 = vunpack.c.l.b16 %v1829_v13  ;;  %v1486_v10 = vmax.f32 %v1484_v49, %v1485_v25  ;;  %v1499_v42 = vrot.slane %v1498_v0, 4  ;;  %v1493_v12 = vmax.f32 %v1491_v28, %v1492_v7  ;;  %v533_v7 = vpop.f32.mrf.mxu0 }
 0x1a4   : > { %v1958_v30 = vunpack.c.l.b16 %v1830_v39  ;;  %v1959_v26 = vunpack.c.l.b16 %v1831_v4  ;;  %v1960_v52 = vunpack.c.l.b16 %v1832_v40  ;;  %v1480_v32 = vrot.slane %v1479_v11, 2 }
 0x1a5   : > { %v2016_v18 = vsel %vm1983_vm5, %v1957_v62, %v2015_v59  ;;  %v1487_v14 = vrot.slane %v1486_v10, 2  ;;  %v1500_v54 = vmax.f32 %v1498_v0, %v1499_v42  ;;  %v1494_v3 = vrot.slane %v1493_v12, 2  ;;  %v6370_v0 = vld [vmem:[#allocation2 + $0x2c] sm:$0x1] }
 0x1a6   : > { %v2017_v55 = vsel %vm1985_vm6, %v1958_v30, %v2016_v18  ;;  %v2042_v47 = vpack.c.b16 %v1960_v52, %v1960_v52  ;;  %v1481_v51 = vmax.f32 %v1479_v11, %v1480_v32  ;;  %v7356_v9 = vunpack.c.l.b16 %v6351_v15 }
 0x1a7   : > { %v2018_v56 = vsel %vm1987_vm9, %v1959_v26, %v2017_v55  ;;  %v1488_v58 = vmax.f32 %v1486_v10, %v1487_v14  ;;  %v1501_v59 = vrot.slane %v1500_v54, 2  ;;  %v1495_v13 = vmax.f32 %v1493_v12, %v1494_v3 }
 0x1a8   : > { %v2041_v8 = vpack.c.b16 %v2018_v56, %v2018_v56  ;;  %v2104_v49 = vsel %vm5888_vm12, %v2042_v47, %v2103_v6  ;;  %v1482_v37 = vrot.slane %v1481_v51, 1  ;;  %v7353_v28 = vunpack.c.l.b16 %v6354_v36 }
 0x1a9   : > { %2105 = vst [vmem:[#allocation2 + $0x34] sm:$0x1] %v2104_v49  ;;  %v1489_v57 = vrot.slane %v1488_v58, 1  ;;  %v6367_v25 = vmax.f32 %v1500_v54, %v1501_v59  ;;  %v4876_v4 = vrot.slane %v6351_v15, 9  ;;  %v2290_v40 = vrot.slane %v6356_v22, 5 }
 0x1aa   : > { %v2101_v39 = vsel %vm5900_vm13, %v2041_v8, %v2100_v48  ;;  %v1496_v11 = vrot.slane %v1495_v13, 1  ;;  %v3018_v62 = vadd.f32 %v6362_v34, %v3017_v2  ;;  %v6381_v10 = vpack.c.b16 %v7353_v28, %v7356_v9 }
 0x1ab   : > { %2102 = vst [vmem:[#allocation2 + $0x30] sm:$0xf] %v2101_v39  ;;  %v6385_v42 = vsel %vm6004_vm8, %v4876_v4, %v2290_v40  ;;  %v4877_v30 = vrot.slane %v6354_v36, 9  ;;  %v2294_v26 = vrot.slane %v6370_v0, 5  ;;  %v531_v52 = vadd.f32 %v6297_v43, %v530_v35  ;;  %v535_v9 = vpop.f32.mrf.mxu0 }
 0x1ac   : > { %7378 = vst [vmem:[#allocation6_spill] sm:$0xff] %v6381_v10  ;;  %v6390_v32 = vmax.f32 %v1481_v51, %v1482_v37  ;;  %v6392_v18 = vmax.f32 %v1488_v58, %v1489_v57  ;;  %v6394_v6 = vmax.f32 %v1495_v13, %v1496_v11  ;;  %v1503_v14 = vrot.slane %v6367_v25, 1  ;;  %3026 = vmatmul.bf16.gmra.mxu1 %v6381_v10 }
 0x1ad   : > { %v6400_v12 = vsel %vm6004_vm8, %v4877_v30, %v2294_v26  ;;  %v573_v54 = vmax.f32 %v531_v52, 0.0  ;;  %v2198_v55 = vshrl.u32 %v6351_v15, 16  ;;  %v2201_v47 = vshll.u32 %v6351_v15, 16 }
 0x1ae   : > { %v7354_v35 = vunpack.c.l.b16 %v6385_v42  ;;  %v7352_v51 = vunpack.c.l.b16 %v6400_v12  ;;  %v2212_v56 = vshrl.u32 %v6354_v36, 16  ;;  %v2215_v48 = vshll.u32 %v6354_v36, 16 }
 0x1af   : > { %v687_v58 = vrot.slane %v573_v54, 2  ;;  %v688_v3 = vrot.slane %v573_v54, 4  ;;  %v689_v59 = vrot.slane %v573_v54, 6  ;;  %v1505_v8 = vsel %vm804_vm1, %v573_v54, -inf  ;;  %v3046_v54 = vpop.f32.mrf.mxu2 }
 0x1b0   : > { %v6413_v49 = vpack.c.b16 %v7352_v51, %v7354_v35  ;;  %v1506_v37 = vrot.slane %v1505_v8, 4  ;;  %v2200_v2 = vrot.slane %v2198_v55, 4  ;;  %v2203_v57 = vrot.slane %v2201_v47, 5 }
 0x1b1   : > { %v1512_v13 = vsel %vm804_vm1, %v687_v58, -inf  ;;  %v1519_v39 = vsel %vm804_vm1, %v688_v3, -inf  ;;  %v1526_v4 = vsel %vm804_vm1, %v689_v59, -inf  ;;  %v2207_v40 = vshll.u32 %v6356_v22, 16 }
 0x1b2   : > { %7379 = vst [vmem:[#allocation7_spill] sm:$0xff] %v6413_v49  ;;  %3084 = vmatmul.bf16.gmra.mxu3 %v6413_v49  ;;  %v1507_v11 = vmax.f32 %v1505_v8, %v1506_v37  ;;  %v1513_v30 = vrot.slane %v1512_v13, 4  ;;  %v1520_v26 = vrot.slane %v1519_v39, 4  ;;  %v1527_v52 = vrot.slane %v1526_v4, 4 }
 0x1b3   : > { %v2204_v51 = vor.u32 %v2203_v57, %v2200_v2  ;;  %v2214_v28 = vrot.slane %v2212_v56, 4  ;;  %v2217_v35 = vrot.slane %v2215_v48, 5  ;;  %v2221_v55 = vshll.u32 %v6370_v0, 16 }
 0x1b4   : > { %v1508_v47 = vrot.slane %v1507_v11, 2  ;;  %v1514_v58 = vmax.f32 %v1512_v13, %v1513_v30  ;;  %v1521_v31 = vmax.f32 %v1519_v39, %v1520_v26  ;;  %v1528_v3 = vmax.f32 %v1526_v4, %v1527_v52 }
 0x1b5   : > { %v2205_v59 = vrot.slane %v2204_v51, 4  ;;  %v2209_v21 = vrot.slane %v2207_v40, 5  ;;  %v2218_v22 = vor.u32 %v2217_v35, %v2214_v28  ;;  %v6421_v23 = vadd.f32 %v3046_v54, %v3018_v62  ;;  %v5524_v54 = vld [vmem:[%s7347_s3 + $0x138] sm:$0xff] }
 0x1b6   : > { %v1509_v8 = vmax.f32 %v1507_v11, %v1508_v47  ;;  %v1515_v37 = vrot.slane %v1514_v58, 2  ;;  %v1522_v20 = vrot.slane %v1521_v31, 2  ;;  %v1529_v60 = vrot.slane %v1528_v3, 2  ;;  %3124 = vmatpush.bf16.msrb.mxu2 %v5524_v54 }
 0x1b7   : > { %7380 = vst [vmem:[#allocation8_spill] sm:$0xff] %v6421_v23  ;;  %v2210_v56 = vsel %vm6052_vm15, %v2205_v59, %v2209_v21  ;;  %v2219_v48 = vrot.slane %v2218_v22, 4  ;;  %v2223_v2 = vrot.slane %v2221_v55, 5  ;;  %v534_v0 = vadd.f32 %v6297_v43, %v533_v7 }
 0x1b8   : > { %v1510_v57 = vrot.slane %v1509_v8, 1  ;;  %v1516_v13 = vmax.f32 %v1514_v58, %v1515_v37  ;;  %v1523_v39 = vmax.f32 %v1521_v31, %v1522_v20  ;;  %v1530_v4 = vmax.f32 %v1528_v3, %v1529_v60 }
 0x1b9   : > { %v6427_v51 = vmax.f32 %v6367_v25, %v1503_v14  ;;  %v2224_v28 = vsel %vm6052_vm15, %v2219_v48, %v2223_v2  ;;  %v6431_v62 = vunpack.c.l.b16 %v2210_v56  ;;  %v574_v35 = vmax.f32 %v534_v0, 0.0  ;;  %v538_v56 = vpop.f32.mrf.mxu0 }
 0x1ba   : > { %v1517_v40 = vrot.slane %v1516_v13, 1  ;;  %v1524_v11 = vrot.slane %v1523_v39, 1  ;;  %v1531_v21 = vrot.slane %v1530_v4, 1  ;;  %v536_v30 = vadd.f32 %v6297_v43, %v535_v9  ;;  %v5532_v9 = vld [vmem:[%s7347_s3 + $0x178] sm:$0xff] }
 0x1bb   : > { %v6434_v26 = vunpack.c.l.b16 %v2224_v28  ;;  %v690_v7 = vrot.slane %v574_v35, 2  ;;  %v691_v52 = vrot.slane %v574_v35, 4  ;;  %v692_v20 = vrot.slane %v574_v35, 6  ;;  %3153 = vmatpush.bf16.msrb.mxu3 %v5532_v9 }
 0x1bc   : > { %v6436_v60 = vmax.f32 %v1509_v8, %v1510_v57  ;;  %v6438_v31 = vmax.f32 %v1516_v13, %v1517_v40  ;;  %v6440_v25 = vmax.f32 %v1523_v39, %v1524_v11  ;;  %v1533_v14 = vsel %vm804_vm1, %v574_v35, -inf }
 0x1bd   : > { %v6451_v55 = vpack.c.b16 %v6434_v26, %v6431_v62  ;;  %v1534_v47 = vrot.slane %v1533_v14, 4  ;;  %v1540_v58 = vsel %vm804_vm1, %v690_v7, -inf  ;;  %v1547_v3 = vsel %vm804_vm1, %v691_v52, -inf  ;;  %v5531_v52 = vld [vmem:[%s7347_s3 + $0x170] sm:$0xff] }
 0x1be   : > { %v1541_v59 = vrot.slane %v1540_v58, 4  ;;  %v1548_v22 = vrot.slane %v1547_v3, 4  ;;  %v1554_v8 = vsel %vm804_vm1, %v692_v20, -inf  ;;  %v575_v37 = vmax.f32 %v536_v30, 0.0 }
 0x1bf   : > { %7381 = vst [vmem:[#allocation9_spill] sm:$0xff] %v6451_v55  ;;  %v6456_v48 = vmax.f32 %v1530_v4, %v1531_v21  ;;  %3055 = vmatmul.bf16.gmra.mxu2 %v6451_v55  ;;  %v1535_v2 = vmax.f32 %v1533_v14, %v1534_v47  ;;  %v1555_v0 = vrot.slane %v1554_v8, 4  ;;  %v6460_v57 = vadd.f32 %v6297_v43, %v538_v56  ;;  %v5516_v4 = vld [vmem:[%s7347_s3 + $0xf8] sm:$0xff]  ;;  %v5523_v21 = vld [vmem:[%s7347_s3 + $0x130] sm:$0xff] }
 0x1c0   : > { %v1542_v13 = vmax.f32 %v1540_v58, %v1541_v59  ;;  %v1549_v39 = vmax.f32 %v1547_v3, %v1548_v22  ;;  %v693_v28 = vrot.slane %v575_v37, 2  ;;  %v694_v35 = vrot.slane %v575_v37, 4  ;;  %3095 = vmatpush.bf16.msrb.mxu1 %v5516_v4  ;;  %3125 = vmatpush.bf16.msrb.mxu2 %v5523_v21 }
 0x1c1   : > { %v1536_v40 = vrot.slane %v1535_v2, 2  ;;  %v1556_v11 = vmax.f32 %v1554_v8, %v1555_v0  ;;  %v695_v7 = vrot.slane %v575_v37, 6  ;;  %v1561_v30 = vsel %vm804_vm1, %v575_v37, -inf  ;;  %3154 = vmatpush.bf16.msrb.mxu3 %v5531_v52 }
 0x1c2   : > { %v1543_v20 = vrot.slane %v1542_v13, 2  ;;  %v1550_v14 = vrot.slane %v1549_v39, 2  ;;  %v1562_v54 = vrot.slane %v1561_v30, 4  ;;  %v1568_v9 = vsel %vm804_vm1, %v693_v28, -inf }
 0x1c3   : > { %v1537_v47 = vmax.f32 %v1535_v2, %v1536_v40  ;;  %v1557_v58 = vrot.slane %v1556_v11, 2  ;;  %v1569_v3 = vrot.slane %v1568_v9, 4  ;;  %v1575_v59 = vsel %vm804_vm1, %v694_v35, -inf }
 0x1c4   : > { %v1544_v22 = vmax.f32 %v1542_v13, %v1543_v20  ;;  %v1551_v8 = vmax.f32 %v1549_v39, %v1550_v14  ;;  %v1563_v37 = vmax.f32 %v1561_v30, %v1562_v54  ;;  %v1576_v56 = vrot.slane %v1575_v59, 4 }
 0x1c5   : > { %v1538_v0 = vrot.slane %v1537_v47, 1  ;;  %v1558_v45 = vmax.f32 %v1556_v11, %v1557_v58  ;;  %v1570_v41 = vmax.f32 %v1568_v9, %v1569_v3  ;;  %v1582_v23 = vsel %vm804_vm1, %v695_v7, -inf  ;;  %v540_v58 = vpop.f32.mrf.mxu0 }
 0x1c6   : > { %v1545_v55 = vrot.slane %v1544_v22, 1  ;;  %v1552_v49 = vrot.slane %v1551_v8, 1  ;;  %v1564_v28 = vrot.slane %v1563_v37, 2  ;;  %v1577_v2 = vmax.f32 %v1575_v59, %v1576_v56 }
 0x1c7   : > { %v1539_v40 = vmax.f32 %v1537_v47, %v1538_v0  ;;  %v1559_v33 = vrot.slane %v1558_v45, 1  ;;  %v1571_v10 = vrot.slane %v1570_v41, 2  ;;  %v1583_v35 = vrot.slane %v1582_v23, 4  ;;  %v5515_v47 = vld [vmem:[%s7347_s3 + $0xf0] sm:$0xff] }
 0x1c8   : > { %v1546_v4 = vmax.f32 %v1544_v22, %v1545_v55  ;;  %v1553_v21 = vmax.f32 %v1551_v8, %v1552_v49  ;;  %v1565_v13 = vmax.f32 %v1563_v37, %v1564_v28  ;;  %v1578_v39 = vrot.slane %v1577_v2, 2  ;;  %v5522_v49 = vld [vmem:[%s7347_s3 + $0x128] sm:$0xff]  ;;  %3096 = vmatpush.bf16.msrb.mxu1 %v5515_v47 }
 0x1c9   : > { %v1560_v30 = vmax.f32 %v1558_v45, %v1559_v33  ;;  %v1749_v52 = vmax.f32 %v6390_v32, %v1539_v40  ;;  %v1572_v20 = vmax.f32 %v1570_v41, %v1571_v10  ;;  %v1584_v11 = vmax.f32 %v1582_v23, %v1583_v35  ;;  %v5530_v41 = vld [vmem:[%s7347_s3 + $0x168] sm:$0xff]  ;;  %3126 = vmatpush.bf16.msrb.mxu2 %v5522_v49 }
 0x1ca   : > { %v1750_v14 = vmax.f32 %v6392_v18, %v1546_v4  ;;  %v1751_v7 = vmax.f32 %v6394_v6, %v1553_v21  ;;  %v1566_v54 = vrot.slane %v1565_v13, 1  ;;  %v1579_v9 = vmax.f32 %v1577_v2, %v1578_v39  ;;  %3155 = vmatpush.bf16.msrb.mxu3 %v5530_v41 }
 0x1cb   : > { %v1752_v45 = vmax.f32 %v6427_v51, %v1560_v30  ;;  %v1833_v23 = vpack.c.bf16 %v1749_v52, %v1749_v52  ;;  %v1573_v33 = vrot.slane %v1572_v20, 1  ;;  %v1585_v10 = vrot.slane %v1584_v11, 2 }
 0x1cc   : > { %v1834_v32 = vpack.c.bf16 %v1750_v14, %v1750_v14  ;;  %v1835_v18 = vpack.c.bf16 %v1751_v7, %v1751_v7  ;;  %v1567_v6 = vmax.f32 %v1565_v13, %v1566_v54  ;;  %v1580_v55 = vrot.slane %v1579_v9, 1 }
 0x1cd   : > { %v1836_v3 = vpack.c.bf16 %v1752_v45, %v1752_v45  ;;  %v1961_v59 = vunpack.c.l.b16 %v1833_v23  ;;  %v1574_v22 = vmax.f32 %v1572_v20, %v1573_v33  ;;  %v1586_v8 = vmax.f32 %v1584_v11, %v1585_v10  ;;  %v543_v45 = vpop.f32.mrf.mxu0 }
 0x1ce   : > { %v1962_v37 = vunpack.c.l.b16 %v1834_v32  ;;  %v1963_v56 = vunpack.c.l.b16 %v1835_v18  ;;  %v1581_v0 = vmax.f32 %v1579_v9, %v1580_v55  ;;  %v1753_v28 = vmax.f32 %v6436_v60, %v1567_v6 }
 0x1cf   : > { %v1964_v51 = vunpack.c.l.b16 %v1836_v3  ;;  %v1587_v2 = vrot.slane %v1586_v8, 1  ;;  %v1754_v40 = vmax.f32 %v6438_v31, %v1574_v22  ;;  %v576_v35 = vmax.f32 %v6460_v57, 0.0 }
 0x1d0   : > { %v2019_v4 = vsel %vm1977_vm2, %v1962_v37, %v1961_v59  ;;  %v1755_v21 = vmax.f32 %v6440_v25, %v1581_v0  ;;  %v1837_v13 = vpack.c.bf16 %v1753_v28, %v1753_v28  ;;  %v541_v39 = vadd.f32 %v6297_v43, %v540_v58 }
 0x1d1   : > { %v2020_v30 = vsel %vm1979_vm3, %v1963_v56, %v2019_v4  ;;  %v1588_v52 = vmax.f32 %v1586_v8, %v1587_v2  ;;  %v1838_v20 = vpack.c.bf16 %v1754_v40, %v1754_v40  ;;  %v696_v11 = vrot.slane %v576_v35, 2  ;;  %v2109_v56 = vld [vmem:[#allocation2 + $0x3c] sm:$0x1] }
 0x1d2   : > { %v2021_v60 = vsel %vm1981_vm4, %v1964_v51, %v2020_v30  ;;  %v1839_v14 = vpack.c.bf16 %v1755_v21, %v1755_v21  ;;  %v1965_v7 = vunpack.c.l.b16 %v1837_v13  ;;  %v697_v54 = vrot.slane %v576_v35, 4 }
 0x1d3   : > { %v1756_v31 = vmax.f32 %v6456_v48, %v1588_v52  ;;  %v1966_v57 = vunpack.c.l.b16 %v1838_v20  ;;  %v698_v9 = vrot.slane %v576_v35, 6  ;;  %v1589_v47 = vsel %vm804_vm1, %v576_v35, -inf  ;;  %v2106_v48 = vld [vmem:[#allocation2 + $0x38] sm:$0xf] }
 0x1d4   : > { %v1967_v25 = vunpack.c.l.b16 %v1839_v14  ;;  %v2022_v49 = vsel %vm1983_vm5, %v1965_v7, %v2021_v60  ;;  %v1590_v58 = vrot.slane %v1589_v47, 4  ;;  %v1596_v41 = vsel %vm804_vm1, %v696_v11, -inf }
 0x1d5   : > { %v1840_v23 = vpack.c.bf16 %v1756_v31, %v1756_v31  ;;  %v2023_v33 = vsel %vm1985_vm6, %v1966_v57, %v2022_v49  ;;  %v1597_v10 = vrot.slane %v1596_v41, 4  ;;  %v1603_v32 = vsel %vm804_vm1, %v697_v54, -inf  ;;  %v5521_v54 = vld [vmem:[%s7347_s3 + $0x120] sm:$0xff] }
 0x1d6   : > { %v2024_v18 = vsel %vm1987_vm9, %v1967_v25, %v2023_v33  ;;  %v1591_v6 = vmax.f32 %v1589_v47, %v1590_v58  ;;  %v1604_v55 = vrot.slane %v1603_v32, 4  ;;  %v1610_v3 = vsel %vm804_vm1, %v698_v9, -inf  ;;  %v5529_v31 = vld [vmem:[%s7347_s3 + $0x160] sm:$0xff]  ;;  %3127 = vmatpush.bf16.msrb.mxu2 %v5521_v54 }
 0x1d7   : > { %v1968_v59 = vunpack.c.l.b16 %v1840_v23  ;;  %v2043_v22 = vpack.c.b16 %v2024_v18, %v2024_v18  ;;  %v1598_v8 = vmax.f32 %v1596_v41, %v1597_v10  ;;  %v1611_v37 = vrot.slane %v1610_v3, 4  ;;  %3156 = vmatpush.bf16.msrb.mxu3 %v5529_v31 }
 0x1d8   : > { %v1592_v0 = vrot.slane %v1591_v6, 2  ;;  %v1605_v28 = vmax.f32 %v1603_v32, %v1604_v55  ;;  %v577_v51 = vmax.f32 %v541_v39, 0.0  ;;  %v544_v2 = vadd.f32 %v6297_v43, %v543_v45  ;;  %v5514_v39 = vld [vmem:[%s7347_s3 + $0xe8] sm:$0xff]  ;;  %v545_v32 = vpop.f32.mrf.mxu0 }
 0x1d9   : > { %v2044_v40 = vpack.c.b16 %v1968_v59, %v1968_v59  ;;  %v2107_v35 = vsel %vm5900_vm13, %v2043_v22, %v2106_v48  ;;  %v1599_v4 = vrot.slane %v1598_v8, 2  ;;  %v1612_v21 = vmax.f32 %v1610_v3, %v1611_v37  ;;  %3097 = vmatpush.bf16.msrb.mxu1 %v5514_v39 }
 0x1da   : > { %2108 = vst [vmem:[#allocation2 + $0x38] sm:$0xf] %v2107_v35  ;;  %v1593_v13 = vmax.f32 %v1591_v6, %v1592_v0  ;;  %v1606_v30 = vrot.slane %v1605_v28, 2  ;;  %v699_v52 = vrot.slane %v577_v51, 2  ;;  %v700_v20 = vrot.slane %v577_v51, 4 }
 0x1db   : > { %v2110_v11 = vsel %vm5888_vm12, %v2044_v40, %v2109_v56  ;;  %v1600_v60 = vmax.f32 %v1598_v8, %v1599_v4  ;;  %v1613_v14 = vrot.slane %v1612_v21, 2  ;;  %v701_v7 = vrot.slane %v577_v51, 6 }
 0x1dc   : > { %2111 = vst [vmem:[#allocation2 + $0x3c] sm:$0x1] %v2110_v11  ;;  %v1594_v57 = vrot.slane %v1593_v13, 1  ;;  %v1607_v9 = vmax.f32 %v1605_v28, %v1606_v30  ;;  %v1617_v47 = vsel %vm804_vm1, %v577_v51, -inf  ;;  %v1624_v25 = vsel %vm804_vm1, %v699_v52, -inf }
 0x1dd   : > { %v1601_v49 = vrot.slane %v1600_v60, 1  ;;  %v1614_v58 = vmax.f32 %v1612_v21, %v1613_v14  ;;  %v1618_v41 = vrot.slane %v1617_v47, 4  ;;  %v1625_v45 = vrot.slane %v1624_v25, 4 }
 0x1de   : > { %v1608_v23 = vrot.slane %v1607_v9, 1  ;;  %v1631_v33 = vsel %vm804_vm1, %v700_v20, -inf  ;;  %v1638_v10 = vsel %vm804_vm1, %v701_v7, -inf  ;;  %v6522_v18 = vmax.f32 %v1593_v13, %v1594_v57 }
 0x1df   : > { %v6524_v48 = vmax.f32 %v1600_v60, %v1601_v49  ;;  %v1619_v6 = vmax.f32 %v1617_v47, %v1618_v41  ;;  %v1626_v55 = vmax.f32 %v1624_v25, %v1625_v45  ;;  %v1615_v3 = vrot.slane %v1614_v58, 1  ;;  %v5513_v45 = vld [vmem:[%s7347_s3 + $0xe0] sm:$0xff] }
 0x1e0   : > { %v1632_v59 = vrot.slane %v1631_v33, 4  ;;  %v1639_v22 = vrot.slane %v1638_v10, 4  ;;  %v578_v8 = vmax.f32 %v544_v2, 0.0  ;;  %v6526_v37 = vmax.f32 %v1607_v9, %v1608_v23  ;;  %v5520_v23 = vld [vmem:[%s7347_s3 + $0x118] sm:$0xff]  ;;  %3098 = vmatpush.bf16.msrb.mxu1 %v5513_v45 }
 0x1e1   : > { %v1620_v56 = vrot.slane %v1619_v6, 2  ;;  %v1627_v0 = vrot.slane %v1626_v55, 2  ;;  %v546_v28 = vadd.f32 %v6297_v43, %v545_v32  ;;  %v6532_v47 = vmax.f32 %v1614_v58, %v1615_v3  ;;  %3128 = vmatpush.bf16.msrb.mxu2 %v5520_v23 }
 0x1e2   : > { %v1633_v51 = vmax.f32 %v1631_v33, %v1632_v59  ;;  %v1640_v40 = vmax.f32 %v1638_v10, %v1639_v22  ;;  %v702_v35 = vrot.slane %v578_v8, 2  ;;  %v703_v4 = vrot.slane %v578_v8, 4  ;;  %v5528_v33 = vld [vmem:[%s7347_s3 + $0x158] sm:$0xff] }
 0x1e3   : > { %v1621_v21 = vmax.f32 %v1619_v6, %v1620_v56  ;;  %v1628_v13 = vmax.f32 %v1626_v55, %v1627_v0  ;;  %v704_v30 = vrot.slane %v578_v8, 6  ;;  %v1645_v52 = vsel %vm804_vm1, %v578_v8, -inf  ;;  %v5512_v8 = vld [vmem:[%s7347_s3 + $0xd8] sm:$0xff]  ;;  %v5519_v56 = vld [vmem:[%s7347_s3 + $0x110] sm:$0xff]  ;;  %3157 = vmatpush.bf16.msrb.mxu3 %v5528_v33  ;;  %v5518_v33 = vld [vmem:[%s7347_s3 + $0x108] sm:$0xff] }
 0x1e4   : > { %v1634_v20 = vrot.slane %v1633_v51, 2  ;;  %v1641_v11 = vrot.slane %v1640_v40, 2  ;;  %v1646_v60 = vrot.slane %v1645_v52, 4  ;;  %v1652_v2 = vsel %vm804_vm1, %v702_v35, -inf  ;;  %3099 = vmatpush.bf16.msrb.mxu1 %v5512_v8 }
 0x1e5   : > { %v1622_v14 = vrot.slane %v1621_v21, 1  ;;  %v1629_v7 = vrot.slane %v1628_v13, 1  ;;  %v1653_v39 = vrot.slane %v1652_v2, 4  ;;  %v1659_v54 = vsel %vm804_vm1, %v703_v4, -inf  ;;  %3129 = vmatpush.bf16.msrb.mxu2 %v5519_v56 }
 0x1e6   : > { %v1635_v43 = vmax.f32 %v1633_v51, %v1634_v20  ;;  %v1642_v31 = vmax.f32 %v1640_v40, %v1641_v11  ;;  %v1647_v57 = vmax.f32 %v1645_v52, %v1646_v60  ;;  %v1660_v9 = vrot.slane %v1659_v54, 4 }
 0x1e7   : > { %v6534_v25 = vmax.f32 %v1621_v21, %v1622_v14  ;;  %v1654_v49 = vmax.f32 %v1652_v2, %v1653_v39  ;;  %v1666_v41 = vsel %vm804_vm1, %v704_v30, -inf  ;;  %v6546_v55 = vmax.f32 %v1628_v13, %v1629_v7 }
 0x1e8   : > { %v1636_v10 = vrot.slane %v1635_v43, 1  ;;  %v1643_v58 = vrot.slane %v1642_v31, 1  ;;  %v1648_v32 = vrot.slane %v1647_v57, 2  ;;  %v1661_v6 = vmax.f32 %v1659_v54, %v1660_v9  ;;  %v5511_v54 = vld [vmem:[%s7347_s3 + $0xd0] sm:$0xff] }
 0x1e9   : > { %v1655_v3 = vrot.slane %v1654_v49, 2  ;;  %v1667_v59 = vrot.slane %v1666_v41, 4  ;;  %v579_v22 = vmax.f32 %v546_v28, 0.0  ;;  %v5527_v28 = vld [vmem:[%s7347_s3 + $0x150] sm:$0xff]  ;;  %3100 = vmatpush.bf16.msrb.mxu1 %v5511_v54  ;;  %3130 = vmatpush.bf16.msrb.mxu2 %v5518_v33 }
 0x1ea   : > { %v6554_v0 = vmax.f32 %v1635_v43, %v1636_v10  ;;  %v6556_v51 = vmax.f32 %v1642_v31, %v1643_v58  ;;  %v1649_v40 = vmax.f32 %v1647_v57, %v1648_v32  ;;  %v1662_v35 = vrot.slane %v1661_v6, 2  ;;  %3158 = vmatpush.bf16.msrb.mxu3 %v5527_v28  ;;  %v5526_v10 = vld [vmem:[%s7347_s3 + $0x148] sm:$0xff] }
 0x1eb   : > { %v1656_v4 = vmax.f32 %v1654_v49, %v1655_v3  ;;  %v1668_v21 = vmax.f32 %v1666_v41, %v1667_v59  ;;  %v705_v13 = vrot.slane %v579_v22, 2  ;;  %v706_v30 = vrot.slane %v579_v22, 4 }
 0x1ec   : > { %v1650_v52 = vrot.slane %v1649_v40, 1  ;;  %v1663_v20 = vmax.f32 %v1661_v6, %v1662_v35  ;;  %v707_v11 = vrot.slane %v579_v22, 6  ;;  %v1673_v60 = vsel %vm804_vm1, %v579_v22, -inf  ;;  %v5517_v35 = vld [vmem:[%s7347_s3 + $0x100] sm:$0xff] }
 0x1ed   : > { %v1657_v2 = vrot.slane %v1656_v4, 1  ;;  %v1669_v14 = vrot.slane %v1668_v21, 2  ;;  %v1674_v7 = vrot.slane %v1673_v60, 4  ;;  %v1680_v39 = vsel %vm804_vm1, %v705_v13, -inf  ;;  %3131 = vmatpush.bf16.msrb.mxu2 %v5517_v35 }
 0x1ee   : > { %v1651_v43 = vmax.f32 %v1649_v40, %v1650_v52  ;;  %v1664_v31 = vrot.slane %v1663_v20, 1  ;;  %v1681_v57 = vrot.slane %v1680_v39, 4  ;;  %v1687_v9 = vsel %vm804_vm1, %v706_v30, -inf  ;;  %v5510_v40 = vld [vmem:[%s7347_s3 + $0xc8] sm:$0xff]  ;;  %3159 = vmatpush.bf16.msrb.mxu3 %v5526_v10 }
 0x1ef   : > { %v1658_v49 = vmax.f32 %v1656_v4, %v1657_v2  ;;  %v1670_v41 = vmax.f32 %v1668_v21, %v1669_v14  ;;  %v1675_v45 = vmax.f32 %v1673_v60, %v1674_v7  ;;  %v1688_v23 = vrot.slane %v1687_v9, 4  ;;  %3101 = vmatpush.bf16.msrb.mxu1 %v5510_v40 }
 0x1f0   : > { %v1665_v58 = vmax.f32 %v1663_v20, %v1664_v31  ;;  %v1757_v32 = vmax.f32 %v6522_v18, %v1651_v43  ;;  %v1682_v6 = vmax.f32 %v1680_v39, %v1681_v57  ;;  %v1694_v3 = vsel %vm804_vm1, %v707_v11, -inf  ;;  %v6586_v11 = vld [vmem:[#allocation2 + $0x30] sm:$0xf]  ;;  %v6588_v39 = vpop.f32.mrf.mxu1  ;;  %v6591_v57 = vld [vmem:[#allocation2 + $0x38] sm:$0xf] }
 0x1f1   : > { %v1671_v59 = vrot.slane %v1670_v41, 1  ;;  %v1758_v22 = vmax.f32 %v6524_v48, %v1658_v49  ;;  %v1676_v8 = vrot.slane %v1675_v45, 2  ;;  %v1689_v56 = vmax.f32 %v1687_v9, %v1688_v23  ;;  %v5525_v48 = vld [vmem:[%s7347_s3 + $0x140] sm:$0xff] }
 0x1f2   : > { %v1759_v18 = vmax.f32 %v6526_v37, %v1665_v58  ;;  %v1841_v28 = vpack.c.bf16 %v1757_v32, %v1757_v32  ;;  %v1683_v4 = vrot.slane %v1682_v6, 2  ;;  %v1695_v21 = vrot.slane %v1694_v3, 4  ;;  %v5509_v9 = vld [vmem:[%s7347_s3 + $0xc0] sm:$0xff]  ;;  %3160 = vmatpush.bf16.msrb.mxu3 %v5525_v48  ;;  %v6598_v32 = vld [vmem:[#allocation2 + $0x34] sm:$0x1] }
 0x1f3   : > { %v1672_v13 = vmax.f32 %v1670_v41, %v1671_v59  ;;  %v1842_v30 = vpack.c.bf16 %v1758_v22, %v1758_v22  ;;  %v1677_v52 = vmax.f32 %v1675_v45, %v1676_v8  ;;  %v1690_v20 = vrot.slane %v1689_v56, 2  ;;  %3102 = vmatpush.bf16.msrb.mxu1 %v5509_v9 }
 0x1f4   : > { %v1843_v60 = vpack.c.bf16 %v1759_v18, %v1759_v18  ;;  %v1969_v2 = vunpack.c.l.b16 %v1841_v28  ;;  %v1684_v14 = vmax.f32 %v1682_v6, %v1683_v4  ;;  %v1696_v7 = vmax.f32 %v1694_v3, %v1695_v21  ;;  %v6600_v6 = vpop.f32.mrf.mxu2  ;;  %v6605_v18 = vld [vmem:[#allocation2 + $0x3c] sm:$0x1] }
 0x1f5   : > { %v1760_v37 = vmax.f32 %v6532_v47, %v1672_v13  ;;  %v1970_v54 = vunpack.c.l.b16 %v1842_v30  ;;  %v1678_v43 = vrot.slane %v1677_v52, 1  ;;  %v1691_v31 = vmax.f32 %v1689_v56, %v1690_v20 }
 0x1f6   : > { %v1971_v49 = vunpack.c.l.b16 %v1843_v60  ;;  %v1685_v41 = vrot.slane %v1684_v14, 1  ;;  %v1697_v45 = vrot.slane %v1696_v7, 2  ;;  %v2350_v23 = vunpack.c.l.b16 %v6586_v11 }
 0x1f7   : > { %v1844_v33 = vpack.c.bf16 %v1760_v37, %v1760_v37  ;;  %v2025_v47 = vsel %vm1977_vm2, %v1970_v54, %v1969_v2  ;;  %v1679_v10 = vmax.f32 %v1677_v52, %v1678_v43  ;;  %v1692_v58 = vrot.slane %v1691_v31, 1 }
 0x1f8   : > { %v2026_v3 = vsel %vm1979_vm3, %v1971_v49, %v2025_v47  ;;  %v1686_v59 = vmax.f32 %v1684_v14, %v1685_v41  ;;  %v1698_v22 = vmax.f32 %v1696_v7, %v1697_v45  ;;  %v2351_v8 = vunpack.c.l.b16 %v6591_v57  ;;  %v3022_v54 = vpop.f32.mrf.mxu1 }
 0x1f9   : > { %v1972_v56 = vunpack.c.l.b16 %v1844_v33  ;;  %v1693_v40 = vmax.f32 %v1691_v31, %v1692_v58  ;;  %v1761_v35 = vmax.f32 %v6534_v25, %v1679_v10  ;;  %v4878_v28 = vrot.slane %v6586_v11, 9  ;;  %v5548_v10 = vld [vmem:[%s7347_s3 + $0x1f8] sm:$0xff] }
 0x1fa   : > { %v1699_v4 = vrot.slane %v1698_v22, 1  ;;  %v1762_v21 = vmax.f32 %v6546_v55, %v1686_v59  ;;  %v6613_v48 = vpack.c.b16 %v2351_v8, %v2350_v23  ;;  %v2298_v13 = vrot.slane %v6598_v32, 5  ;;  %v5540_v58 = vld [vmem:[%s7347_s3 + $0x1b8] sm:$0xff]  ;;  %3211 = vmatpush.bf16.msra.mxu2 %v5548_v10 }
 0x1fb   : > { %v2027_v30 = vsel %vm1981_vm4, %v1972_v56, %v2026_v3  ;;  %v1763_v25 = vmax.f32 %v6554_v0, %v1693_v40  ;;  %v1845_v52 = vpack.c.bf16 %v1761_v35, %v1761_v35  ;;  %v4879_v20 = vrot.slane %v6591_v57, 9  ;;  %3182 = vmatpush.bf16.msra.mxu1 %v5540_v58 }
 0x1fc   : > { %v1700_v60 = vmax.f32 %v1698_v22, %v1699_v4  ;;  %v1846_v2 = vpack.c.bf16 %v1762_v21, %v1762_v21  ;;  %3031 = vmatmul.bf16.gmra.mxu1 %v6613_v48  ;;  %v6622_v55 = vsel %vm6004_vm8, %v4878_v28, %v2298_v13  ;;  %v2302_v14 = vrot.slane %v6605_v18, 5  ;;  %v3051_v40 = vpop.f32.mrf.mxu2  ;;  %v2112_v28 = vld [vmem:[#allocation2 + $0x40] sm:$0xf] }
 0x1fd   : > { %v1847_v7 = vpack.c.bf16 %v1763_v25, %v1763_v25  ;;  %v1973_v37 = vunpack.c.l.b16 %v1845_v52  ;;  %v2382_v43 = vunpack.c.l.b16 %v6622_v55  ;;  %v2226_v49 = vshrl.u32 %v6586_v11, 16 }
 0x1fe   : > { %v1764_v0 = vmax.f32 %v6556_v51, %v1700_v60  ;;  %v1974_v31 = vunpack.c.l.b16 %v1846_v2  ;;  %v6629_v9 = vsel %vm6004_vm8, %v4879_v20, %v2302_v14  ;;  %v2229_v47 = vshll.u32 %v6586_v11, 16  ;;  %v5556_v51 = vld [vmem:[%s7347_s3 + $0x238] sm:$0xff]  ;;  %v2115_v60 = vld [vmem:[#allocation2 + $0x44] sm:$0x1] }
 0x1ff   : > { %v1975_v41 = vunpack.c.l.b16 %v1847_v7  ;;  %v2028_v45 = vsel %vm1983_vm5, %v1973_v37, %v2027_v30  ;;  %v2383_v33 = vunpack.c.l.b16 %v6629_v9  ;;  %v3023_v22 = vadd.f32 %v6362_v34, %v3022_v54  ;;  %3240 = vmatpush.bf16.msra.mxu3 %v5556_v51  ;;  %v5547_v34 = vld [vmem:[%s7347_s3 + $0x1f0] sm:$0xff]  ;;  %vm6876_vm5 = vmand %vm2269_vm14, %vm3648_vm0 }
 0x200   : > { %v1848_v3 = vpack.c.bf16 %v1764_v0, %v1764_v0  ;;  %v2029_v59 = vsel %vm1985_vm6, %v1974_v31, %v2028_v45  ;;  %v2228_v56 = vrot.slane %v2226_v49, 4  ;;  %v2231_v21 = vrot.slane %v2229_v47, 5  ;;  %v5555_v37 = vld [vmem:[%s7347_s3 + $0x230] sm:$0xff]  ;;  %3212 = vmatpush.bf16.msra.mxu2 %v5547_v34  ;;  %v5545_v34 = vld [vmem:[%s7347_s3 + $0x1e0] sm:$0xff]  ;;  %vm6998_vm0 = vmor %vm2070_vm7, %vm1977_vm2 }
 0x201   : > { %v2030_v35 = vsel %vm1987_vm9, %v1975_v41, %v2029_v59  ;;  %v6651_v4 = vpack.c.b16 %v2383_v33, %v2382_v43  ;;  %v2240_v13 = vshrl.u32 %v6591_v57, 16  ;;  %v2235_v52 = vshll.u32 %v6598_v32, 16  ;;  %v5539_v54 = vld [vmem:[%s7347_s3 + $0x1b0] sm:$0xff]  ;;  %vm3767_vm7 = vmor %vm6998_vm0, %vm1981_vm4 }
 0x202   : > { %v1976_v30 = vunpack.c.l.b16 %v1848_v3  ;;  %v2045_v25 = vpack.c.b16 %v2030_v35, %v2030_v35  ;;  %v2243_v20 = vshll.u32 %v6591_v57, 16  ;;  %v2232_v2 = vor.u32 %v2231_v21, %v2228_v56  ;;  %3183 = vmatpush.bf16.msra.mxu1 %v5539_v54  ;;  %v5546_v35 = vld [vmem:[%s7347_s3 + $0x1e8] sm:$0xff]  ;;  %v5535_v54 = vld [vmem:[%s7347_s3 + $0x190] sm:$0xff] }
 0x203   : > { %3089 = vmatmul.bf16.gmra.mxu3 %v6651_v4  ;;  %v2242_v14 = vrot.slane %v2240_v13, 4  ;;  %v6660_v7 = vadd.f32 %v3051_v40, %v3023_v22  ;;  %v2249_v49 = vshll.u32 %v6605_v18, 16  ;;  %v2237_v47 = vrot.slane %v2235_v52, 5 }
 0x204   : > { %v2046_v0 = vpack.c.b16 %v1976_v30, %v1976_v30  ;;  %v2113_v32 = vsel %vm5900_vm13, %v2045_v25, %v2112_v28  ;;  %v2245_v31 = vrot.slane %v2243_v20, 5  ;;  %v2233_v41 = vrot.slane %v2232_v2, 4  ;;  %3241 = vmatpush.bf16.msra.mxu3 %v5555_v37  ;;  %3213 = vmatpush.bf16.msra.mxu2 %v5546_v35  ;;  %v5553_v30 = vld [vmem:[%s7347_s3 + $0x220] sm:$0xff]  ;;  %v5552_v2 = vld [vmem:[%s7347_s3 + $0x218] sm:$0xff] }
 0x205   : > { %2114 = vst [vmem:[#allocation2 + $0x40] sm:$0xf] %v2113_v32  ;;  %v2251_v29 = vrot.slane %v2249_v49, 5  ;;  %v7382_v18 = vunpack.c.l.b16 %v5983_v24  ;;  %v7383_v59 = vunpack.c.l.b16 %v6075_v63  ;;  %v5554_v24 = vld [vmem:[%s7347_s3 + $0x228] sm:$0xff]  ;;  %v7384_v28 = vunpack.c.l.b16 %v6017_v17  ;;  %v5537_v25 = vld [vmem:[%s7347_s3 + $0x1a0] sm:$0xff] }
 0x206   : > { %v2116_v45 = vsel %vm5888_vm12, %v2046_v0, %v2115_v60  ;;  %v2246_v10 = vor.u32 %v2245_v31, %v2242_v14  ;;  %v2238_v51 = vsel %vm6052_vm15, %v2233_v41, %v2237_v47  ;;  %v5538_v63 = vld [vmem:[%s7347_s3 + $0x1a8] sm:$0xff]  ;;  %v7385_v21 = vunpack.c.l.b16 %v6201_v53  ;;  %v5544_v60 = vld [vmem:[%s7347_s3 + $0x1d8] sm:$0xff]  ;;  %v6771_v41 = vpop.f32.mrf.mxu1 }
 0x207   : > { %2117 = vst [vmem:[#allocation2 + $0x44] sm:$0x1] %v2116_v45  ;;  %v2393_v22 = vpack.c.b16 %v7383_v59, %v7382_v18  ;;  %v6681_v56 = vunpack.c.l.b16 %v2238_v51  ;;  %3184 = vmatpush.bf16.msra.mxu1 %v5538_v63  ;;  %v7386_v17 = vunpack.c.l.b16 %v6183_v50  ;;  %v7387_v53 = vunpack.c.l.b16 %v6351_v15  ;;  %v5536_v50 = vld [vmem:[%s7347_s3 + $0x198] sm:$0xff]  ;;  %v5534_v32 = vld [vmem:[%s7347_s3 + $0x188] sm:$0xff] }
 0x208   : > { %v2247_v58 = vrot.slane %v2246_v10, 4  ;;  %v2411_v13 = vpack.c.b16 %v7385_v21, %v7384_v28  ;;  %3242 = vmatpush.bf16.msra.mxu3 %v5554_v24  ;;  %3214 = vmatpush.bf16.msra.mxu2 %v5545_v34  ;;  %v2402_v20 = vpack.c.b16 %v6247_v46, %v6065_v38  ;;  %v7388_v15 = vunpack.c.l.b16 %v6217_v19  ;;  %v5543_v38 = vld [vmem:[%s7347_s3 + $0x1d0] sm:$0xff]  ;;  %v5542_v31 = vld [vmem:[%s7347_s3 + $0x1c8] sm:$0xff]  ;;  %v6787_v21 = vld [vmem:[%s7348_s4] ss:$0 sm:$0xff] }
 0x209   : > { %v2394_v52 = vpack.c.b16 %v7387_v53, %v7386_v17  ;;  %v7389_v14 = vunpack.c.l.b16 %v6385_v42  ;;  %v5551_v46 = vld [vmem:[%s7347_s3 + $0x210] sm:$0xff]  ;;  %v7390_v19 = vunpack.c.l.b16 %v6354_v36  ;;  %v2403_v0 = vpack.c.b16 %v6431_v62, %v6249_v16  ;;  %v5550_v36 = vld [vmem:[%s7347_s3 + $0x208] sm:$0xff]  ;;  %v5533_v16 = vld [vmem:[%s7347_s3 + $0x180] sm:$0xff]  ;;  %v3075_v53 = vpop.f32.mrf.mxu3 }
 0x20a   : > { %v2252_v3 = vsel %vm6052_vm15, %v2247_v58, %v2251_v29  ;;  %v7391_v11 = vunpack.c.l.b16 %v6400_v12  ;;  %v5541_v62 = vld [vmem:[%s7347_s3 + $0x1c0] sm:$0xff]  ;;  %v6776_v58 = vpop.f32.mrf.mxu2  ;;  %vm3679_vm9 = vcmask 1043458   ;;  %vm3701_vm12 = vsmask.f32 1280 }
 0x20b   : > { %v6683_v5 = vunpack.c.l.b16 %v2252_v3  ;;  %3185 = vmatpush.bf16.msra.mxu1 %v5537_v25  ;;  %v2412_v37 = vpack.c.b16 %v7389_v14, %v7388_v15  ;;  %v2395_v42 = vpack.c.b16 %v2350_v23, %v7390_v19  ;;  %v5549_v12 = vld [vmem:[%s7347_s3 + $0x200] sm:$0xff]  ;;  %v2137_v15 = vld [vmem:[#allocation2 + $0x4c] sm:$0x1]  ;;  %vm3702_vm13 = vsmask.f32 3336 }
 0x20c   : > { %3103 = vmatmul.bf16.vlgmr.msrb.gmra.mxu1 %v2393_v22  ;;  %3243 = vmatpush.bf16.msra.mxu3 %v5553_v30  ;;  %v2413_v23 = vpack.c.b16 %v2382_v43, %v7391_v11  ;;  %v6765_v49 = vld [vmem:[#allocation2 + $0x40] sm:$0xf]  ;;  %v2404_v22 = vpack.c.b16 %v6681_v56, %v6434_v26  ;;  %vm3703_vm14 = vmor %vm3701_vm12, %vm3702_vm13 }
 0x20d   : > { %v6687_v40 = vpack.c.b16 %v6683_v5, %v6681_v56  ;;  %3215 = vmatpush.bf16.msra.mxu2 %v5544_v60  ;;  %v2392_v43 = vunpack.c.l.b16 %v6765_v49  ;;  %v4880_v45 = vrot.slane %v6765_v49, 9  ;;  %v2305_v10 = vshrl.u32 %v6765_v49, 16  ;;  %vm7024_vm12 = vmor %vm3767_vm7, %vm1985_vm6 }
 0x20e   : > { %v2135_v55 = vld [vmem:[#allocation2 + $0x44] sm:$0x1]  ;;  %v2308_v51 = vshll.u32 %v6765_v49, 16 }
 0x20f   : > { %3060 = vmatmul.bf16.gmra.mxu2 %v6687_v40  ;;  %3186 = vmatpush.bf16.msra.mxu1 %v5536_v50  ;;  %v2322_v47 = vrot.slane %v2135_v55, 5  ;;  %v2396_v29 = vpack.c.b16 %v2392_v43, %v2351_v8  ;;  %v2307_v18 = vrot.slane %v2305_v10, 4  ;;  %v2314_v28 = vshll.u32 %v2135_v55, 16  ;;  %v2136_v50 = vld [vmem:[#allocation2 + $0x48] sm:$0xf] }
 0x210   : > { %3244 = vmatpush.bf16.msra.mxu3 %v5552_v2  ;;  %v2310_v59 = vrot.slane %v2308_v51, 5  ;;  %v7394_v2 = vld [vmem:[#allocation7_spill] sm:$0xff]  ;;  %v2328_v19 = vshll.u32 %v2136_v50, 16  ;;  %v5611_v55 = vld [vmem:[%s7349_s5 + $0x1b0] sm:$0xff] }
 0x211   : > { %3216 = vmatpush.bf16.msra.mxu2 %v5543_v38  ;;  %v2323_v3 = vsel %vm6004_vm8, %v4880_v45, %v2322_v47  ;;  %v2316_v26 = vrot.slane %v2314_v28, 5  ;;  %v6799_v9 = vpop.f32.mrf.mxu3  ;;  %v4881_v38 = vrot.slane %v2136_v50, 9  ;;  %v7396_v45 = vld [vmem:[#allocation8_spill] sm:$0xff] }
 0x212   : > { %v2410_v35 = vunpack.c.l.b16 %v2323_v3  ;;  %v2311_v63 = vor.u32 %v2310_v59, %v2307_v18  ;;  %v3076_v47 = vadd.f32 %v3075_v53, %v7396_v45  ;;  %v5610_v53 = vld [vmem:[%s7349_s5 + $0x1a8] sm:$0xff] }
 0x213   : > { %3161 = vmatmul.bf16.vlgmr.msrb.gmra.mxu3 %v2411_v13  ;;  %3187 = vmatpush.bf16.msra.mxu1 %v5535_v54  ;;  %v2325_v54 = vshrl.u32 %v2136_v50, 16 }
 0x214   : > { %3245 = vmatpush.bf16.msra.mxu3 %v5551_v46  ;;  %v2414_v8 = vpack.c.b16 %v2410_v35, %v2383_v33  ;;  %v2312_v13 = vrot.slane %v2311_v63, 4  ;;  %v7392_v33 = vld [vmem:[#allocation6_spill] sm:$0xff]  ;;  %v2342_v46 = vrot.slane %v2137_v15, 5 }
 0x215   : > { %3217 = vmatpush.bf16.msra.mxu2 %v5542_v31  ;;  %v2327_v31 = vrot.slane %v2325_v54, 4 }
 0x216   : > { %v2317_v56 = vsel %vm6052_vm15, %v2312_v13, %v2316_v26 }
 0x217   : > { %3188 = vmatpush.bf16.msra.mxu1 %v5534_v32  ;;  %v2401_v25 = vunpack.c.l.b16 %v2317_v56  ;;  %v2343_v32 = vsel %vm6004_vm8, %v4881_v38, %v2342_v46  ;;  %v3025_v46 = vadd.f32 %v6787_v21, %v6771_v41  ;;  %vm3704_vm8 = vsmask.f32 5392 }
 0x218   : > { %3246 = vmatpush.bf16.msra.mxu3 %v5550_v36  ;;  %v2425_v36 = vunpack.c.l.b16 %v2343_v32  ;;  %vm3705_vm11 = vmor %vm3703_vm14, %vm3704_vm8 }
 0x219   : > { %3218 = vmatpush.bf16.msra.mxu2 %v5541_v62  ;;  %v2405_v17 = vpack.c.b16 %v2401_v25, %v6683_v5  ;;  %v3080_v60 = vpop.f32.mrf.mxu3  ;;  %v7395_v5 = vld [vmem:[#allocation9_spill] sm:$0xff] }
 0x21a   : > { %v3081_v28 = vadd.f32 %v3080_v60, %v6660_v7 }
 0x21b   : > { %3189 = vmatpush.bf16.msra.mxu1 %v5533_v16  ;;  %v2334_v16 = vshll.u32 %v2137_v15, 16 }
 0x21c   : > { %3108 = vmatmul.bf16.gmra.mxu1 %v2394_v52  ;;  %3247 = vmatpush.bf16.msra.mxu3 %v5549_v12  ;;  %v7393_v52 = vld [vmem:[#allocation5_spill] sm:$0xff] }
 0x21d   : > { %v2336_v12 = vrot.slane %v2334_v16, 5 }
 0x21f   : > { %3132 = vmatmul.bf16.vlgmr.msrb.gmra.mxu2 %v2402_v20  ;;  %v5612_v20 = vld [vmem:[%s7349_s5 + $0x1b8] sm:$0xff] }
 0x220   : > { %4595 = vmatpush.bf16.msrb.mxu0 %v5612_v20 }
 0x223   : > { %3166 = vmatmul.bf16.gmra.mxu3 %v2412_v37  ;;  %v2419_v37 = vunpack.c.l.b16 %v2136_v50 }
 0x224   : > { %4596 = vmatpush.bf16.msrb.mxu0 %v5611_v55 }
 0x228   : > { %4597 = vmatpush.bf16.msrb.mxu0 %v5610_v53 }
 0x229   : > { %v3027_v24 = vpop.f32.mrf.mxu1 }
 0x22a   : > { %v3028_v57 = vadd.f32 %v6787_v21, %v3027_v24 }
 0x22c   : > { %3113 = vmatmul.bf16.gmra.mxu1 %v2395_v42 }
 0x22f   : > { %3137 = vmatmul.bf16.gmra.mxu2 %v2403_v0  ;;  %v2420_v0 = vpack.c.b16 %v2419_v37, %v2392_v43 }
 0x233   : > { %3171 = vmatmul.bf16.gmra.mxu3 %v2413_v23 }
 0x23c   : > { %3118 = vmatmul.bf16.gmra.mxu1 %v2396_v29 }
 0x23f   : > { %3142 = vmatmul.bf16.gmra.mxu2 %v2404_v22 }
 0x242   : > { %v3056_v34 = vpop.f32.mrf.mxu2 }
 0x243   : > { %3176 = vmatmul.bf16.gmra.mxu3 %v2414_v8  ;;  %v6792_v30 = vadd.f32 %v3056_v34, %v3028_v57 }
 0x24a   : > { %v3058_v29 = vpop.f32.mrf.mxu2 }
 0x24c   : > { %3190 = vmatmul.bf16.vlgmr.msra.gmra.mxu1 %v6193_v27  ;;  %v6807_v27 = vpop.f32.mrf.mxu3 }
 0x24f   : > { %3147 = vmatmul.bf16.gmra.mxu2 %v2405_v17 }
 0x253   : > { %3248 = vmatmul.bf16.vlgmr.msra.gmra.mxu3 %v6234_v44  ;;  %v3029_v44 = vpop.f32.mrf.mxu1 }
 0x254   : > { %v3085_v14 = vpop.f32.mrf.mxu3  ;;  %v3030_v60 = vadd.f32 %v6787_v21, %v3029_v44 }
 0x255   : > { %v3086_v20 = vadd.f32 %v3085_v14, %v6792_v30 }
 0x256   : > { %v3059_v15 = vadd.f32 %v3058_v29, %v3030_v60 }
 0x25c   : > { %3195 = vmatmul.bf16.gmra.mxu1 %v7392_v33  ;;  %v3087_v11 = vpop.f32.mrf.mxu3 }
 0x25d   : > { %v3088_v38 = vadd.f32 %v3087_v11, %v3059_v15 }
 0x25f   : > { %3219 = vmatmul.bf16.vlgmr.msra.gmra.mxu2 %v7393_v52 }
 0x263   : > { %3253 = vmatmul.bf16.gmra.mxu3 %v7394_v2 }
 0x26c   : > { %3200 = vmatmul.bf16.gmra.mxu1 %v6613_v48  ;;  %v2330_v48 = vrot.slane %v2328_v19, 5 }
 0x26e   : > { %v2331_v23 = vor.u32 %v2330_v48, %v2327_v31 }
 0x26f   : > { %3224 = vmatmul.bf16.gmra.mxu2 %v7395_v5 }
 0x270   : > { %v2332_v49 = vrot.slane %v2331_v23, 4 }
 0x272   : > { %v2337_v43 = vsel %vm6052_vm15, %v2332_v49, %v2336_v12  ;;  %vm6977_vm15 = vmor %vm3705_vm11, %vm3706_vm10 }
 0x273   : > { %3258 = vmatmul.bf16.gmra.mxu3 %v6651_v4  ;;  %v2426_v4 = vpack.c.b16 %v2425_v36, %v2410_v35  ;;  %v2422_v10 = vunpack.c.l.b16 %v2337_v43  ;;  %v5609_v43 = vld [vmem:[%s7349_s5 + $0x1a0] sm:$0xff] }
 0x274   : > { %4598 = vmatpush.bf16.msrb.mxu0 %v5609_v43 }
 0x275   : > { %v2423_v3 = vpack.c.b16 %v2422_v10, %v2401_v25 }
 0x279   : > { %v3032_v42 = vpop.f32.mrf.mxu1 }
 0x27a   : > { %v3033_v59 = vadd.f32 %v6787_v21, %v3032_v42 }
 0x27c   : > { %3205 = vmatmul.bf16.gmra.mxu1 %v2420_v0  ;;  %v3054_v0 = vadd.f32 %v6776_v58, %v3025_v46 }
 0x27e   : > { %v3083_v14 = vadd.f32 %v6807_v27, %v3054_v0 }
 0x27f   : > { %3229 = vmatmul.bf16.gmra.mxu2 %v6687_v40 }
 0x281   : > { %v3034_v62 = vpop.f32.mrf.mxu1 }
 0x282   : > { %v3035_v61 = vadd.f32 %v6787_v21, %v3034_v62 }
 0x283   : > { %3263 = vmatmul.bf16.gmra.mxu3 %v2426_v4 }
 0x286   : > { %v3090_v1 = vpop.f32.mrf.mxu3 }
 0x289   : > { %v3104_v51 = vpop.f32.mrf.mxu1 }
 0x28a   : > { %v3105_v40 = vadd.f32 %v3104_v51, %v3076_v47  ;;  %v3020_v47 = vadd.f32 %v6787_v21, %v6588_v39 }
 0x28c   : > { %v3049_v51 = vadd.f32 %v6600_v6, %v3020_v47 }
 0x28e   : > { %v3092_v18 = vpop.f32.mrf.mxu3 }
 0x28f   : > { %3234 = vmatmul.bf16.gmra.mxu2 %v2423_v3 }
 0x291   : > { %v3106_v22 = vpop.f32.mrf.mxu1 }
 0x292   : > { %v3061_v35 = vpop.f32.mrf.mxu2 }
 0x293   : > { %v3062_v24 = vadd.f32 %v3061_v35, %v3033_v59 }
 0x295   : > { %v3091_v33 = vadd.f32 %v3090_v1, %v3062_v24 }
 0x296   : > { %v3162_v63 = vpop.f32.mrf.mxu3 }
 0x299   : > { %v3109_v57 = vpop.f32.mrf.mxu1 }
 0x29a   : > { %v3063_v8 = vpop.f32.mrf.mxu2  ;;  %v3110_v13 = vadd.f32 %v3109_v57, %v3081_v28 }
 0x29b   : > { %v3064_v34 = vadd.f32 %v3063_v8, %v3035_v61 }
 0x29d   : > { %v3093_v50 = vadd.f32 %v3092_v18, %v3064_v34  ;;  %v3078_v18 = vadd.f32 %v6799_v9, %v3049_v51 }
 0x29e   : > { %v3164_v26 = vpop.f32.mrf.mxu3 }
 0x29f   : > { %v3107_v59 = vadd.f32 %v3106_v22, %v3078_v18 }
 0x2a1   : > { %v3111_v56 = vpop.f32.mrf.mxu1 }
 0x2a2   : > { %v3133_v17 = vpop.f32.mrf.mxu2  ;;  %v3112_v44 = vadd.f32 %v3111_v56, %v3083_v14 }
 0x2a3   : > { %v3134_v25 = vadd.f32 %v3133_v17, %v3105_v40 }
 0x2a5   : > { %v3163_v30 = vadd.f32 %v3162_v63, %v3134_v25 }
 0x2a6   : > { %v3167_v52 = vpop.f32.mrf.mxu3 }
 0x2a9   : > { %v3114_v7 = vpop.f32.mrf.mxu1 }
 0x2aa   : > { %v3135_v2 = vpop.f32.mrf.mxu2  ;;  %v3115_v5 = vadd.f32 %v3114_v7, %v3086_v20 }
 0x2ab   : > { %v3136_v24 = vadd.f32 %v3135_v2, %v3107_v59 }
 0x2ad   : > { %v3165_v39 = vadd.f32 %v3164_v26, %v3136_v24 }
 0x2ae   : > { %v6829_v37 = vpop.f32.mrf.mxu3 }
 0x2b1   : > { %v3116_v54 = vpop.f32.mrf.mxu1 }
 0x2b2   : > { %v3138_v19 = vpop.f32.mrf.mxu2  ;;  %v3117_v42 = vadd.f32 %v3116_v54, %v3088_v38 }
 0x2b3   : > { %v3139_v32 = vadd.f32 %v3138_v19, %v3110_v13 }
 0x2b5   : > { %v6852_v45 = vadd.f32 %v3167_v52, %v3139_v32 }
 0x2b6   : > { %v6835_v36 = vpop.f32.mrf.mxu3 }
 0x2b9   : > { %v3119_v31 = vpop.f32.mrf.mxu1 }
 0x2ba   : > { %v3140_v48 = vpop.f32.mrf.mxu2  ;;  %v3120_v23 = vadd.f32 %v3119_v31, %v3091_v33 }
 0x2bb   : > { %v6837_v16 = vadd.f32 %v3140_v48, %v3112_v44 }
 0x2be   : > { %v6841_v49 = vpop.f32.mrf.mxu3 }
 0x2c1   : > { %v3121_v11 = vpop.f32.mrf.mxu1 }
 0x2c2   : > { %v3143_v4 = vpop.f32.mrf.mxu2  ;;  %v3122_v41 = vadd.f32 %v3121_v11, %v3093_v50 }
 0x2c3   : > { %v6839_v62 = vadd.f32 %v3143_v4, %v3115_v5 }
 0x2c6   : > { %v6845_v55 = vpop.f32.mrf.mxu3 }
 0x2c9   : > { %v3191_v40 = vpop.f32.mrf.mxu1 }
 0x2ca   : > { %v3145_v58 = vpop.f32.mrf.mxu2  ;;  %v3192_v35 = vadd.f32 %v3191_v40, %v3163_v30 }
 0x2cb   : > { %v6843_v12 = vadd.f32 %v3145_v58, %v3117_v42 }
 0x2ce   : > { %v6856_v10 = vpop.f32.mrf.mxu3 }
 0x2d1   : > { %v3193_v57 = vpop.f32.mrf.mxu1 }
 0x2d2   : > { %v3148_v27 = vpop.f32.mrf.mxu2  ;;  %v3194_v13 = vadd.f32 %v3193_v57, %v3165_v39 }
 0x2d3   : > { %v6847_v1 = vadd.f32 %v3148_v27, %v3120_v23 }
 0x2d6   : > { %v3249_v63 = vpop.f32.mrf.mxu3 }
 0x2da   : > { %v3150_v29 = vpop.f32.mrf.mxu2 }
 0x2db   : > { %v6859_v3 = vadd.f32 %v3150_v29, %v3122_v41 }
 0x2de   : > { %v3251_v2 = vpop.f32.mrf.mxu3 }
 0x2e2   : > { %v3220_v28 = vpop.f32.mrf.mxu2 }
 0x2e3   : > { %v3221_v61 = vadd.f32 %v3220_v28, %v3192_v35 }
 0x2e5   : > { %v3250_v8 = vadd.f32 %v3249_v63, %v3221_v61 }
 0x2e7   : > { %v3269_v21 = vmax.f32 %v3250_v8, 0.0 }
 0x2e9   : > { %v3285_v34 = vrot.slane %v3269_v21, 2  ;;  %v3286_v56 = vrot.slane %v3269_v21, 4  ;;  %v3287_v6 = vrot.slane %v3269_v21, 6  ;;  %v3333_v17 = vsel %vm804_vm1, %v3269_v21, -inf }
 0x2ea   : > { %v3334_v25 = vrot.slane %v3333_v17, 4  ;;  %v3222_v53 = vpop.f32.mrf.mxu2 }
 0x2eb   : > { %v3340_v9 = vsel %vm804_vm1, %v3285_v34, -inf  ;;  %v3347_v22 = vsel %vm804_vm1, %v3286_v56, -inf  ;;  %v3354_v33 = vsel %vm804_vm1, %v3287_v6, -inf  ;;  %v3223_v52 = vadd.f32 %v3222_v53, %v3194_v13 }
 0x2ec   : > { %v3335_v20 = vmax.f32 %v3333_v17, %v3334_v25  ;;  %v3341_v7 = vrot.slane %v3340_v9, 4  ;;  %v3348_v60 = vrot.slane %v3347_v22, 4  ;;  %v3355_v26 = vrot.slane %v3354_v33, 4  ;;  %v3196_v25 = vpop.f32.mrf.mxu1 }
 0x2ed   : > { %v3252_v5 = vadd.f32 %v3251_v2, %v3223_v52 }
 0x2ee   : > { %v3342_v50 = vmax.f32 %v3340_v9, %v3341_v7  ;;  %v3349_v15 = vmax.f32 %v3347_v22, %v3348_v60  ;;  %v3356_v38 = vmax.f32 %v3354_v33, %v3355_v26  ;;  %v3336_v54 = vrot.slane %v3335_v20, 2 }
 0x2ef   : > { %v3270_v46 = vmax.f32 %v3252_v5, 0.0 }
 0x2f0   : > { %v3343_v30 = vrot.slane %v3342_v50, 2  ;;  %v3350_v14 = vrot.slane %v3349_v15, 2  ;;  %v3357_v44 = vrot.slane %v3356_v38, 2  ;;  %v3337_v4 = vmax.f32 %v3335_v20, %v3336_v54 }
 0x2f1   : > { %v3288_v19 = vrot.slane %v3270_v46, 2  ;;  %v3289_v42 = vrot.slane %v3270_v46, 4  ;;  %v3290_v0 = vrot.slane %v3270_v46, 6  ;;  %v3361_v32 = vsel %vm804_vm1, %v3270_v46, -inf }
 0x2f2   : > { %v3362_v31 = vrot.slane %v3361_v32, 4  ;;  %v3344_v47 = vmax.f32 %v3342_v50, %v3343_v30  ;;  %v3351_v51 = vmax.f32 %v3349_v15, %v3350_v14  ;;  %v3358_v29 = vmax.f32 %v3356_v38, %v3357_v44 }
 0x2f3   : > { %v3368_v48 = vsel %vm804_vm1, %v3288_v19, -inf  ;;  %v3375_v23 = vsel %vm804_vm1, %v3289_v42, -inf  ;;  %v3382_v11 = vsel %vm804_vm1, %v3290_v0, -inf  ;;  %v3338_v24 = vrot.slane %v3337_v4, 1  ;;  %v3225_v19 = vpop.f32.mrf.mxu2  ;;  %v3254_v42 = vpop.f32.mrf.mxu3 }
 0x2f4   : > { %v3363_v41 = vmax.f32 %v3361_v32, %v3362_v31  ;;  %v3369_v58 = vrot.slane %v3368_v48, 4  ;;  %v3376_v27 = vrot.slane %v3375_v23, 4  ;;  %v3383_v43 = vrot.slane %v3382_v11, 4 }
 0x2f5   : > { %v3345_v8 = vrot.slane %v3344_v47, 1  ;;  %v3352_v39 = vrot.slane %v3351_v51, 1  ;;  %v3359_v21 = vrot.slane %v3358_v29, 1  ;;  %v3339_v17 = vmax.f32 %v3337_v4, %v3338_v24 }
 0x2f6   : > { %v3364_v40 = vrot.slane %v3363_v41, 2  ;;  %v3370_v18 = vmax.f32 %v3368_v48, %v3369_v58  ;;  %v3377_v59 = vmax.f32 %v3375_v23, %v3376_v27  ;;  %v3384_v35 = vmax.f32 %v3382_v11, %v3383_v43  ;;  %v3198_v11 = vpop.f32.mrf.mxu1 }
 0x2f7   : > { %v3346_v52 = vmax.f32 %v3344_v47, %v3345_v8  ;;  %v3353_v20 = vmax.f32 %v3351_v51, %v3352_v39  ;;  %v3360_v7 = vmax.f32 %v3358_v29, %v3359_v21  ;;  %v3197_v50 = vadd.f32 %v3196_v25, %v6852_v45  ;;  %v5576_v29 = vld [vmem:[%s7349_s5 + $0x98] sm:$0xff] }
 0x2f8   : > { %v3365_v63 = vmax.f32 %v3363_v41, %v3364_v40  ;;  %v3371_v28 = vrot.slane %v3370_v18, 2  ;;  %v3378_v61 = vrot.slane %v3377_v59, 2  ;;  %v3385_v57 = vrot.slane %v3384_v35, 2 }
 0x2f9   : > { %v3226_v0 = vadd.f32 %v3225_v19, %v3197_v50  ;;  %v3170_v58 = vadd.f32 %v6829_v37, %v6837_v16 }
 0x2fa   : > { %v3366_v13 = vrot.slane %v3365_v63, 1  ;;  %v3372_v34 = vmax.f32 %v3370_v18, %v3371_v28  ;;  %v3379_v56 = vmax.f32 %v3377_v59, %v3378_v61  ;;  %v3386_v6 = vmax.f32 %v3384_v35, %v3385_v57  ;;  %v3650_v18 = vld [vmem:[#allocation3 + $0x4] sm:$0x7] }
 0x2fb   : > { %v3255_v44 = vadd.f32 %v3254_v42, %v3226_v0  ;;  %v3199_v59 = vadd.f32 %v3198_v11, %v3170_v58  ;;  %v3227_v24 = vpop.f32.mrf.mxu2 }
 0x2fc   : > { %v3367_v53 = vmax.f32 %v3365_v63, %v3366_v13  ;;  %v3373_v9 = vrot.slane %v3372_v34, 1  ;;  %v3380_v22 = vrot.slane %v3379_v56, 1  ;;  %v3387_v33 = vrot.slane %v3386_v6, 1 }
 0x2fd   : > { %v3271_v4 = vmax.f32 %v3255_v44, 0.0  ;;  %v3228_v39 = vadd.f32 %v3227_v24, %v3199_v59 }
 0x2fe   : > { %v3374_v60 = vmax.f32 %v3372_v34, %v3373_v9  ;;  %v3381_v26 = vmax.f32 %v3379_v56, %v3380_v22  ;;  %v3388_v2 = vmax.f32 %v3386_v6, %v3387_v33  ;;  %v3557_v5 = vmax.f32 %v3339_v17, %v3367_v53  ;;  %v3256_v56 = vpop.f32.mrf.mxu3 }
 0x2ff   : > { %v3291_v43 = vrot.slane %v3271_v4, 2  ;;  %v3292_v47 = vrot.slane %v3271_v4, 4  ;;  %v3293_v51 = vrot.slane %v3271_v4, 6  ;;  %v3389_v35 = vsel %vm804_vm1, %v3271_v4, -inf }
 0x300   : > { %v3558_v15 = vmax.f32 %v3346_v52, %v3374_v60  ;;  %v3559_v38 = vmax.f32 %v3353_v20, %v3381_v26  ;;  %v3560_v46 = vmax.f32 %v3360_v7, %v3388_v2  ;;  %v3579_v54 = vpack.c.bf16 %v3557_v5, %v3557_v5 }
 0x301   : > { %v3390_v28 = vrot.slane %v3389_v35, 4  ;;  %v3396_v37 = vsel %vm804_vm1, %v3291_v43, -inf  ;;  %v3403_v16 = vsel %vm804_vm1, %v3292_v47, -inf  ;;  %v3410_v8 = vsel %vm804_vm1, %v3293_v51, -inf }
 0x302   : > { %v3580_v32 = vpack.c.bf16 %v3558_v15, %v3558_v15  ;;  %v3581_v30 = vpack.c.bf16 %v3559_v38, %v3559_v38  ;;  %v3582_v14 = vpack.c.bf16 %v3560_v46, %v3560_v46  ;;  %v3611_v31 = vunpack.c.l.b16 %v3579_v54 }
 0x303   : > { %v3397_v61 = vrot.slane %v3396_v37, 4  ;;  %v3404_v57 = vrot.slane %v3403_v16, 4  ;;  %v3391_v13 = vmax.f32 %v3389_v35, %v3390_v28  ;;  %v3411_v34 = vrot.slane %v3410_v8, 4  ;;  %v3201_v35 = vpop.f32.mrf.mxu1 }
 0x304   : > { %v3612_v48 = vunpack.c.l.b16 %v3580_v32  ;;  %v3613_v23 = vunpack.c.l.b16 %v3581_v30  ;;  %v3614_v41 = vunpack.c.l.b16 %v3582_v14  ;;  %v3257_v6 = vadd.f32 %v3256_v56, %v3228_v39 }
 0x305   : > { %v3398_v17 = vmax.f32 %v3396_v37, %v3397_v61  ;;  %v3405_v25 = vmax.f32 %v3403_v16, %v3404_v57  ;;  %v3392_v9 = vrot.slane %v3391_v13, 2  ;;  %v3412_v22 = vmax.f32 %v3410_v8, %v3411_v34 }
 0x306   : > { %v3627_v45 = vsel %vm1977_vm2, %v3612_v48, %v3611_v31  ;;  %v3272_v53 = vmax.f32 %v3257_v6, 0.0  ;;  %v3173_v34 = vadd.f32 %v6835_v36, %v6839_v62 }
 0x307   : > { %v3628_v27 = vsel %vm1979_vm3, %v3613_v23, %v3627_v45  ;;  %v3399_v20 = vrot.slane %v3398_v17, 2  ;;  %v3406_v26 = vrot.slane %v3405_v25, 2  ;;  %v3393_v15 = vmax.f32 %v3391_v13, %v3392_v9 }
 0x308   : > { %v3629_v40 = vsel %vm1981_vm4, %v3614_v41, %v3628_v27  ;;  %v3294_v33 = vrot.slane %v3272_v53, 2  ;;  %v3295_v52 = vrot.slane %v3272_v53, 4  ;;  %v3296_v7 = vrot.slane %v3272_v53, 6 }
 0x309   : > { %v3639_v63 = vpack.c.b16 %v3629_v40, %v3629_v40  ;;  %v3417_v60 = vsel %vm804_vm1, %v3272_v53, -inf  ;;  %v3413_v38 = vrot.slane %v3412_v22, 2  ;;  %v3400_v42 = vmax.f32 %v3398_v17, %v3399_v20  ;;  %v5608_v53 = vld [vmem:[%s7349_s5 + $0x198] sm:$0xff] }
 0x30a   : > { %v3418_v2 = vrot.slane %v3417_v60, 4  ;;  %v3424_v5 = vsel %vm804_vm1, %v3294_v33, -inf  ;;  %v3431_v54 = vsel %vm804_vm1, %v3295_v52, -inf  ;;  %v3438_v30 = vsel %vm804_vm1, %v3296_v7, -inf  ;;  %v3259_v7 = vpop.f32.mrf.mxu3  ;;  %4599 = vmatpush.bf16.msrb.mxu0 %v5608_v53 }
 0x30b   : > { %v3651_v21 = vsel %vm6876_vm5, %v3639_v63, %v3650_v18  ;;  %v3425_v46 = vrot.slane %v3424_v5, 4  ;;  %v3432_v32 = vrot.slane %v3431_v54, 4  ;;  %v3439_v44 = vrot.slane %v3438_v30, 4  ;;  %v3203_v62 = vpop.f32.mrf.mxu1 }
 0x30c   : > { %3652 = vst [vmem:[#allocation3 + $0x4] sm:$0x7] %v3651_v21  ;;  %v3419_v19 = vmax.f32 %v3417_v60, %v3418_v2  ;;  %v3394_v31 = vrot.slane %v3393_v15, 1  ;;  %v3407_v48 = vmax.f32 %v3405_v25, %v3406_v26  ;;  %v3414_v23 = vmax.f32 %v3412_v22, %v3413_v38  ;;  %v3230_v22 = vpop.f32.mrf.mxu2 }
 0x30d   : > { %v3426_v0 = vmax.f32 %v3424_v5, %v3425_v46  ;;  %v3433_v41 = vmax.f32 %v3431_v54, %v3432_v32  ;;  %v3440_v45 = vmax.f32 %v3438_v30, %v3439_v44  ;;  %v3401_v58 = vrot.slane %v3400_v42, 1 }
 0x30e   : > { %v3420_v14 = vrot.slane %v3419_v19, 2  ;;  %v3395_v40 = vmax.f32 %v3393_v15, %v3394_v31  ;;  %v3408_v18 = vrot.slane %v3407_v48, 1  ;;  %v3415_v59 = vrot.slane %v3414_v23, 1 }
 0x30f   : > { %v3427_v4 = vrot.slane %v3426_v0, 2  ;;  %v3434_v47 = vrot.slane %v3433_v41, 2  ;;  %v3441_v51 = vrot.slane %v3440_v45, 2  ;;  %v3402_v16 = vmax.f32 %v3400_v42, %v3401_v58 }
 0x310   : > { %v3421_v11 = vmax.f32 %v3419_v19, %v3420_v14  ;;  %v3409_v21 = vmax.f32 %v3407_v48, %v3408_v18  ;;  %v3416_v13 = vmax.f32 %v3414_v23, %v3415_v59  ;;  %v3202_v9 = vadd.f32 %v3201_v35, %v3173_v34  ;;  %v3653_v14 = vld [vmem:[#allocation3 + $0x8] sm:$0x7] }
 0x311   : > { %v3428_v43 = vmax.f32 %v3426_v0, %v3427_v4  ;;  %v3435_v28 = vmax.f32 %v3433_v41, %v3434_v47  ;;  %v3442_v37 = vmax.f32 %v3440_v45, %v3441_v51  ;;  %v3175_v54 = vadd.f32 %v6841_v49, %v6843_v12 }
 0x312   : > { %v3422_v27 = vrot.slane %v3421_v11, 1  ;;  %v3231_v60 = vadd.f32 %v3230_v22, %v3202_v9  ;;  %v3261_v47 = vpop.f32.mrf.mxu3 }
 0x313   : > { %v6889_v50 = vld [vmem:[#allocation3 + $0x4] sm:$0x7]  ;;  %v3429_v63 = vrot.slane %v3428_v43, 1  ;;  %v3436_v57 = vrot.slane %v3435_v28, 1  ;;  %v3443_v8 = vrot.slane %v3442_v37, 1  ;;  %v3204_v32 = vadd.f32 %v3203_v62, %v3175_v54 }
 0x314   : > { %3840 = vst [vmem:[#allocation1 + $0x1] ss:$4 sm:$0xff] %v6889_v50  ;;  %v3423_v24 = vmax.f32 %v3421_v11, %v3422_v27  ;;  %v3260_v15 = vadd.f32 %v3259_v7, %v3231_v60  ;;  %v3232_v23 = vpop.f32.mrf.mxu2 }
 0x315   : > { %v3430_v61 = vmax.f32 %v3428_v43, %v3429_v63  ;;  %v3437_v56 = vmax.f32 %v3435_v28, %v3436_v57  ;;  %v3444_v6 = vmax.f32 %v3442_v37, %v3443_v8  ;;  %v3233_v41 = vadd.f32 %v3232_v23, %v3204_v32 }
 0x316   : > { %v3561_v39 = vmax.f32 %v3395_v40, %v3423_v24  ;;  %v3273_v42 = vmax.f32 %v3260_v15, 0.0 }
 0x317   : > { %v3562_v17 = vmax.f32 %v3402_v16, %v3430_v61  ;;  %v3563_v33 = vmax.f32 %v3409_v21, %v3437_v56  ;;  %v3564_v52 = vmax.f32 %v3416_v13, %v3444_v6  ;;  %v3262_v18 = vadd.f32 %v3261_v47, %v3233_v41 }
 0x318   : > { %v3583_v25 = vpack.c.bf16 %v3561_v39, %v3561_v39  ;;  %v3297_v44 = vrot.slane %v3273_v42, 2  ;;  %v3298_v31 = vrot.slane %v3273_v42, 4  ;;  %v3299_v48 = vrot.slane %v3273_v42, 6 }
 0x319   : > { %v3584_v20 = vpack.c.bf16 %v3562_v17, %v3562_v17  ;;  %v3585_v26 = vpack.c.bf16 %v3563_v33, %v3563_v33  ;;  %v3586_v2 = vpack.c.bf16 %v3564_v52, %v3564_v52  ;;  %v3445_v4 = vsel %vm804_vm1, %v3273_v42, -inf }
 0x31a   : > { %v3615_v5 = vunpack.c.l.b16 %v3583_v25  ;;  %v3446_v45 = vrot.slane %v3445_v4, 4  ;;  %v3452_v58 = vsel %vm804_vm1, %v3297_v44, -inf  ;;  %v3459_v49 = vsel %vm804_vm1, %v3298_v31, -inf }
 0x31b   : > { %v3616_v36 = vunpack.c.l.b16 %v3584_v20  ;;  %v3617_v38 = vunpack.c.l.b16 %v3585_v26  ;;  %v3618_v19 = vunpack.c.l.b16 %v3586_v2  ;;  %v3453_v27 = vrot.slane %v3452_v58, 4 }
 0x31c   : > { %v3460_v43 = vrot.slane %v3459_v49, 4  ;;  %v3447_v51 = vmax.f32 %v3445_v4, %v3446_v45  ;;  %v3466_v40 = vsel %vm804_vm1, %v3299_v48, -inf  ;;  %v3274_v24 = vmax.f32 %v3262_v18, 0.0 }
 0x31d   : > { %v3630_v46 = vsel %vm1977_vm2, %v3616_v36, %v3615_v5  ;;  %v3454_v59 = vmax.f32 %v3452_v58, %v3453_v27  ;;  %v3467_v28 = vrot.slane %v3466_v40, 4 }
 0x31e   : > { %v3631_v0 = vsel %vm1979_vm3, %v3617_v38, %v3630_v46  ;;  %v3461_v35 = vmax.f32 %v3459_v49, %v3460_v43  ;;  %v3448_v63 = vrot.slane %v3447_v51, 2  ;;  %v3300_v37 = vrot.slane %v3274_v24, 2 }
 0x31f   : > { %v3632_v30 = vsel %vm1981_vm4, %v3618_v19, %v3631_v0  ;;  %v3301_v16 = vrot.slane %v3274_v24, 4  ;;  %v3455_v61 = vrot.slane %v3454_v59, 2  ;;  %v3473_v8 = vsel %vm804_vm1, %v3274_v24, -inf }
 0x320   : > { %v3640_v11 = vpack.c.b16 %v3632_v30, %v3632_v30  ;;  %v3462_v57 = vrot.slane %v3461_v35, 2  ;;  %v3474_v39 = vrot.slane %v3473_v8, 4  ;;  %v3480_v21 = vsel %vm804_vm1, %v3300_v37, -inf }
 0x321   : > { %v3487_v13 = vsel %vm804_vm1, %v3301_v16, -inf  ;;  %v3449_v56 = vmax.f32 %v3447_v51, %v3448_v63  ;;  %v3468_v6 = vmax.f32 %v3466_v40, %v3467_v28  ;;  %v3481_v17 = vrot.slane %v3480_v21, 4  ;;  %v7399_v28 = vld [vmem:[#allocation4_spill] sm:$0xff] }
 0x322   : > { %v3654_v12 = vsel %vm6876_vm5, %v3640_v11, %v3653_v14  ;;  %v3302_v25 = vrot.slane %v3274_v24, 6  ;;  %v3475_v53 = vmax.f32 %v3473_v8, %v3474_v39  ;;  %v3488_v9 = vrot.slane %v3487_v13, 4 }
 0x323   : > { %3655 = vst [vmem:[#allocation3 + $0x8] sm:$0x7] %v3654_v12  ;;  %v3456_v22 = vmax.f32 %v3454_v59, %v3455_v61  ;;  %v3463_v33 = vmax.f32 %v3461_v35, %v3462_v57  ;;  %v3482_v52 = vmax.f32 %v3480_v21, %v3481_v17  ;;  %v3450_v60 = vrot.slane %v3449_v56, 1 }
 0x324   : > { %v3476_v20 = vrot.slane %v3475_v53, 2  ;;  %v3489_v7 = vmax.f32 %v3487_v13, %v3488_v9  ;;  %v3469_v26 = vrot.slane %v3468_v6, 2  ;;  %v3494_v62 = vsel %vm804_vm1, %v3302_v25, -inf  ;;  %v3656_v9 = vld [vmem:[#allocation3 + $0xc] sm:$0x7] }
 0x325   : > { %v3483_v5 = vrot.slane %v3482_v52, 2  ;;  %v3457_v15 = vrot.slane %v3456_v22, 1  ;;  %v3464_v38 = vrot.slane %v3463_v33, 1  ;;  %v3495_v42 = vrot.slane %v3494_v62, 4 }
 0x326   : > { %v3477_v2 = vmax.f32 %v3475_v53, %v3476_v20  ;;  %v3490_v36 = vrot.slane %v3489_v7, 2  ;;  %v3451_v0 = vmax.f32 %v3449_v56, %v3450_v60  ;;  %v3470_v32 = vmax.f32 %v3468_v6, %v3469_v26 }
 0x327   : > { %v3484_v54 = vmax.f32 %v3482_v52, %v3483_v5  ;;  %v3496_v31 = vmax.f32 %v3494_v62, %v3495_v42  ;;  %v3458_v48 = vmax.f32 %v3456_v22, %v3457_v15  ;;  %v3465_v23 = vmax.f32 %v3463_v33, %v3464_v38 }
 0x328   : > { %v3478_v46 = vrot.slane %v3477_v2, 1  ;;  %v3491_v19 = vmax.f32 %v3489_v7, %v3490_v36  ;;  %v3471_v58 = vrot.slane %v3470_v32, 1  ;;  %v3672_v37 = vrot.slane %v7399_v28, 2 }
 0x329   : > { %v3485_v14 = vrot.slane %v3484_v54, 1  ;;  %v3497_v41 = vrot.slane %v3496_v31, 2  ;;  %v3673_v21 = vrot.slane %v6889_v50, 2 }
 0x32a   : > { %v6913_v34 = vld [vmem:[#allocation3 + $0x8] sm:$0x7]  ;;  %v3479_v30 = vmax.f32 %v3477_v2, %v3478_v46  ;;  %v3492_v44 = vrot.slane %v3491_v19, 1  ;;  %v3472_v18 = vmax.f32 %v3470_v32, %v3471_v58  ;;  %v6922_v39 = vsel %vm804_vm1, %v7399_v28, %v3672_v37 }
 0x32b   : > { %3842 = vst [vmem:[#allocation1 + $0x2] ss:$4 sm:$0xff] %v6913_v34  ;;  %v3486_v11 = vmax.f32 %v3484_v54, %v3485_v14  ;;  %v3498_v49 = vmax.f32 %v3496_v31, %v3497_v41  ;;  %v3674_v13 = vrot.slane %v6913_v34, 2  ;;  %v6928_v6 = vsel %vm3679_vm9, %v7399_v28, %v3672_v37 }
 0x32c   : > { %v3493_v4 = vmax.f32 %v3491_v19, %v3492_v44  ;;  %v3565_v45 = vmax.f32 %v3451_v0, %v3479_v30  ;;  %v3708_v17 = vshrl.u32 %v6922_v39, 16  ;;  %v3711_v25 = vshll.u32 %v6922_v39, 16  ;;  %v3206_v0 = vpop.f32.mrf.mxu1 }
 0x32d   : > { %v3566_v12 = vmax.f32 %v3458_v48, %v3486_v11  ;;  %v3499_v47 = vrot.slane %v3498_v49, 1  ;;  %v6935_v22 = vsel %vm804_vm1, %v6889_v50, %v3673_v21  ;;  %v6939_v52 = vsel %vm804_vm1, %v6913_v34, %v3674_v13 }
 0x32e   : > { %v3567_v27 = vmax.f32 %v3465_v23, %v3493_v4  ;;  %v3587_v43 = vpack.c.bf16 %v3565_v45, %v3565_v45  ;;  %v3682_v20 = vrot.slane %v6928_v6, 2  ;;  %v3710_v60 = vrot.slane %v3708_v17, 6 }
 0x32f   : > { %v3588_v51 = vpack.c.bf16 %v3566_v12, %v3566_v12  ;;  %v3500_v59 = vmax.f32 %v3498_v49, %v3499_v47  ;;  %v3713_v26 = vrot.slane %v3711_v25, 7  ;;  %v3721_v2 = vshrl.u32 %v6935_v22, 16 }
 0x330   : > { %v3589_v40 = vpack.c.bf16 %v3567_v27, %v3567_v27  ;;  %v3619_v35 = vunpack.c.l.b16 %v3587_v43  ;;  %v3724_v5 = vshll.u32 %v6935_v22, 16  ;;  %v3734_v36 = vshrl.u32 %v6939_v52, 16  ;;  %v3235_v43 = vpop.f32.mrf.mxu2 }
 0x331   : > { %v3620_v24 = vunpack.c.l.b16 %v3588_v51  ;;  %v3568_v16 = vmax.f32 %v3472_v18, %v3500_v59  ;;  %v3737_v62 = vshll.u32 %v6939_v52, 16  ;;  %v3717_v15 = vshll.u32 %v3682_v20, 16  ;;  %v3264_v18 = vpop.f32.mrf.mxu3 }
 0x332   : > { %v3621_v63 = vunpack.c.l.b16 %v3589_v40  ;;  %v6952_v38 = vsel %vm3679_vm9, %v6889_v50, %v3673_v21  ;;  %v3714_v46 = vor.u32 %v3713_v26, %v3710_v60  ;;  %v3723_v54 = vrot.slane %v3721_v2, 6 }
 0x333   : > { %v3633_v61 = vsel %vm1977_vm2, %v3620_v24, %v3619_v35  ;;  %v3590_v8 = vpack.c.bf16 %v3568_v16, %v3568_v16  ;;  %v3726_v19 = vrot.slane %v3724_v5, 7  ;;  %v6956_v42 = vsel %vm3679_vm9, %v6913_v34, %v3674_v13 }
 0x334   : > { %v3634_v57 = vsel %vm1979_vm3, %v3621_v63, %v3633_v61  ;;  %v3736_v32 = vrot.slane %v3734_v36, 6  ;;  %v3739_v30 = vrot.slane %v3737_v62, 7  ;;  %v3688_v14 = vrot.slane %v6952_v38, 2 }
 0x335   : > { %v3622_v56 = vunpack.c.l.b16 %v3590_v8  ;;  %v3719_v44 = vrot.slane %v3717_v15, 7  ;;  %v3694_v31 = vrot.slane %v6956_v42, 2  ;;  %v3715_v23 = vrot.slane %v3714_v46, 2 }
 0x336   : > { %v3727_v11 = vor.u32 %v3726_v19, %v3723_v54  ;;  %v3178_v4 = vadd.f32 %v6845_v55, %v6847_v1  ;;  %v3740_v45 = vor.u32 %v3739_v30, %v3736_v32  ;;  %v3730_v58 = vshll.u32 %v3688_v14, 16  ;;  %v5617_v55 = vld [vmem:[%s7349_s5 + $0x1e0] sm:$0xff] }
 0x337   : > { %v3635_v53 = vsel %vm1981_vm4, %v3622_v56, %v3634_v57  ;;  %v3743_v1 = vshll.u32 %v3694_v31, 16  ;;  %v3720_v59 = vsel %vm6977_vm15, %v3715_v23, %v3719_v44  ;;  %v3208_v57 = vpop.f32.mrf.mxu1  ;;  %v3180_v17 = vadd.f32 %v6856_v10, %v6859_v3 }
 0x338   : > { %v3641_v33 = vpack.c.b16 %v3635_v53, %v3635_v53  ;;  %v3207_v49 = vadd.f32 %v3206_v0, %v3178_v4  ;;  %v3728_v35 = vrot.slane %v3727_v11, 2  ;;  %v3741_v63 = vrot.slane %v3740_v45, 2  ;;  %v3237_v36 = vpop.f32.mrf.mxu2  ;;  %v5614_v45 = vld [vmem:[%s7349_s5 + $0x1c8] sm:$0xff] }
 0x339   : > { %v3732_v61 = vrot.slane %v3730_v58, 7  ;;  %v3745_v21 = vrot.slane %v3743_v1, 7  ;;  %v3209_v10 = vadd.f32 %v3208_v57, %v3180_v17  ;;  %v5170_v62 = vrot.slane %v6922_v39, 9  ;;  %v3266_v4 = vpop.f32.mrf.mxu3 }
 0x33a   : > { %v3657_v7 = vsel %vm6876_vm5, %v3641_v33, %v3656_v9  ;;  %v3236_v24 = vadd.f32 %v3235_v43, %v3207_v49  ;;  %v3772_v19 = vrot.slane %v3682_v20, 7  ;;  %v3776_v6 = vrot.slane %v3688_v14, 7 }
 0x33b   : > { %3658 = vst [vmem:[#allocation3 + $0xc] sm:$0x7] %v3657_v7  ;;  %v6994_v25 = vsel %vm6977_vm15, %v3728_v35, %v3732_v61  ;;  %v7004_v33 = vsel %vm6977_vm15, %v3741_v63, %v3745_v21  ;;  %v3238_v54 = vadd.f32 %v3237_v36, %v3209_v10  ;;  %v5171_v43 = vrot.slane %v6935_v22, 9 }
 0x33c   : > { %v3265_v8 = vadd.f32 %v3264_v18, %v3236_v24  ;;  %v5172_v1 = vrot.slane %v6939_v52, 9 }
 0x33e   : > { %v3275_v53 = vmax.f32 %v3265_v8, 0.0 }
 0x340   : > { %v3303_v3 = vrot.slane %v3275_v53, 2  ;;  %v3304_v26 = vrot.slane %v3275_v53, 4  ;;  %v3305_v2 = vrot.slane %v3275_v53, 6  ;;  %v3501_v5 = vsel %vm804_vm1, %v3275_v53, -inf }
 0x341   : > { %v3502_v46 = vrot.slane %v3501_v5, 4 }
 0x342   : > { %v6960_v48 = vld [vmem:[#allocation3 + $0xc] sm:$0x7]  ;;  %v3508_v0 = vsel %vm804_vm1, %v3303_v3, -inf  ;;  %v3515_v32 = vsel %vm804_vm1, %v3304_v26, -inf  ;;  %v3522_v39 = vsel %vm804_vm1, %v3305_v2, -inf }
 0x343   : > { %v3675_v41 = vrot.slane %v6960_v48, 2  ;;  %3844 = vst [vmem:[#allocation1 + $0x3] ss:$4 sm:$0xff] %v6960_v48  ;;  %v3503_v30 = vmax.f32 %v3501_v5, %v3502_v46  ;;  %v3509_v44 = vrot.slane %v3508_v0, 4  ;;  %v3516_v23 = vrot.slane %v3515_v32, 4 }
 0x344   : > { %v3523_v11 = vrot.slane %v3522_v39, 4 }
 0x345   : > { %v6970_v12 = vsel %vm804_vm1, %v6960_v48, %v3675_v41  ;;  %v6974_v27 = vsel %vm3679_vm9, %v6960_v48, %v3675_v41  ;;  %v3267_v41 = vadd.f32 %v3266_v4, %v3238_v54  ;;  %v3510_v20 = vmax.f32 %v3508_v0, %v3509_v44 }
 0x346   : > { %v3700_v47 = vrot.slane %v6974_v27, 2  ;;  %v3747_v51 = vshrl.u32 %v6970_v12, 16  ;;  %v3750_v40 = vshll.u32 %v6970_v12, 16  ;;  %v3517_v58 = vmax.f32 %v3515_v32, %v3516_v23 }
 0x347   : > { %v3524_v49 = vmax.f32 %v3522_v39, %v3523_v11  ;;  %v3773_v27 = vsel %vm7024_vm12, %v5170_v62, %v3772_v19  ;;  %v5173_v18 = vrot.slane %v6970_v12, 9  ;;  %v3504_v35 = vrot.slane %v3503_v30, 2 }
 0x348   : > { %v3749_v28 = vrot.slane %v3747_v51, 6  ;;  %v3752_v37 = vrot.slane %v3750_v40, 7  ;;  %v3756_v16 = vshll.u32 %v3700_v47, 16  ;;  %v3276_v51 = vmax.f32 %v3267_v41, 0.0 }
 0x349   : > { %v3780_v40 = vrot.slane %v3694_v31, 7  ;;  %v3511_v52 = vrot.slane %v3510_v20, 2  ;;  %v3505_v8 = vmax.f32 %v3503_v30, %v3504_v35 }
 0x34a   : > { %v3753_v13 = vor.u32 %v3752_v37, %v3749_v28  ;;  %v6988_v56 = vld.sshfl [vmem:[#allocation1] sm:$0xff pattern:$0x73625140]  ;;  %v3758_v60 = vrot.slane %v3756_v16, 7  ;;  %v3306_v38 = vrot.slane %v3276_v51, 2  ;;  %v3307_v14 = vrot.slane %v3276_v51, 4 }
 0x34b   : > { %3848 = vst [vmem:[#allocation1] ss:$4 sm:$0xff] %v3720_v59  ;;  %v3784_v59 = vrot.slane %v3700_v47, 7  ;;  %v3308_v24 = vrot.slane %v3276_v51, 6  ;;  %v3529_v63 = vsel %vm804_vm1, %v3276_v51, -inf  ;;  %v7040_v28 = vsel %vm7024_vm12, %v5171_v43, %v3776_v6 }
 0x34c   : > { %v3754_v7 = vrot.slane %v3753_v13, 2  ;;  %3851 = vst [vmem:[#allocation1 + $0x1] ss:$4 sm:$0xff] %v6994_v25  ;;  %v3518_v37 = vrot.slane %v3517_v58, 2  ;;  %v3525_v16 = vrot.slane %v3524_v49, 2  ;;  %v3530_v42 = vrot.slane %v3529_v63, 4 }
 0x34d   : > { %3854 = vst [vmem:[#allocation1 + $0x2] ss:$4 sm:$0xff] %v7004_v33  ;;  %v3536_v31 = vsel %vm804_vm1, %v3306_v38, -inf  ;;  %v3543_v12 = vsel %vm804_vm1, %v3307_v14, -inf  ;;  %v3550_v47 = vsel %vm804_vm1, %v3308_v24, -inf  ;;  %v7049_v61 = vsel %vm7024_vm12, %v5172_v1, %v3780_v40  ;;  %v5564_v24 = vld [vmem:[%s7349_s5 + $0x38] sm:$0xff] }
 0x34e   : > { %v7012_v15 = vsel %vm6977_vm15, %v3754_v7, %v3758_v60  ;;  %v7053_v57 = vsel %vm7024_vm12, %v5173_v18, %v3784_v59  ;;  %v3531_v21 = vmax.f32 %v3529_v63, %v3530_v42  ;;  %v3537_v13 = vrot.slane %v3536_v31, 4  ;;  %v5572_v63 = vld [vmem:[%s7349_s5 + $0x78] sm:$0xff]  ;;  %4511 = vmatpush.bf16.msrb.mxu1 %v5564_v24  ;;  %v5563_v42 = vld [vmem:[%s7349_s5 + $0x30] sm:$0xff] }
 0x34f   : > { %3857 = vst [vmem:[#allocation1 + $0x3] ss:$4 sm:$0xff] %v7012_v15  ;;  %v3544_v17 = vrot.slane %v3543_v12, 4  ;;  %v3551_v53 = vrot.slane %v3550_v47, 4  ;;  %v3512_v9 = vmax.f32 %v3510_v20, %v3511_v52  ;;  %v3519_v7 = vmax.f32 %v3517_v58, %v3518_v37  ;;  %4525 = vmatpush.bf16.msrb.mxu2 %v5572_v63  ;;  %v5596_v24 = vld [vmem:[%s7349_s5 + $0x138] sm:$0xff]  ;;  %v5573_v63 = vld [vmem:[%s7349_s5 + $0x80] sm:$0xff] }
 0x350   : > { %v3526_v60 = vmax.f32 %v3524_v49, %v3525_v16  ;;  %v3532_v10 = vrot.slane %v3531_v21, 2  ;;  %v3538_v3 = vmax.f32 %v3536_v31, %v3537_v13  ;;  %v3506_v5 = vrot.slane %v3505_v8, 1  ;;  %v5571_v31 = vld [vmem:[%s7349_s5 + $0x70] sm:$0xff] }
 0x351   : > { %v3545_v26 = vmax.f32 %v3543_v12, %v3544_v17  ;;  %v3552_v2 = vmax.f32 %v3550_v47, %v3551_v53  ;;  %v3513_v19 = vrot.slane %v3512_v9, 1  ;;  %v3520_v0 = vrot.slane %v3519_v7, 1  ;;  %v5580_v12 = vld [vmem:[%s7349_s5 + $0xb8] sm:$0xff]  ;;  %v5579_v13 = vld [vmem:[%s7349_s5 + $0xb0] sm:$0xff] }
 0x352   : > { %v3533_v36 = vmax.f32 %v3531_v21, %v3532_v10  ;;  %v3539_v62 = vrot.slane %v3538_v3, 2  ;;  %v3527_v32 = vrot.slane %v3526_v60, 1  ;;  %v3507_v11 = vmax.f32 %v3505_v8, %v3506_v5  ;;  %4539 = vmatpush.bf16.msrb.mxu3 %v5580_v12  ;;  %4512 = vmatpush.bf16.msrb.mxu1 %v5563_v42  ;;  %v5606_v5 = vld [vmem:[%s7349_s5 + $0x188] sm:$0xff]  ;;  %v5595_v42 = vld [vmem:[%s7349_s5 + $0x130] sm:$0xff] }
 0x353   : > { %v3546_v46 = vrot.slane %v3545_v26, 2  ;;  %v3553_v54 = vrot.slane %v3552_v2, 2  ;;  %v3514_v49 = vmax.f32 %v3512_v9, %v3513_v19  ;;  %v5562_v9 = vld [vmem:[%s7349_s5 + $0x28] sm:$0xff]  ;;  %4526 = vmatpush.bf16.msrb.mxu2 %v5571_v31  ;;  %v5560_v19 = vld [vmem:[%s7349_s5 + $0x18] sm:$0xff]  ;;  %v5603_v31 = vld [vmem:[%s7349_s5 + $0x170] sm:$0xff] }
 0x354   : > { %v3534_v39 = vrot.slane %v3533_v36, 1  ;;  %v3540_v30 = vmax.f32 %v3538_v3, %v3539_v62  ;;  %v3528_v43 = vmax.f32 %v3526_v60, %v3527_v32  ;;  %v3659_v3 = vld [vmem:[#allocation3 + $0x10] sm:$0x7]  ;;  %v5569_v62 = vld [vmem:[%s7349_s5 + $0x60] sm:$0xff]  ;;  %v5559_v32 = vld [vmem:[%s7349_s5 + $0x10] sm:$0xff] }
 0x355   : > { %v3547_v44 = vmax.f32 %v3545_v26, %v3546_v46  ;;  %v3554_v23 = vmax.f32 %v3552_v2, %v3553_v54  ;;  %v5578_v26 = vld [vmem:[%s7349_s5 + $0xa8] sm:$0xff]  ;;  %v5577_v54 = vld [vmem:[%s7349_s5 + $0xa0] sm:$0xff] }
 0x356   : > { %v7042_v22 = vld.sshfl [vmem:[#allocation1] sm:$0xff pattern:$0x73625140]  ;;  %v3535_v41 = vmax.f32 %v3533_v36, %v3534_v39  ;;  %v3541_v6 = vrot.slane %v3540_v30, 1  ;;  %4540 = vmatpush.bf16.msrb.mxu3 %v5579_v13  ;;  %4513 = vmatpush.bf16.msrb.mxu1 %v5562_v9  ;;  %v5567_v39 = vld [vmem:[%s7349_s5 + $0x50] sm:$0xff]  ;;  %v5586_v12 = vld [vmem:[%s7349_s5 + $0xe8] sm:$0xff] }
 0x357   : > { %3861 = vst [vmem:[#allocation1] ss:$4 sm:$0xff] %v3773_v27  ;;  %v3548_v20 = vrot.slane %v3547_v44, 1  ;;  %v3555_v58 = vrot.slane %v3554_v23, 1  ;;  %v3521_v27 = vmax.f32 %v3519_v7, %v3520_v0  ;;  %v5570_v7 = vld [vmem:[%s7349_s5 + $0x68] sm:$0xff]  ;;  %v5561_v36 = vld [vmem:[%s7349_s5 + $0x20] sm:$0xff] }
 0x358   : > { %3864 = vst [vmem:[#allocation1 + $0x1] ss:$4 sm:$0xff] %v7040_v28  ;;  %v3542_v1 = vmax.f32 %v3540_v30, %v3541_v6  ;;  %v3569_v18 = vmax.f32 %v3507_v11, %v3535_v41  ;;  %4527 = vmatpush.bf16.msrb.mxu2 %v5570_v7  ;;  %v5568_v0 = vld [vmem:[%s7349_s5 + $0x58] sm:$0xff]  ;;  %v5558_v6 = vld [vmem:[%s7349_s5 + $0x8] sm:$0xff]  ;;  %v5585_v13 = vld [vmem:[%s7349_s5 + $0xe0] sm:$0xff] }
 0x359   : > { %3867 = vst [vmem:[#allocation1 + $0x2] ss:$4 sm:$0xff] %v7049_v61  ;;  %v3549_v51 = vmax.f32 %v3547_v44, %v3548_v20  ;;  %v3556_v40 = vmax.f32 %v3554_v23, %v3555_v58  ;;  %v5575_v23 = vld [vmem:[%s7349_s5 + $0x90] sm:$0xff]  ;;  %v5566_v20 = vld [vmem:[%s7349_s5 + $0x48] sm:$0xff] }
 0x35a   : > { %3870 = vst [vmem:[#allocation1 + $0x3] ss:$4 sm:$0xff] %v7053_v57  ;;  %v3570_v59 = vmax.f32 %v3514_v49, %v3542_v1  ;;  %v3591_v14 = vpack.c.bf16 %v3569_v18, %v3569_v18  ;;  %4541 = vmatpush.bf16.msrb.mxu3 %v5578_v26  ;;  %4514 = vmatpush.bf16.msrb.mxu1 %v5561_v36  ;;  %v5557_v18 = vld [vmem:[%s7349_s5] sm:$0xff]  ;;  %v5600_v26 = vld [vmem:[%s7349_s5 + $0x158] sm:$0xff]  ;;  %v5591_v36 = vld [vmem:[%s7349_s5 + $0x110] sm:$0xff] }
 0x35b   : > { %v3571_v35 = vmax.f32 %v3521_v27, %v3549_v51  ;;  %v3572_v38 = vmax.f32 %v3528_v43, %v3556_v40  ;;  %v5574_v43 = vld [vmem:[%s7349_s5 + $0x88] sm:$0xff] }
 0x35c   : > { %v3592_v52 = vpack.c.bf16 %v3570_v59, %v3570_v59  ;;  %v3623_v47 = vunpack.c.l.b16 %v3591_v14  ;;  %4528 = vmatpush.bf16.msrb.mxu2 %v5569_v62  ;;  %v5565_v59 = vld [vmem:[%s7349_s5 + $0x40] sm:$0xff]  ;;  %v5588_v14 = vld [vmem:[%s7349_s5 + $0xf8] sm:$0xff] }
 0x35d   : > { %v3593_v37 = vpack.c.bf16 %v3571_v35, %v3571_v35  ;;  %v3594_v16 = vpack.c.bf16 %v3572_v38, %v3572_v38 }
 0x35e   : > { %v3624_v8 = vunpack.c.l.b16 %v3592_v52  ;;  %4542 = vmatpush.bf16.msrb.mxu3 %v5577_v54  ;;  %4515 = vmatpush.bf16.msrb.mxu1 %v5560_v19  ;;  %v5599_v19 = vld [vmem:[%s7349_s5 + $0x150] sm:$0xff] }
 0x35f   : > { %v3625_v21 = vunpack.c.l.b16 %v3593_v37  ;;  %v3626_v17 = vunpack.c.l.b16 %v3594_v16  ;;  %v5604_v37 = vld [vmem:[%s7349_s5 + $0x178] sm:$0xff]  ;;  %v5587_v16 = vld [vmem:[%s7349_s5 + $0xf0] sm:$0xff] }
 0x360   : > { %v3636_v53 = vsel %vm1977_vm2, %v3624_v8, %v3623_v47  ;;  %4529 = vmatpush.bf16.msrb.mxu2 %v5568_v0  ;;  %v5594_v47 = vld [vmem:[%s7349_s5 + $0x128] sm:$0xff] }
 0x361   : > { %v7058_v4 = vld.sshfl [vmem:[#allocation1] sm:$0xff pattern:$0x73625140]  ;;  %v3637_v60 = vsel %vm1979_vm3, %v3625_v21, %v3636_v53  ;;  %v5602_v21 = vld [vmem:[%s7349_s5 + $0x168] sm:$0xff] }
 0x362   : > { %3877 = vst [vmem:[#allocation1 + $0x2] ss:$4 sm:$0xff] %v6960_v48  ;;  %v3638_v10 = vsel %vm1981_vm4, %v3626_v17, %v3637_v60  ;;  %4543 = vmatpush.bf16.msrb.mxu3 %v5576_v29  ;;  %4516 = vmatpush.bf16.msrb.mxu1 %v5559_v32  ;;  %v5601_v60 = vld [vmem:[%s7349_s5 + $0x160] sm:$0xff]  ;;  %v5582_v29 = vld [vmem:[%s7349_s5 + $0xc8] sm:$0xff] }
 0x363   : > { %3873 = vst [vmem:[#allocation1] ss:$4 sm:$0xff] %v6889_v50  ;;  %v5607_v50 = vld [vmem:[%s7349_s5 + $0x190] sm:$0xff]  ;;  %v3642_v2 = vpack.c.b16 %v3638_v10, %v3638_v10  ;;  %v5584_v10 = vld [vmem:[%s7349_s5 + $0xd8] sm:$0xff]  ;;  %v5590_v32 = vld [vmem:[%s7349_s5 + $0x108] sm:$0xff] }
 0x364   : > { %3875 = vst [vmem:[#allocation1 + $0x1] ss:$4 sm:$0xff] %v6913_v34  ;;  %4600 = vmatpush.bf16.msrb.mxu0 %v5607_v50  ;;  %4530 = vmatpush.bf16.msrb.mxu2 %v5567_v39 }
 0x365   : > { %v3660_v46 = vsel %vm6876_vm5, %v3642_v2, %v3659_v3 }
 0x366   : > { %3661 = vst [vmem:[#allocation3 + $0x10] sm:$0x7] %v3660_v46  ;;  %4544 = vmatpush.bf16.msrb.mxu3 %v5575_v23  ;;  %4517 = vmatpush.bf16.msrb.mxu1 %v5558_v6 }
 0x368   : > { %4601 = vmatpush.bf16.msrb.mxu0 %v5606_v5  ;;  %4531 = vmatpush.bf16.msrb.mxu2 %v5566_v20  ;;  %v5583_v5 = vld [vmem:[%s7349_s5 + $0xd0] sm:$0xff] }
 0x36a   : > { %4545 = vmatpush.bf16.msrb.mxu3 %v5574_v43  ;;  %4518 = vmatpush.bf16.msrb.mxu1 %v5557_v18  ;;  %v5627_v43 = vld [vmem:[%s7349_s5 + $0x230] sm:$0xff]  ;;  %v5626_v18 = vld [vmem:[%s7349_s5 + $0x228] sm:$0xff] }
 0x36c   : > { %4532 = vmatpush.bf16.msrb.mxu2 %v5565_v59 }
 0x36d   : > { %v7125_v30 = vld [vmem:[#allocation3 + $0x10] sm:$0x7]  ;;  %4519 = vmatmul.bf16.vlgmr.msrb.gmra.mxu1 %v6988_v56  ;;  %v5605_v56 = vld [vmem:[%s7349_s5 + $0x180] sm:$0xff] }
 0x36e   : > { %v3787_v44 = vrot.slane %v7125_v30, 2  ;;  %3879 = vst [vmem:[#allocation1 + $0x3] ss:$4 sm:$0xff] %v7125_v30  ;;  %4553 = vmatpush.bf16.msra.mxu1 %v5588_v14  ;;  %4546 = vmatpush.bf16.msrb.mxu3 %v5573_v63  ;;  %v5615_v63 = vld [vmem:[%s7349_s5 + $0x1d0] sm:$0xff] }
 0x36f   : > { %4533 = vmatmul.bf16.vlgmr.msrb.gmra.mxu2 %v7042_v22  ;;  %v3667_v22 = vld [vmem:[#allocation3 + $0x14] sm:$0x7]  ;;  %4602 = vmatpush.bf16.msrb.mxu0 %v5605_v56  ;;  %v5640_v56 = vld [vmem:[%s7350_s6] ss:$0 sm:$0xff] }
 0x370   : > { %v7134_v11 = vsel %vm804_vm1, %v7125_v30, %v3787_v44  ;;  %v3791_v41 = vsel %vm3679_vm9, %v7125_v30, %v3787_v44  ;;  %4567 = vmatpush.bf16.msra.mxu2 %v5596_v24  ;;  %v3813_v9 = vrot.slane %v3667_v22, 2 }
 0x371   : > { %v3793_v58 = vrot.slane %v3791_v41, 2  ;;  %v3794_v49 = vshrl.u32 %v7134_v11, 16  ;;  %v3797_v27 = vshll.u32 %v7134_v11, 16  ;;  %4547 = vmatmul.bf16.vlgmr.msrb.gmra.mxu3 %v7058_v4  ;;  %v5593_v4 = vld [vmem:[%s7349_s5 + $0x120] sm:$0xff]  ;;  %v5174_v53 = vrot.slane %v7134_v11, 9  ;;  %v5598_v11 = vld [vmem:[%s7349_s5 + $0x148] sm:$0xff] }
 0x372   : > { %4581 = vmatpush.bf16.msra.mxu3 %v5604_v37  ;;  %4554 = vmatpush.bf16.msra.mxu1 %v5587_v16  ;;  %v7226_v3 = vsel %vm804_vm1, %v3667_v22, %v3813_v9  ;;  %v3817_v2 = vsel %vm3679_vm9, %v3667_v22, %v3813_v9  ;;  %v5581_v41 = vld [vmem:[%s7349_s5 + $0xc0] sm:$0xff] }
 0x373   : > { %v3796_v1 = vrot.slane %v3794_v49, 6  ;;  %v3799_v51 = vrot.slane %v3797_v27, 7  ;;  %v3803_v40 = vshll.u32 %v3793_v58, 16  ;;  %v3810_v8 = vrot.slane %v3793_v58, 7  ;;  %v5597_v49 = vld [vmem:[%s7349_s5 + $0x140] sm:$0xff]  ;;  %v5619_v27 = vld [vmem:[%s7349_s5 + $0x1f0] sm:$0xff] }
 0x374   : > { %4568 = vmatpush.bf16.msra.mxu2 %v5595_v42  ;;  %v3820_v62 = vshrl.u32 %v7226_v3, 16  ;;  %v3823_v46 = vshll.u32 %v7226_v3, 16  ;;  %v3819_v54 = vrot.slane %v3817_v2, 2 }
 0x375   : > { %v3800_v35 = vor.u32 %v3799_v51, %v3796_v1  ;;  %v7155_v38 = vld.sshfl [vmem:[#allocation1] sm:$0xff pattern:$0x73625140]  ;;  %v3805_v52 = vrot.slane %v3803_v40, 7  ;;  %v7212_v7 = vsel %vm7024_vm12, %v5174_v53, %v3810_v8  ;;  %v5618_v40 = vld [vmem:[%s7349_s5 + $0x1e8] sm:$0xff] }
 0x376   : > { %3882 = vst [vmem:[#allocation1] ss:$4 sm:$0xff] %v6994_v25  ;;  %4582 = vmatpush.bf16.msra.mxu3 %v5603_v31  ;;  %4555 = vmatpush.bf16.msra.mxu1 %v5586_v12  ;;  %v3822_v39 = vrot.slane %v3820_v62, 6  ;;  %v3825_v44 = vrot.slane %v3823_v46, 7  ;;  %v3829_v23 = vshll.u32 %v3819_v54, 16  ;;  %v3836_v59 = vrot.slane %v3819_v54, 7 }
 0x377   : > { %v3801_v50 = vrot.slane %v3800_v35, 2  ;;  %3884 = vst [vmem:[#allocation1 + $0x1] ss:$4 sm:$0xff] %v7004_v33  ;;  %v5616_v35 = vld [vmem:[%s7349_s5 + $0x1d8] sm:$0xff] }
 0x378   : > { %3886 = vst [vmem:[#allocation1 + $0x2] ss:$4 sm:$0xff] %v7012_v15  ;;  %4569 = vmatpush.bf16.msra.mxu2 %v5594_v47  ;;  %v3826_v6 = vor.u32 %v3825_v44, %v3822_v39  ;;  %v3831_v58 = vrot.slane %v3829_v23, 7 }
 0x379   : > { %v7174_v25 = vsel %vm6977_vm15, %v3801_v50, %v3805_v52  ;;  %v5623_v50 = vld [vmem:[%s7349_s5 + $0x210] sm:$0xff]  ;;  %v5621_v52 = vld [vmem:[%s7349_s5 + $0x200] sm:$0xff] }
 0x37a   : > { %3889 = vst [vmem:[#allocation1 + $0x3] ss:$4 sm:$0xff] %v7174_v25  ;;  %4583 = vmatpush.bf16.msra.mxu3 %v5602_v21  ;;  %4556 = vmatpush.bf16.msra.mxu1 %v5585_v13  ;;  %v3827_v20 = vrot.slane %v3826_v6, 2 }
 0x37c   : > { %4570 = vmatpush.bf16.msra.mxu2 %v5593_v4  ;;  %v3832_v51 = vsel %vm6977_vm15, %v3827_v20, %v3831_v58 }
 0x37e   : > { %4584 = vmatpush.bf16.msra.mxu3 %v5601_v60  ;;  %4557 = vmatpush.bf16.msra.mxu1 %v5584_v10 }
 0x381   : > { %v3890_v17 = vld.sshfl [vmem:[#allocation1] sm:$0xff pattern:$0x73625140] }
 0x382   : > { %3892 = vst [vmem:[#allocation1] ss:$4 sm:$0xff] %v7040_v28  ;;  %v5592_v28 = vld [vmem:[%s7349_s5 + $0x118] sm:$0xff]  ;;  %4585 = vmatpush.bf16.msra.mxu3 %v5600_v26  ;;  %4558 = vmatpush.bf16.msra.mxu1 %v5583_v5 }
 0x383   : > { %3894 = vst [vmem:[#allocation1 + $0x1] ss:$4 sm:$0xff] %v7049_v61  ;;  %4571 = vmatpush.bf16.msra.mxu2 %v5592_v28 }
 0x384   : > { %3896 = vst [vmem:[#allocation1 + $0x2] ss:$4 sm:$0xff] %v7053_v57 }
 0x385   : > { %3899 = vst [vmem:[#allocation1 + $0x3] ss:$4 sm:$0xff] %v7212_v7 }
 0x386   : > { %4586 = vmatpush.bf16.msra.mxu3 %v5599_v19  ;;  %4559 = vmatpush.bf16.msra.mxu1 %v5582_v29 }
 0x387   : > { %4572 = vmatpush.bf16.msra.mxu2 %v5591_v36 }
 0x38a   : > { %4587 = vmatpush.bf16.msra.mxu3 %v5598_v11  ;;  %4560 = vmatpush.bf16.msra.mxu1 %v5581_v41 }
 0x38b   : > { %4573 = vmatpush.bf16.msra.mxu2 %v5590_v32 }
 0x38c   : > { %v3900_v0 = vld.sshfl [vmem:[#allocation1] sm:$0xff pattern:$0x73625140] }
 0x38d   : > { %3902 = vst [vmem:[#allocation1] ss:$4 sm:$0xff] %v6913_v34  ;;  %v5589_v34 = vld [vmem:[%s7349_s5 + $0x100] sm:$0xff]  ;;  %4561 = vmatmul.bf16.vlgmr.msra.gmra.mxu1 %v7155_v38  ;;  %v5624_v38 = vld [vmem:[%s7349_s5 + $0x218] sm:$0xff] }
 0x38e   : > { %3904 = vst [vmem:[#allocation1 + $0x1] ss:$4 sm:$0xff] %v6960_v48  ;;  %v5620_v48 = vld [vmem:[%s7349_s5 + $0x1f8] sm:$0xff]  ;;  %4588 = vmatpush.bf16.msra.mxu3 %v5597_v49 }
 0x38f   : > { %3906 = vst [vmem:[#allocation1 + $0x2] ss:$4 sm:$0xff] %v7125_v30  ;;  %v5628_v30 = vld [vmem:[%s7349_s5 + $0x238] sm:$0xff]  ;;  %4574 = vmatpush.bf16.msra.mxu2 %v5589_v34  ;;  %4609 = vmatpush.bf16.msrb.mxu1 %v5620_v48 }
 0x390   : > { %3908 = vst [vmem:[#allocation1 + $0x3] ss:$4 sm:$0xff] %v3667_v22 }
 0x391   : > { %4589 = vmatmul.bf16.vlgmr.msra.gmra.mxu3 %v3900_v0 }
 0x392   : > { %4575 = vmatmul.bf16.vlgmr.msra.gmra.mxu2 %v3890_v17 }
 0x393   : > { %4623 = vmatpush.bf16.msrb.mxu2 %v5628_v30  ;;  %4610 = vmatpush.bf16.msrb.mxu1 %v5619_v27 }
 0x397   : > { %v3909_v1 = vld.sshfl [vmem:[#allocation1] sm:$0xff pattern:$0x73625140]  ;;  %4624 = vmatpush.bf16.msrb.mxu2 %v5627_v43  ;;  %4611 = vmatpush.bf16.msrb.mxu1 %v5618_v40 }
 0x398   : > { %3911 = vst [vmem:[#allocation1] ss:$4 sm:$0xff] %v7004_v33  ;;  %4603 = vmatmul.bf16.vlgmr.msrb.gmra.mxu0 %v3909_v1  ;;  %v5625_v33 = vld [vmem:[%s7349_s5 + $0x220] sm:$0xff] }
 0x399   : > { %3913 = vst [vmem:[#allocation1 + $0x1] ss:$4 sm:$0xff] %v7012_v15  ;;  %v5175_v15 = vrot.slane %v7226_v3, 9 }
 0x39a   : > { %3915 = vst [vmem:[#allocation1 + $0x2] ss:$4 sm:$0xff] %v7174_v25 }
 0x39b   : > { %3918 = vst [vmem:[#allocation1 + $0x3] ss:$4 sm:$0xff] %v3832_v51  ;;  %4625 = vmatpush.bf16.msrb.mxu2 %v5626_v18  ;;  %4612 = vmatpush.bf16.msrb.mxu1 %v5617_v55  ;;  %v3837_v24 = vsel %vm7024_vm12, %v5175_v15, %v3836_v59 }
 0x39f   : > { %4626 = vmatpush.bf16.msrb.mxu2 %v5625_v33  ;;  %4613 = vmatpush.bf16.msrb.mxu1 %v5616_v35 }
 0x3a2   : > { %v3919_v14 = vld.sshfl [vmem:[#allocation1] sm:$0xff pattern:$0x73625140] }
 0x3a3   : > { %3921 = vst [vmem:[#allocation1] ss:$4 sm:$0xff] %v7049_v61  ;;  %4627 = vmatpush.bf16.msrb.mxu2 %v5624_v38  ;;  %4614 = vmatpush.bf16.msrb.mxu1 %v5615_v63  ;;  %v5622_v61 = vld [vmem:[%s7349_s5 + $0x208] sm:$0xff] }
 0x3a4   : > { %3923 = vst [vmem:[#allocation1 + $0x1] ss:$4 sm:$0xff] %v7053_v57  ;;  %v5613_v57 = vld [vmem:[%s7349_s5 + $0x1c0] sm:$0xff] }
 0x3a5   : > { %3925 = vst [vmem:[#allocation1 + $0x2] ss:$4 sm:$0xff] %v7212_v7 }
 0x3a6   : > { %3928 = vst [vmem:[#allocation1 + $0x3] ss:$4 sm:$0xff] %v3837_v24 }
 0x3a7   : > { %4628 = vmatpush.bf16.msrb.mxu2 %v5623_v50  ;;  %4615 = vmatpush.bf16.msrb.mxu1 %v5614_v45 }
 0x3ab   : > { %4629 = vmatpush.bf16.msrb.mxu2 %v5622_v61  ;;  %4616 = vmatpush.bf16.msrb.mxu1 %v5613_v57 }
 0x3ad   : > { %v3929_v37 = vld.sshfl [vmem:[#allocation1] sm:$0xff pattern:$0x73625140] }
 0x3ae   : > { %4617 = vmatmul.bf16.vlgmr.msrb.gmra.mxu1 %v3919_v14 }
 0x3af   : > { %4630 = vmatpush.bf16.msrb.mxu2 %v5621_v52 }
 0x3b2   : > { %4631 = vmatmul.bf16.vlgmr.msrb.gmra.mxu2 %v3929_v37 }
 0x3ea   : > { %v4520_v25 = vpop.f32.mrf.mxu1 }
 0x3eb   : > { %v4521_v8 = vadd.f32 %v5640_v56, %v4520_v25 }
 0x3f2   : > { %v4534_v16 = vpop.f32.mrf.mxu2  ;;  %v4522_v42 = vpop.f32.mrf.mxu1 }
 0x3f3   : > { %v4535_v13 = vadd.f32 %v4534_v16, %v4521_v8  ;;  %v4523_v9 = vadd.f32 %v5640_v56, %v4522_v42 }
 0x3f4   : > { %v4548_v31 = vpop.f32.mrf.mxu3 }
 0x3f5   : > { %v4549_v4 = vadd.f32 %v4548_v31, %v4535_v13 }
 0x3fa   : > { %v4536_v12 = vpop.f32.mrf.mxu2 }
 0x3fb   : > { %v4537_v60 = vadd.f32 %v4536_v12, %v4523_v9 }
 0x3fc   : > { %v4550_v22 = vpop.f32.mrf.mxu3 }
 0x3fd   : > { %v4551_v3 = vadd.f32 %v4550_v22, %v4537_v60 }
 0x40a   : > { %v4562_v47 = vpop.f32.mrf.mxu1 }
 0x40b   : > { %v4563_v7 = vadd.f32 %v4562_v47, %v4549_v4 }
 0x412   : > { %v4564_v17 = vpop.f32.mrf.mxu1 }
 0x413   : > { %v4565_v36 = vadd.f32 %v4564_v17, %v4551_v3 }
 0x414   : > { %v4590_v53 = vpop.f32.mrf.mxu3 }
 0x415   : > { %v4576_v21 = vpop.f32.mrf.mxu2  ;;  %v4604_v28 = vpop.f32.mrf.mxu0 }
 0x416   : > { %v4577_v10 = vadd.f32 %v4576_v21, %v4563_v7 }
 0x418   : > { %v4591_v2 = vadd.f32 %v4590_v53, %v4577_v10 }
 0x41a   : > { %v4605_v62 = vadd.f32 %v4604_v28, %v4591_v2 }
 0x41c   : > { %v4592_v46 = vpop.f32.mrf.mxu3 }
 0x41d   : > { %v4578_v26 = vpop.f32.mrf.mxu2  ;;  %v4606_v32 = vpop.f32.mrf.mxu0 }
 0x41e   : > { %v4579_v54 = vadd.f32 %v4578_v26, %v4565_v36 }
 0x420   : > { %v4593_v0 = vadd.f32 %v4592_v46, %v4579_v54 }
 0x422   : > { %v4607_v23 = vadd.f32 %v4606_v32, %v4593_v0 }
 0x42b   : > { %v4618_v5 = vpop.f32.mrf.mxu1 }
 0x42c   : > { %v4619_v19 = vadd.f32 %v4618_v5, %v4605_v62 }
 0x433   : > { %v4620_v11 = vpop.f32.mrf.mxu1 }
 0x434   : > { %v4621_v20 = vadd.f32 %v4620_v11, %v4607_v23 }
 0x435   : > { %v4632_v29 = vpop.f32.mrf.mxu2 }
 0x436   : > { %v4633_v39 = vadd.f32 %v4632_v29, %v4619_v19 }
 0x438   : > { %v4637_v44 = vmax.f32 %v4633_v39, 0.0 }
 0x43a   : > { %v4641_v41 = vrot.slane %v4637_v44, 2  ;;  %v4642_v34 = vrot.slane %v4637_v44, 4  ;;  %v4643_v48 = vrot.slane %v4637_v44, 6  ;;  %v4653_v30 = vsel %vm804_vm1, %v4637_v44, -inf }
 0x43b   : > { %v4654_v6 = vrot.slane %v4653_v30, 4 }
 0x43c   : > { %v4660_v58 = vsel %vm804_vm1, %v4641_v41, -inf  ;;  %v4667_v49 = vsel %vm804_vm1, %v4642_v34, -inf  ;;  %v4674_v27 = vsel %vm804_vm1, %v4643_v48, -inf }
 0x43d   : > { %v4655_v43 = vmax.f32 %v4653_v30, %v4654_v6  ;;  %v4661_v1 = vrot.slane %v4660_v58, 4  ;;  %v4668_v51 = vrot.slane %v4667_v49, 4  ;;  %v4675_v40 = vrot.slane %v4674_v27, 4  ;;  %v4634_v18 = vpop.f32.mrf.mxu2 }
 0x43e   : > { %v4635_v55 = vadd.f32 %v4634_v18, %v4621_v20 }
 0x43f   : > { %v4662_v33 = vmax.f32 %v4660_v58, %v4661_v1  ;;  %v4669_v15 = vmax.f32 %v4667_v49, %v4668_v51  ;;  %v4676_v59 = vmax.f32 %v4674_v27, %v4675_v40  ;;  %v4656_v38 = vrot.slane %v4655_v43, 2 }
 0x440   : > { %v4638_v35 = vmax.f32 %v4635_v55, 0.0 }
 0x441   : > { %v4663_v14 = vrot.slane %v4662_v33, 2  ;;  %v4670_v24 = vrot.slane %v4669_v15, 2  ;;  %v4677_v63 = vrot.slane %v4676_v59, 2  ;;  %v4657_v47 = vmax.f32 %v4655_v43, %v4656_v38 }
 0x442   : > { %v4644_v50 = vrot.slane %v4638_v35, 2  ;;  %v4645_v45 = vrot.slane %v4638_v35, 4  ;;  %v4646_v61 = vrot.slane %v4638_v35, 6  ;;  %v4681_v57 = vsel %vm804_vm1, %v4638_v35, -inf }
 0x443   : > { %v4664_v52 = vmax.f32 %v4662_v33, %v4663_v14  ;;  %v4671_v37 = vmax.f32 %v4669_v15, %v4670_v24  ;;  %v4678_v25 = vmax.f32 %v4676_v59, %v4677_v63  ;;  %v4682_v16 = vrot.slane %v4681_v57, 4 }
 0x444   : > { %v4688_v42 = vsel %vm804_vm1, %v4644_v50, -inf  ;;  %v4695_v31 = vsel %vm804_vm1, %v4645_v45, -inf  ;;  %v4702_v12 = vsel %vm804_vm1, %v4646_v61, -inf  ;;  %v4658_v10 = vrot.slane %v4657_v47, 1 }
 0x445   : > { %v4683_v56 = vmax.f32 %v4681_v57, %v4682_v16  ;;  %v4689_v22 = vrot.slane %v4688_v42, 4  ;;  %v4696_v8 = vrot.slane %v4695_v31, 4  ;;  %v4703_v21 = vrot.slane %v4702_v12, 4 }
 0x446   : > { %v4665_v13 = vrot.slane %v4664_v52, 1  ;;  %v4672_v4 = vrot.slane %v4671_v37, 1  ;;  %v4679_v17 = vrot.slane %v4678_v25, 1  ;;  %v4659_v29 = vmax.f32 %v4657_v47, %v4658_v10 }
 0x447   : > { %v4684_v53 = vrot.slane %v4683_v56, 2  ;;  %v4690_v9 = vmax.f32 %v4688_v42, %v4689_v22  ;;  %v4697_v7 = vmax.f32 %v4695_v31, %v4696_v8  ;;  %v4704_v60 = vmax.f32 %v4702_v12, %v4703_v21 }
 0x448   : > { %v4666_v5 = vmax.f32 %v4664_v52, %v4665_v13  ;;  %v4673_v36 = vmax.f32 %v4671_v37, %v4672_v4  ;;  %v4680_v62 = vmax.f32 %v4678_v25, %v4679_v17  ;;  %vm4717_vm1 = vcmask 1041409  }
 0x449   : > { %v4685_v28 = vmax.f32 %v4683_v56, %v4684_v53  ;;  %v4691_v3 = vrot.slane %v4690_v9, 2  ;;  %v4698_v26 = vrot.slane %v4697_v7, 2  ;;  %v4705_v2 = vrot.slane %v4704_v60, 2 }
 0x44a   : > { %v4709_v23 = vmax.f32 %v4659_v29, %v4673_v36  ;;  %v4710_v11 = vmax.f32 %v4666_v5, %v4680_v62 }
 0x44b   : > { %v4686_v46 = vrot.slane %v4685_v28, 1  ;;  %v4692_v54 = vmax.f32 %v4690_v9, %v4691_v3  ;;  %v4699_v19 = vmax.f32 %v4697_v7, %v4698_v26  ;;  %v4706_v0 = vmax.f32 %v4704_v60, %v4705_v2 }
 0x44c   : > { %v4718_v58 = vsel %vm4717_vm1, %v4710_v11, %v4709_v23 }
 0x44d   : > { %v4693_v32 = vrot.slane %v4692_v54, 1  ;;  %v4700_v39 = vrot.slane %v4699_v19, 1  ;;  %v4707_v44 = vrot.slane %v4706_v0, 1  ;;  %v4687_v41 = vmax.f32 %v4685_v28, %v4686_v46 }
 0x44f   : > { %v4694_v34 = vmax.f32 %v4692_v54, %v4693_v32  ;;  %v4701_v48 = vmax.f32 %v4699_v19, %v4700_v39  ;;  %v4708_v30 = vmax.f32 %v4706_v0, %v4707_v44 }
 0x451   : > { %v4711_v6 = vmax.f32 %v4687_v41, %v4701_v48  ;;  %v4712_v20 = vmax.f32 %v4694_v34, %v4708_v30 }
 0x453   : > { %v4719_v49 = vsel %vm1977_vm2, %v4711_v6, %v4718_v58 }
 0x454   : > { %v4720_v27 = vsel %vm1979_vm3, %v4712_v20, %v4719_v49 }
 0x455   : > { %4722 = vst [vmem:[%s276_s22] sm:$0xf] %v4720_v27 }
 0x456 PF: > { %s17_s24 = sadd.s32 1, %s5650_s24  }
 0x457   : > { %p14_p4 = scmp.ge.s32.totalorder %s17_s24, 4  }
 0x459   :  { %16 = sbr.rel (!%p14_p4) target bundleno = 1 (0x1), region = 107 }

</bundles_post_ra>
